<compile_context>
chip_gen: v7x
topology: tpu7x:2x2x1
jax: 0.10.0
libtpu: 0.0.40
codegen_flags: <defaults>
</compile_context>

<pallas_src>
import functools

import numpy as np

import jax
import jax.numpy as jnp
from jax import lax
from jax.experimental import pallas as pl
from jax.experimental.pallas import tpu as pltpu  # noqa: F401  (TPU backend)


# ---------------------------------------------------------------------------
# Pallas kernel: the whole LeNet forward, per-sample unrolled (B is tiny)
# ---------------------------------------------------------------------------
def _lenet_kernel(x_ref, w1_ref, b1_ref, sr1_ref, sc1_ref,
                  w2_ref, b2_ref, sr2_ref, sc2_ref,
                  wf1_ref, bf1_ref, wf2_ref, bf2_ref, wf3_ref, bf3_ref,
                  o_ref, *, n_classes):
    f32 = jnp.float32
    b1 = b1_ref[...]
    sr1 = sr1_ref[...]
    sc1 = sc1_ref[...]
    b2 = b2_ref[...]
    sr2 = sr2_ref[...]
    sc2 = sc2_ref[...]
    bf1 = bf1_ref[...]
    wf2 = wf2_ref[...]
    bf2 = bf2_ref[...]
    wf3 = wf3_ref[...]
    bf3 = bf3_ref[...]

    rows = []
    for b in range(x_ref.shape[0]):
        xb = x_ref[b]                                               # (32, 32)

        # ---- conv1 (5x5, 1->6): sum over kh of band matmuls ----
        # output cols = j*6 + co   (168 used of 256, rest exactly 0)
        y1 = jnp.dot(xb[0:28, :], w1_ref[0], preferred_element_type=f32)
        for kh in range(1, 5):
            y1 = y1 + jnp.dot(xb[kh:kh + 28, :], w1_ref[kh],
                              preferred_element_type=f32)           # (28, 256)
        y1 = jnp.maximum(y1 + b1, 0.0)

        # ---- 2x2/2 max-pool: row-selection matmul + width-selection matmul ----
        z1 = jnp.dot(sr1, y1, preferred_element_type=f32)           # (28, 256)
        hp1 = jnp.maximum(z1[:14, :], z1[14:, :])                   # (14, 256)
        ws1 = jnp.dot(hp1, sc1, preferred_element_type=f32)         # (14, 256)
        a1 = jnp.maximum(ws1[:, :128], ws1[:, 128:])                # (14, 128)

        # ---- conv2 (5x5, 6->16) ----
        # output cols = j2*16 + co (160 used of 256)
        y2 = jnp.dot(a1[0:10, :], w2_ref[0], preferred_element_type=f32)
        for kh in range(1, 5):
            y2 = y2 + jnp.dot(a1[kh:kh + 10, :], w2_ref[kh],
                              preferred_element_type=f32)           # (10, 256)
        y2 = jnp.maximum(y2 + b2, 0.0)

        z2 = jnp.dot(sr2, y2, preferred_element_type=f32)           # (10, 256)
        hp2 = jnp.maximum(z2[:5, :], z2[5:, :])                     # (5, 256)
        ws2 = jnp.dot(hp2, sc2, preferred_element_type=f32)         # (5, 256)
        a2 = jnp.maximum(ws2[:, :128], ws2[:, 128:])                # (5, 128)

        # ---- FC head: fc1+ReLU -> fc2+ReLU -> fc3 ----
        h = jnp.dot(a2[0:1, :], wf1_ref[0], preferred_element_type=f32)
        for i in range(1, 5):
            h = h + jnp.dot(a2[i:i + 1, :], wf1_ref[i],
                            preferred_element_type=f32)             # (1, 128)
        h = jnp.maximum(h + bf1, 0.0)
        h = jnp.maximum(jnp.dot(h, wf2, preferred_element_type=f32) + bf2, 0.0)
        lg = jnp.dot(h, wf3, preferred_element_type=f32) + bf3      # (1, 128)
        rows.append(lg)

    logits = jnp.concatenate(rows, axis=0)                          # (B, 128)
    # mask the padded logit lanes before the row softmax
    lane = lax.broadcasted_iota(jnp.int32, logits.shape, 1)
    logits = jnp.where(lane < n_classes, logits, -1e30)
    m = jnp.max(logits, axis=-1, keepdims=True)
    s = logits - m
    lse = jnp.log(jnp.sum(jnp.exp(s), axis=-1, keepdims=True))
    o_ref[...] = (s - lse).astype(o_ref.dtype)


# ---------------------------------------------------------------------------
# Forward wrapper: one gridless pallas_call, all operands VMEM-resident
# ---------------------------------------------------------------------------
def lenet_forward(pp, x):
    # x: (B, 1, 32, 32) NCHW float32 (LeNet's 16*5*5 flatten requires 32x32)
    B = x.shape[0]
    x3 = x.reshape(B, x.shape[2], x.shape[3])            # squeeze Cin == 1

    def full(a):
        nd = a.ndim
        return pl.BlockSpec(a.shape, lambda: (0,) * nd)

    order = ["w1", "b1", "sr1", "sc1", "w2", "b2", "sr2", "sc2",
             "wf1", "bf1", "wf2", "bf2", "wf3", "bf3"]
    args = [x3] + [pp[k] for k in order]

    out = pl.pallas_call(
        functools.partial(_lenet_kernel, n_classes=10),
        out_shape=jax.ShapeDtypeStruct((B, 128), jnp.float32),
        in_specs=[full(a) for a in args],
        out_specs=pl.BlockSpec((B, 128), lambda: (0, 0)),
    )(*args)
    return out[:, :10]


# ---------------------------------------------------------------------------
# Parameters (PyTorch-style) + one-time packing for the kernel
# ---------------------------------------------------------------------------
def init_lenet_params(key):
    def uinit(key, shape, fan_in):
        bound = 1.0 / jnp.sqrt(jnp.asarray(fan_in, jnp.float32))
        return jax.random.uniform(key, shape, jnp.float32, -bound, bound)

    ks = jax.random.split(key, 10)
    return {
        "conv1_w": uinit(ks[0], (6, 1, 5, 5), 1 * 5 * 5),
        "conv1_b": uinit(ks[1], (6,), 1 * 5 * 5),
        "conv2_w": uinit(ks[2], (16, 6, 5, 5), 6 * 5 * 5),
        "conv2_b": uinit(ks[3], (16,), 6 * 5 * 5),
        "fc1_w": uinit(ks[4], (120, 400), 400),
        "fc1_b": uinit(ks[5], (120,), 400),
        "fc2_w": uinit(ks[6], (84, 120), 120),
        "fc2_b": uinit(ks[7], (84,), 120),
        "fc3_w": uinit(ks[8], (10, 84), 84),
        "fc3_b": uinit(ks[9], (10,), 84),
    }


def prepare_lenet_weights(params):
    """One-time (outside jit) packing into band / selection matrices."""
    w1 = np.asarray(params["conv1_w"], np.float32)   # (6, 1, 5, 5)
    b1 = np.asarray(params["conv1_b"], np.float32)
    w2 = np.asarray(params["conv2_w"], np.float32)   # (16, 6, 5, 5)
    b2 = np.asarray(params["conv2_b"], np.float32)
    f1w = np.asarray(params["fc1_w"], np.float32)    # (120, 400)
    f1b = np.asarray(params["fc1_b"], np.float32)
    f2w = np.asarray(params["fc2_w"], np.float32)    # (84, 120)
    f2b = np.asarray(params["fc2_b"], np.float32)
    f3w = np.asarray(params["fc3_w"], np.float32)    # (10, 84)
    f3b = np.asarray(params["fc3_b"], np.float32)

    # conv1 band weights: W1[kh, w, j*6+co] = w1[co, 0, kh, w-j], 0 <= w-j < 5
    W1 = np.zeros((5, 32, 256), np.float32)
    for kh in range(5):
        for kw in range(5):
            for j in range(28):
                W1[kh, j + kw, j * 6:(j + 1) * 6] = w1[:, 0, kh, kw]
    B1 = np.zeros((1, 256), np.float32)
    B1[0, :28 * 6] = np.tile(b1, 28)

    # 2x2 pool selections for the 28x28 conv1 map
    SR1 = np.zeros((28, 28), np.float32)              # rows: even->top, odd->bottom
    for ip in range(14):
        SR1[ip, 2 * ip] = 1.0
        SR1[14 + ip, 2 * ip + 1] = 1.0
    SC1 = np.zeros((256, 256), np.float32)            # cols: dj=0 -> [:128], dj=1 -> [128:]
    for dj in range(2):
        for jp in range(14):
            for c in range(6):
                SC1[(2 * jp + dj) * 6 + c, dj * 128 + jp * 6 + c] = 1.0

    # conv2 band weights: W2[kh, jin*6+ci, j2*16+co] = w2[co, ci, kh, jin-j2]
    W2 = np.zeros((5, 128, 256), np.float32)
    for kh in range(5):
        for kw in range(5):
            for j2 in range(10):
                jin = j2 + kw
                for ci in range(6):
                    W2[kh, jin * 6 + ci, j2 * 16:(j2 + 1) * 16] = w2[:, ci, kh, kw]
    B2 = np.zeros((1, 256), np.float32)
    B2[0, :10 * 16] = np.tile(b2, 10)

    SR2 = np.zeros((10, 10), np.float32)
    for ip in range(5):
        SR2[ip, 2 * ip] = 1.0
        SR2[5 + ip, 2 * ip + 1] = 1.0
    SC2 = np.zeros((256, 256), np.float32)
    for dj in range(2):
        for jp in range(5):
            for c in range(16):
                SC2[(2 * jp + dj) * 16 + c, dj * 128 + jp * 16 + c] = 1.0

    # fc1: PyTorch flatten order is (c, i, j); our A2 rows are i, cols j*16+c.
    WF1 = np.zeros((5, 128, 128), np.float32)
    for i in range(5):
        for j in range(5):
            for c in range(16):
                WF1[i, j * 16 + c, :120] = f1w[:, c * 25 + i * 5 + j]
    BF1 = np.zeros((1, 128), np.float32)
    BF1[0, :120] = f1b

    WF2 = np.zeros((128, 128), np.float32)
    WF2[:120, :84] = f2w.T
    BF2 = np.zeros((1, 128), np.float32)
    BF2[0, :84] = f2b
    WF3 = np.zeros((128, 128), np.float32)
    WF3[:84, :10] = f3w.T
    BF3 = np.zeros((1, 128), np.float32)
    BF3[0, :10] = f3b

    packed = dict(w1=W1, b1=B1, sr1=SR1, sc1=SC1,
                  w2=W2, b2=B2, sr2=SR2, sc2=SC2,
                  wf1=WF1, bf1=BF1, wf2=WF2, bf2=BF2, wf3=WF3, bf3=BF3)
    return {k: jnp.asarray(v) for k, v in packed.items()}


# ---------------------------------------------------------------------------
# Plain-JAX reference (correctness check only)
# ---------------------------------------------------------------------------
def lenet_reference(params, x):
    def conv(x, w, b):
        y = lax.conv_general_dilated(x, w, (1, 1), "VALID",
                                     dimension_numbers=("NCHW", "OIHW", "NCHW"))
        return y + b[None, :, None, None]

    def pool(x):
        return lax.reduce_window(x, -jnp.inf, lax.max,
                                 (1, 1, 2, 2), (1, 1, 2, 2), "VALID")

    x = jnp.maximum(conv(x, params["conv1_w"], params["conv1_b"]), 0.0)
    x = pool(x)
    x = jnp.maximum(conv(x, params["conv2_w"], params["conv2_b"]), 0.0)
    x = pool(x)
    x = x.reshape(x.shape[0], 16 * 5 * 5)
    x = jnp.maximum(x @ params["fc1_w"].T + params["fc1_b"], 0.0)
    x = jnp.maximum(x @ params["fc2_w"].T + params["fc2_b"], 0.0)
    x = x @ params["fc3_w"].T + params["fc3_b"]
    return jax.nn.log_softmax(x, axis=1)


if __name__ == "__main__":
    key = jax.random.PRNGKey(0)
    k_param, k_in = jax.random.split(key)
    params = init_lenet_params(k_param)
    prepped = prepare_lenet_weights(params)   # one-time packing, outside jit

    # LeNet's flatten to 16*5*5 requires 32x32 spatial input.
    x = jax.random.normal(k_in, (2, 1, 32, 32), dtype=jnp.float32)

    fwd = jax.jit(lenet_forward)
    out = jax.block_until_ready(fwd(prepped, x))

    assert out.shape == (2, 10)
    # log_softmax rows should sum to ~1 in probability space
    assert jnp.allclose(jnp.sum(jnp.exp(out), axis=1), 1.0, atol=1e-4)
    # compare against the plain-JAX reference (tolerance covers MXU precision)
    ref = lenet_reference(params, x)
    assert jnp.allclose(out, ref, atol=5e-2, rtol=5e-2)
    print("KERNEL_OK")
</pallas_src>

<mosaic_0001>
module attributes {stable_mosaic.version = 11 : i64} {
  func.func @_lenet_kernel(%arg0: memref<2x32x32xf32, #tpu.memory_space<vmem>>, %arg1: memref<5x32x256xf32, #tpu.memory_space<vmem>>, %arg2: memref<1x256xf32, #tpu.memory_space<vmem>>, %arg3: memref<28x28xf32, #tpu.memory_space<vmem>>, %arg4: memref<256x256xf32, #tpu.memory_space<vmem>>, %arg5: memref<5x128x256xf32, #tpu.memory_space<vmem>>, %arg6: memref<1x256xf32, #tpu.memory_space<vmem>>, %arg7: memref<10x10xf32, #tpu.memory_space<vmem>>, %arg8: memref<256x256xf32, #tpu.memory_space<vmem>>, %arg9: memref<5x128x128xf32, #tpu.memory_space<vmem>>, %arg10: memref<1x128xf32, #tpu.memory_space<vmem>>, %arg11: memref<128x128xf32, #tpu.memory_space<vmem>>, %arg12: memref<1x128xf32, #tpu.memory_space<vmem>>, %arg13: memref<128x128xf32, #tpu.memory_space<vmem>>, %arg14: memref<1x128xf32, #tpu.memory_space<vmem>>, %arg15: memref<2x128xf32, #tpu.memory_space<vmem>>) attributes {dimension_semantics = [], scalar_prefetch = 0 : i64, scratch_operands = 0 : i64, tpu.core_type = #tpu.core_type<tc>} {
    %c0 = arith.constant 0 : index
    %c0_0 = arith.constant 0 : index
    %0 = vector.load %arg2[%c0, %c0_0] : memref<1x256xf32, #tpu.memory_space<vmem>>, vector<1x256xf32>
    %c0_1 = arith.constant 0 : index
    %c0_2 = arith.constant 0 : index
    %1 = vector.load %arg3[%c0_1, %c0_2] : memref<28x28xf32, #tpu.memory_space<vmem>>, vector<28x28xf32>
    %c0_3 = arith.constant 0 : index
    %c0_4 = arith.constant 0 : index
    %2 = vector.load %arg4[%c0_3, %c0_4] : memref<256x256xf32, #tpu.memory_space<vmem>>, vector<256x256xf32>
    %c0_5 = arith.constant 0 : index
    %c0_6 = arith.constant 0 : index
    %3 = vector.load %arg6[%c0_5, %c0_6] : memref<1x256xf32, #tpu.memory_space<vmem>>, vector<1x256xf32>
    %c0_7 = arith.constant 0 : index
    %c0_8 = arith.constant 0 : index
    %4 = vector.load %arg7[%c0_7, %c0_8] : memref<10x10xf32, #tpu.memory_space<vmem>>, vector<10x10xf32>
    %c0_9 = arith.constant 0 : index
    %c0_10 = arith.constant 0 : index
    %5 = vector.load %arg8[%c0_9, %c0_10] : memref<256x256xf32, #tpu.memory_space<vmem>>, vector<256x256xf32>
    %c0_11 = arith.constant 0 : index
    %c0_12 = arith.constant 0 : index
    %6 = vector.load %arg10[%c0_11, %c0_12] : memref<1x128xf32, #tpu.memory_space<vmem>>, vector<1x128xf32>
    %c0_13 = arith.constant 0 : index
    %c0_14 = arith.constant 0 : index
    %7 = vector.load %arg11[%c0_13, %c0_14] : memref<128x128xf32, #tpu.memory_space<vmem>>, vector<128x128xf32>
    %c0_15 = arith.constant 0 : index
    %c0_16 = arith.constant 0 : index
    %8 = vector.load %arg12[%c0_15, %c0_16] : memref<1x128xf32, #tpu.memory_space<vmem>>, vector<1x128xf32>
    %c0_17 = arith.constant 0 : index
    %c0_18 = arith.constant 0 : index
    %9 = vector.load %arg13[%c0_17, %c0_18] : memref<128x128xf32, #tpu.memory_space<vmem>>, vector<128x128xf32>
    %c0_19 = arith.constant 0 : index
    %c0_20 = arith.constant 0 : index
    %10 = vector.load %arg14[%c0_19, %c0_20] : memref<1x128xf32, #tpu.memory_space<vmem>>, vector<1x128xf32>
    %c0_21 = arith.constant 0 : index
    %c0_22 = arith.constant 0 : index
    %c0_23 = arith.constant 0 : index
    %11 = vector.load %arg0[%c0_21, %c0_22, %c0_23] : memref<2x32x32xf32, #tpu.memory_space<vmem>>, vector<1x32x32xf32>
    %12 = vector.shape_cast %11 : vector<1x32x32xf32> to vector<32x32xf32>
    %13 = vector.extract_strided_slice %12 {offsets = [0, 0], sizes = [28, 32], strides = [1, 1]} : vector<32x32xf32> to vector<28x32xf32>
    %c0_24 = arith.constant 0 : index
    %c0_25 = arith.constant 0 : index
    %c0_26 = arith.constant 0 : index
    %14 = vector.load %arg1[%c0_24, %c0_25, %c0_26] : memref<5x32x256xf32, #tpu.memory_space<vmem>>, vector<1x32x256xf32>
    %15 = vector.shape_cast %14 : vector<1x32x256xf32> to vector<32x256xf32>
    %cst = arith.constant dense<0.000000e+00> : vector<28x256xf32>
    %16 = tpu.matmul %13, %15, %cst {dimension_numbers = #tpu.dot_dimension_numbers<[1], [0], [0], [1], [0, 0, 1, 1], [], []>} : vector<28x32xf32>, vector<32x256xf32>, vector<28x256xf32> -> vector<28x256xf32>
    %17 = vector.extract_strided_slice %12 {offsets = [1, 0], sizes = [28, 32], strides = [1, 1]} : vector<32x32xf32> to vector<28x32xf32>
    %c1 = arith.constant 1 : index
    %c0_27 = arith.constant 0 : index
    %c0_28 = arith.constant 0 : index
    %18 = vector.load %arg1[%c1, %c0_27, %c0_28] : memref<5x32x256xf32, #tpu.memory_space<vmem>>, vector<1x32x256xf32>
    %19 = vector.shape_cast %18 : vector<1x32x256xf32> to vector<32x256xf32>
    %cst_29 = arith.constant dense<0.000000e+00> : vector<28x256xf32>
    %20 = tpu.matmul %17, %19, %cst_29 {dimension_numbers = #tpu.dot_dimension_numbers<[1], [0], [0], [1], [0, 0, 1, 1], [], []>} : vector<28x32xf32>, vector<32x256xf32>, vector<28x256xf32> -> vector<28x256xf32>
    %21 = arith.addf %16, %20 : vector<28x256xf32>
    %22 = vector.extract_strided_slice %12 {offsets = [2, 0], sizes = [28, 32], strides = [1, 1]} : vector<32x32xf32> to vector<28x32xf32>
    %c2 = arith.constant 2 : index
    %c0_30 = arith.constant 0 : index
    %c0_31 = arith.constant 0 : index
    %23 = vector.load %arg1[%c2, %c0_30, %c0_31] : memref<5x32x256xf32, #tpu.memory_space<vmem>>, vector<1x32x256xf32>
    %24 = vector.shape_cast %23 : vector<1x32x256xf32> to vector<32x256xf32>
    %cst_32 = arith.constant dense<0.000000e+00> : vector<28x256xf32>
    %25 = tpu.matmul %22, %24, %cst_32 {dimension_numbers = #tpu.dot_dimension_numbers<[1], [0], [0], [1], [0, 0, 1, 1], [], []>} : vector<28x32xf32>, vector<32x256xf32>, vector<28x256xf32> -> vector<28x256xf32>
    %26 = arith.addf %21, %25 : vector<28x256xf32>
    %27 = vector.extract_strided_slice %12 {offsets = [3, 0], sizes = [28, 32], strides = [1, 1]} : vector<32x32xf32> to vector<28x32xf32>
    %c3 = arith.constant 3 : index
    %c0_33 = arith.constant 0 : index
    %c0_34 = arith.constant 0 : index
    %28 = vector.load %arg1[%c3, %c0_33, %c0_34] : memref<5x32x256xf32, #tpu.memory_space<vmem>>, vector<1x32x256xf32>
    %29 = vector.shape_cast %28 : vector<1x32x256xf32> to vector<32x256xf32>
    %cst_35 = arith.constant dense<0.000000e+00> : vector<28x256xf32>
    %30 = tpu.matmul %27, %29, %cst_35 {dimension_numbers = #tpu.dot_dimension_numbers<[1], [0], [0], [1], [0, 0, 1, 1], [], []>} : vector<28x32xf32>, vector<32x256xf32>, vector<28x256xf32> -> vector<28x256xf32>
    %31 = arith.addf %26, %30 : vector<28x256xf32>
    %32 = vector.extract_strided_slice %12 {offsets = [4, 0], sizes = [28, 32], strides = [1, 1]} : vector<32x32xf32> to vector<28x32xf32>
    %c4 = arith.constant 4 : index
    %c0_36 = arith.constant 0 : index
    %c0_37 = arith.constant 0 : index
    %33 = vector.load %arg1[%c4, %c0_36, %c0_37] : memref<5x32x256xf32, #tpu.memory_space<vmem>>, vector<1x32x256xf32>
    %34 = vector.shape_cast %33 : vector<1x32x256xf32> to vector<32x256xf32>
    %cst_38 = arith.constant dense<0.000000e+00> : vector<28x256xf32>
    %35 = tpu.matmul %32, %34, %cst_38 {dimension_numbers = #tpu.dot_dimension_numbers<[1], [0], [0], [1], [0, 0, 1, 1], [], []>} : vector<28x32xf32>, vector<32x256xf32>, vector<28x256xf32> -> vector<28x256xf32>
    %36 = arith.addf %31, %35 : vector<28x256xf32>
    %37 = vector.broadcast %0 : vector<1x256xf32> to vector<28x256xf32>
    %38 = arith.addf %36, %37 : vector<28x256xf32>
    %cst_39 = arith.constant 0.000000e+00 : f32
    %39 = vector.broadcast %cst_39 : f32 to vector<28x256xf32>
    %40 = arith.maximumf %38, %39 : vector<28x256xf32>
    %cst_40 = arith.constant dense<0.000000e+00> : vector<28x256xf32>
    %41 = tpu.matmul %1, %40, %cst_40 {dimension_numbers = #tpu.dot_dimension_numbers<[1], [0], [0], [1], [0, 0, 1, 1], [], []>} : vector<28x28xf32>, vector<28x256xf32>, vector<28x256xf32> -> vector<28x256xf32>
    %42 = vector.extract_strided_slice %41 {offsets = [0, 0], sizes = [14, 256], strides = [1, 1]} : vector<28x256xf32> to vector<14x256xf32>
    %43 = vector.extract_strided_slice %41 {offsets = [14, 0], sizes = [14, 256], strides = [1, 1]} : vector<28x256xf32> to vector<14x256xf32>
    %44 = arith.maximumf %42, %43 : vector<14x256xf32>
    %cst_41 = arith.constant dense<0.000000e+00> : vector<14x256xf32>
    %45 = tpu.matmul %44, %2, %cst_41 {dimension_numbers = #tpu.dot_dimension_numbers<[1], [0], [0], [1], [0, 0, 1, 1], [], []>} : vector<14x256xf32>, vector<256x256xf32>, vector<14x256xf32> -> vector<14x256xf32>
    %46 = vector.extract_strided_slice %45 {offsets = [0, 0], sizes = [14, 128], strides = [1, 1]} : vector<14x256xf32> to vector<14x128xf32>
    %47 = vector.extract_strided_slice %45 {offsets = [0, 128], sizes = [14, 128], strides = [1, 1]} : vector<14x256xf32> to vector<14x128xf32>
    %48 = arith.maximumf %46, %47 : vector<14x128xf32>
    %49 = vector.extract_strided_slice %48 {offsets = [0, 0], sizes = [10, 128], strides = [1, 1]} : vector<14x128xf32> to vector<10x128xf32>
    %c0_42 = arith.constant 0 : index
    %c0_43 = arith.constant 0 : index
    %c0_44 = arith.constant 0 : index
    %50 = vector.load %arg5[%c0_42, %c0_43, %c0_44] : memref<5x128x256xf32, #tpu.memory_space<vmem>>, vector<1x128x256xf32>
    %51 = vector.shape_cast %50 : vector<1x128x256xf32> to vector<128x256xf32>
    %cst_45 = arith.constant dense<0.000000e+00> : vector<10x256xf32>
    %52 = tpu.matmul %49, %51, %cst_45 {dimension_numbers = #tpu.dot_dimension_numbers<[1], [0], [0], [1], [0, 0, 1, 1], [], []>} : vector<10x128xf32>, vector<128x256xf32>, vector<10x256xf32> -> vector<10x256xf32>
    %53 = vector.extract_strided_slice %48 {offsets = [1, 0], sizes = [10, 128], strides = [1, 1]} : vector<14x128xf32> to vector<10x128xf32>
    %c1_46 = arith.constant 1 : index
    %c0_47 = arith.constant 0 : index
    %c0_48 = arith.constant 0 : index
    %54 = vector.load %arg5[%c1_46, %c0_47, %c0_48] : memref<5x128x256xf32, #tpu.memory_space<vmem>>, vector<1x128x256xf32>
    %55 = vector.shape_cast %54 : vector<1x128x256xf32> to vector<128x256xf32>
    %cst_49 = arith.constant dense<0.000000e+00> : vector<10x256xf32>
    %56 = tpu.matmul %53, %55, %cst_49 {dimension_numbers = #tpu.dot_dimension_numbers<[1], [0], [0], [1], [0, 0, 1, 1], [], []>} : vector<10x128xf32>, vector<128x256xf32>, vector<10x256xf32> -> vector<10x256xf32>
    %57 = arith.addf %52, %56 : vector<10x256xf32>
    %58 = vector.extract_strided_slice %48 {offsets = [2, 0], sizes = [10, 128], strides = [1, 1]} : vector<14x128xf32> to vector<10x128xf32>
    %c2_50 = arith.constant 2 : index
    %c0_51 = arith.constant 0 : index
    %c0_52 = arith.constant 0 : index
    %59 = vector.load %arg5[%c2_50, %c0_51, %c0_52] : memref<5x128x256xf32, #tpu.memory_space<vmem>>, vector<1x128x256xf32>
    %60 = vector.shape_cast %59 : vector<1x128x256xf32> to vector<128x256xf32>
    %cst_53 = arith.constant dense<0.000000e+00> : vector<10x256xf32>
    %61 = tpu.matmul %58, %60, %cst_53 {dimension_numbers = #tpu.dot_dimension_numbers<[1], [0], [0], [1], [0, 0, 1, 1], [], []>} : vector<10x128xf32>, vector<128x256xf32>, vector<10x256xf32> -> vector<10x256xf32>
    %62 = arith.addf %57, %61 : vector<10x256xf32>
    %63 = vector.extract_strided_slice %48 {offsets = [3, 0], sizes = [10, 128], strides = [1, 1]} : vector<14x128xf32> to vector<10x128xf32>
    %c3_54 = arith.constant 3 : index
    %c0_55 = arith.constant 0 : index
    %c0_56 = arith.constant 0 : index
    %64 = vector.load %arg5[%c3_54, %c0_55, %c0_56] : memref<5x128x256xf32, #tpu.memory_space<vmem>>, vector<1x128x256xf32>
    %65 = vector.shape_cast %64 : vector<1x128x256xf32> to vector<128x256xf32>
    %cst_57 = arith.constant dense<0.000000e+00> : vector<10x256xf32>
    %66 = tpu.matmul %63, %65, %cst_57 {dimension_numbers = #tpu.dot_dimension_numbers<[1], [0], [0], [1], [0, 0, 1, 1], [], []>} : vector<10x128xf32>, vector<128x256xf32>, vector<10x256xf32> -> vector<10x256xf32>
    %67 = arith.addf %62, %66 : vector<10x256xf32>
    %68 = vector.extract_strided_slice %48 {offsets = [4, 0], sizes = [10, 128], strides = [1, 1]} : vector<14x128xf32> to vector<10x128xf32>
    %c4_58 = arith.constant 4 : index
    %c0_59 = arith.constant 0 : index
    %c0_60 = arith.constant 0 : index
    %69 = vector.load %arg5[%c4_58, %c0_59, %c0_60] : memref<5x128x256xf32, #tpu.memory_space<vmem>>, vector<1x128x256xf32>
    %70 = vector.shape_cast %69 : vector<1x128x256xf32> to vector<128x256xf32>
    %cst_61 = arith.constant dense<0.000000e+00> : vector<10x256xf32>
    %71 = tpu.matmul %68, %70, %cst_61 {dimension_numbers = #tpu.dot_dimension_numbers<[1], [0], [0], [1], [0, 0, 1, 1], [], []>} : vector<10x128xf32>, vector<128x256xf32>, vector<10x256xf32> -> vector<10x256xf32>
    %72 = arith.addf %67, %71 : vector<10x256xf32>
    %73 = vector.broadcast %3 : vector<1x256xf32> to vector<10x256xf32>
    %74 = arith.addf %72, %73 : vector<10x256xf32>
    %cst_62 = arith.constant 0.000000e+00 : f32
    %75 = vector.broadcast %cst_62 : f32 to vector<10x256xf32>
    %76 = arith.maximumf %74, %75 : vector<10x256xf32>
    %cst_63 = arith.constant dense<0.000000e+00> : vector<10x256xf32>
    %77 = tpu.matmul %4, %76, %cst_63 {dimension_numbers = #tpu.dot_dimension_numbers<[1], [0], [0], [1], [0, 0, 1, 1], [], []>} : vector<10x10xf32>, vector<10x256xf32>, vector<10x256xf32> -> vector<10x256xf32>
    %78 = vector.extract_strided_slice %77 {offsets = [0, 0], sizes = [5, 256], strides = [1, 1]} : vector<10x256xf32> to vector<5x256xf32>
    %79 = vector.extract_strided_slice %77 {offsets = [5, 0], sizes = [5, 256], strides = [1, 1]} : vector<10x256xf32> to vector<5x256xf32>
    %80 = arith.maximumf %78, %79 : vector<5x256xf32>
    %cst_64 = arith.constant dense<0.000000e+00> : vector<5x256xf32>
    %81 = tpu.matmul %80, %5, %cst_64 {dimension_numbers = #tpu.dot_dimension_numbers<[1], [0], [0], [1], [0, 0, 1, 1], [], []>} : vector<5x256xf32>, vector<256x256xf32>, vector<5x256xf32> -> vector<5x256xf32>
    %82 = vector.extract_strided_slice %81 {offsets = [0, 0], sizes = [5, 128], strides = [1, 1]} : vector<5x256xf32> to vector<5x128xf32>
    %83 = vector.extract_strided_slice %81 {offsets = [0, 128], sizes = [5, 128], strides = [1, 1]} : vector<5x256xf32> to vector<5x128xf32>
    %84 = arith.maximumf %82, %83 : vector<5x128xf32>
    %85 = vector.extract_strided_slice %84 {offsets = [0, 0], sizes = [1, 128], strides = [1, 1]} : vector<5x128xf32> to vector<1x128xf32>
    %c0_65 = arith.constant 0 : index
    %c0_66 = arith.constant 0 : index
    %c0_67 = arith.constant 0 : index
    %86 = vector.load %arg9[%c0_65, %c0_66, %c0_67] : memref<5x128x128xf32, #tpu.memory_space<vmem>>, vector<1x128x128xf32>
    %87 = vector.shape_cast %86 : vector<1x128x128xf32> to vector<128x128xf32>
    %cst_68 = arith.constant dense<0.000000e+00> : vector<1x128xf32>
    %88 = tpu.matmul %85, %87, %cst_68 {dimension_numbers = #tpu.dot_dimension_numbers<[1], [0], [0], [1], [0, 0, 1, 1], [], []>} : vector<1x128xf32>, vector<128x128xf32>, vector<1x128xf32> -> vector<1x128xf32>
    %89 = vector.extract_strided_slice %84 {offsets = [1, 0], sizes = [1, 128], strides = [1, 1]} : vector<5x128xf32> to vector<1x128xf32>
    %c1_69 = arith.constant 1 : index
    %c0_70 = arith.constant 0 : index
    %c0_71 = arith.constant 0 : index
    %90 = vector.load %arg9[%c1_69, %c0_70, %c0_71] : memref<5x128x128xf32, #tpu.memory_space<vmem>>, vector<1x128x128xf32>
    %91 = vector.shape_cast %90 : vector<1x128x128xf32> to vector<128x128xf32>
    %cst_72 = arith.constant dense<0.000000e+00> : vector<1x128xf32>
    %92 = tpu.matmul %89, %91, %cst_72 {dimension_numbers = #tpu.dot_dimension_numbers<[1], [0], [0], [1], [0, 0, 1, 1], [], []>} : vector<1x128xf32>, vector<128x128xf32>, vector<1x128xf32> -> vector<1x128xf32>
    %93 = arith.addf %88, %92 : vector<1x128xf32>
    %94 = vector.extract_strided_slice %84 {offsets = [2, 0], sizes = [1, 128], strides = [1, 1]} : vector<5x128xf32> to vector<1x128xf32>
    %c2_73 = arith.constant 2 : index
    %c0_74 = arith.constant 0 : index
    %c0_75 = arith.constant 0 : index
    %95 = vector.load %arg9[%c2_73, %c0_74, %c0_75] : memref<5x128x128xf32, #tpu.memory_space<vmem>>, vector<1x128x128xf32>
    %96 = vector.shape_cast %95 : vector<1x128x128xf32> to vector<128x128xf32>
    %cst_76 = arith.constant dense<0.000000e+00> : vector<1x128xf32>
    %97 = tpu.matmul %94, %96, %cst_76 {dimension_numbers = #tpu.dot_dimension_numbers<[1], [0], [0], [1], [0, 0, 1, 1], [], []>} : vector<1x128xf32>, vector<128x128xf32>, vector<1x128xf32> -> vector<1x128xf32>
    %98 = arith.addf %93, %97 : vector<1x128xf32>
    %99 = vector.extract_strided_slice %84 {offsets = [3, 0], sizes = [1, 128], strides = [1, 1]} : vector<5x128xf32> to vector<1x128xf32>
    %c3_77 = arith.constant 3 : index
    %c0_78 = arith.constant 0 : index
    %c0_79 = arith.constant 0 : index
    %100 = vector.load %arg9[%c3_77, %c0_78, %c0_79] : memref<5x128x128xf32, #tpu.memory_space<vmem>>, vector<1x128x128xf32>
    %101 = vector.shape_cast %100 : vector<1x128x128xf32> to vector<128x128xf32>
    %cst_80 = arith.constant dense<0.000000e+00> : vector<1x128xf32>
    %102 = tpu.matmul %99, %101, %cst_80 {dimension_numbers = #tpu.dot_dimension_numbers<[1], [0], [0], [1], [0, 0, 1, 1], [], []>} : vector<1x128xf32>, vector<128x128xf32>, vector<1x128xf32> -> vector<1x128xf32>
    %103 = arith.addf %98, %102 : vector<1x128xf32>
    %104 = vector.extract_strided_slice %84 {offsets = [4, 0], sizes = [1, 128], strides = [1, 1]} : vector<5x128xf32> to vector<1x128xf32>
    %c4_81 = arith.constant 4 : index
    %c0_82 = arith.constant 0 : index
    %c0_83 = arith.constant 0 : index
    %105 = vector.load %arg9[%c4_81, %c0_82, %c0_83] : memref<5x128x128xf32, #tpu.memory_space<vmem>>, vector<1x128x128xf32>
    %106 = vector.shape_cast %105 : vector<1x128x128xf32> to vector<128x128xf32>
    %cst_84 = arith.constant dense<0.000000e+00> : vector<1x128xf32>
    %107 = tpu.matmul %104, %106, %cst_84 {dimension_numbers = #tpu.dot_dimension_numbers<[1], [0], [0], [1], [0, 0, 1, 1], [], []>} : vector<1x128xf32>, vector<128x128xf32>, vector<1x128xf32> -> vector<1x128xf32>
    %108 = arith.addf %103, %107 : vector<1x128xf32>
    %109 = arith.addf %108, %6 : vector<1x128xf32>
    %cst_85 = arith.constant 0.000000e+00 : f32
    %110 = vector.broadcast %cst_85 : f32 to vector<1x128xf32>
    %111 = arith.maximumf %109, %110 : vector<1x128xf32>
    %cst_86 = arith.constant dense<0.000000e+00> : vector<1x128xf32>
    %112 = tpu.matmul %111, %7, %cst_86 {dimension_numbers = #tpu.dot_dimension_numbers<[1], [0], [0], [1], [0, 0, 1, 1], [], []>} : vector<1x128xf32>, vector<128x128xf32>, vector<1x128xf32> -> vector<1x128xf32>
    %113 = arith.addf %112, %8 : vector<1x128xf32>
    %cst_87 = arith.constant 0.000000e+00 : f32
    %114 = vector.broadcast %cst_87 : f32 to vector<1x128xf32>
    %115 = arith.maximumf %113, %114 : vector<1x128xf32>
    %cst_88 = arith.constant dense<0.000000e+00> : vector<1x128xf32>
    %116 = tpu.matmul %115, %9, %cst_88 {dimension_numbers = #tpu.dot_dimension_numbers<[1], [0], [0], [1], [0, 0, 1, 1], [], []>} : vector<1x128xf32>, vector<128x128xf32>, vector<1x128xf32> -> vector<1x128xf32>
    %117 = arith.addf %116, %10 : vector<1x128xf32>
    %c1_89 = arith.constant 1 : index
    %c0_90 = arith.constant 0 : index
    %c0_91 = arith.constant 0 : index
    %118 = vector.load %arg0[%c1_89, %c0_90, %c0_91] : memref<2x32x32xf32, #tpu.memory_space<vmem>>, vector<1x32x32xf32>
    %119 = vector.shape_cast %118 : vector<1x32x32xf32> to vector<32x32xf32>
    %120 = vector.extract_strided_slice %119 {offsets = [0, 0], sizes = [28, 32], strides = [1, 1]} : vector<32x32xf32> to vector<28x32xf32>
    %c0_92 = arith.constant 0 : index
    %c0_93 = arith.constant 0 : index
    %c0_94 = arith.constant 0 : index
    %121 = vector.load %arg1[%c0_92, %c0_93, %c0_94] : memref<5x32x256xf32, #tpu.memory_space<vmem>>, vector<1x32x256xf32>
    %122 = vector.shape_cast %121 : vector<1x32x256xf32> to vector<32x256xf32>
    %cst_95 = arith.constant dense<0.000000e+00> : vector<28x256xf32>
    %123 = tpu.matmul %120, %122, %cst_95 {dimension_numbers = #tpu.dot_dimension_numbers<[1], [0], [0], [1], [0, 0, 1, 1], [], []>} : vector<28x32xf32>, vector<32x256xf32>, vector<28x256xf32> -> vector<28x256xf32>
    %124 = vector.extract_strided_slice %119 {offsets = [1, 0], sizes = [28, 32], strides = [1, 1]} : vector<32x32xf32> to vector<28x32xf32>
    %c1_96 = arith.constant 1 : index
    %c0_97 = arith.constant 0 : index
    %c0_98 = arith.constant 0 : index
    %125 = vector.load %arg1[%c1_96, %c0_97, %c0_98] : memref<5x32x256xf32, #tpu.memory_space<vmem>>, vector<1x32x256xf32>
    %126 = vector.shape_cast %125 : vector<1x32x256xf32> to vector<32x256xf32>
    %cst_99 = arith.constant dense<0.000000e+00> : vector<28x256xf32>
    %127 = tpu.matmul %124, %126, %cst_99 {dimension_numbers = #tpu.dot_dimension_numbers<[1], [0], [0], [1], [0, 0, 1, 1], [], []>} : vector<28x32xf32>, vector<32x256xf32>, vector<28x256xf32> -> vector<28x256xf32>
    %128 = arith.addf %123, %127 : vector<28x256xf32>
    %129 = vector.extract_strided_slice %119 {offsets = [2, 0], sizes = [28, 32], strides = [1, 1]} : vector<32x32xf32> to vector<28x32xf32>
    %c2_100 = arith.constant 2 : index
    %c0_101 = arith.constant 0 : index
    %c0_102 = arith.constant 0 : index
    %130 = vector.load %arg1[%c2_100, %c0_101, %c0_102] : memref<5x32x256xf32, #tpu.memory_space<vmem>>, vector<1x32x256xf32>
    %131 = vector.shape_cast %130 : vector<1x32x256xf32> to vector<32x256xf32>
    %cst_103 = arith.constant dense<0.000000e+00> : vector<28x256xf32>
    %132 = tpu.matmul %129, %131, %cst_103 {dimension_numbers = #tpu.dot_dimension_numbers<[1], [0], [0], [1], [0, 0, 1, 1], [], []>} : vector<28x32xf32>, vector<32x256xf32>, vector<28x256xf32> -> vector<28x256xf32>
    %133 = arith.addf %128, %132 : vector<28x256xf32>
    %134 = vector.extract_strided_slice %119 {offsets = [3, 0], sizes = [28, 32], strides = [1, 1]} : vector<32x32xf32> to vector<28x32xf32>
    %c3_104 = arith.constant 3 : index
    %c0_105 = arith.constant 0 : index
    %c0_106 = arith.constant 0 : index
    %135 = vector.load %arg1[%c3_104, %c0_105, %c0_106] : memref<5x32x256xf32, #tpu.memory_space<vmem>>, vector<1x32x256xf32>
    %136 = vector.shape_cast %135 : vector<1x32x256xf32> to vector<32x256xf32>
    %cst_107 = arith.constant dense<0.000000e+00> : vector<28x256xf32>
    %137 = tpu.matmul %134, %136, %cst_107 {dimension_numbers = #tpu.dot_dimension_numbers<[1], [0], [0], [1], [0, 0, 1, 1], [], []>} : vector<28x32xf32>, vector<32x256xf32>, vector<28x256xf32> -> vector<28x256xf32>
    %138 = arith.addf %133, %137 : vector<28x256xf32>
    %139 = vector.extract_strided_slice %119 {offsets = [4, 0], sizes = [28, 32], strides = [1, 1]} : vector<32x32xf32> to vector<28x32xf32>
    %c4_108 = arith.constant 4 : index
    %c0_109 = arith.constant 0 : index
    %c0_110 = arith.constant 0 : index
    %140 = vector.load %arg1[%c4_108, %c0_109, %c0_110] : memref<5x32x256xf32, #tpu.memory_space<vmem>>, vector<1x32x256xf32>
    %141 = vector.shape_cast %140 : vector<1x32x256xf32> to vector<32x256xf32>
    %cst_111 = arith.constant dense<0.000000e+00> : vector<28x256xf32>
    %142 = tpu.matmul %139, %141, %cst_111 {dimension_numbers = #tpu.dot_dimension_numbers<[1], [0], [0], [1], [0, 0, 1, 1], [], []>} : vector<28x32xf32>, vector<32x256xf32>, vector<28x256xf32> -> vector<28x256xf32>
    %143 = arith.addf %138, %142 : vector<28x256xf32>
    %144 = vector.broadcast %0 : vector<1x256xf32> to vector<28x256xf32>
    %145 = arith.addf %143, %144 : vector<28x256xf32>
    %cst_112 = arith.constant 0.000000e+00 : f32
    %146 = vector.broadcast %cst_112 : f32 to vector<28x256xf32>
    %147 = arith.maximumf %145, %146 : vector<28x256xf32>
    %cst_113 = arith.constant dense<0.000000e+00> : vector<28x256xf32>
    %148 = tpu.matmul %1, %147, %cst_113 {dimension_numbers = #tpu.dot_dimension_numbers<[1], [0], [0], [1], [0, 0, 1, 1], [], []>} : vector<28x28xf32>, vector<28x256xf32>, vector<28x256xf32> -> vector<28x256xf32>
    %149 = vector.extract_strided_slice %148 {offsets = [0, 0], sizes = [14, 256], strides = [1, 1]} : vector<28x256xf32> to vector<14x256xf32>
    %150 = vector.extract_strided_slice %148 {offsets = [14, 0], sizes = [14, 256], strides = [1, 1]} : vector<28x256xf32> to vector<14x256xf32>
    %151 = arith.maximumf %149, %150 : vector<14x256xf32>
    %cst_114 = arith.constant dense<0.000000e+00> : vector<14x256xf32>
    %152 = tpu.matmul %151, %2, %cst_114 {dimension_numbers = #tpu.dot_dimension_numbers<[1], [0], [0], [1], [0, 0, 1, 1], [], []>} : vector<14x256xf32>, vector<256x256xf32>, vector<14x256xf32> -> vector<14x256xf32>
    %153 = vector.extract_strided_slice %152 {offsets = [0, 0], sizes = [14, 128], strides = [1, 1]} : vector<14x256xf32> to vector<14x128xf32>
    %154 = vector.extract_strided_slice %152 {offsets = [0, 128], sizes = [14, 128], strides = [1, 1]} : vector<14x256xf32> to vector<14x128xf32>
    %155 = arith.maximumf %153, %154 : vector<14x128xf32>
    %156 = vector.extract_strided_slice %155 {offsets = [0, 0], sizes = [10, 128], strides = [1, 1]} : vector<14x128xf32> to vector<10x128xf32>
    %c0_115 = arith.constant 0 : index
    %c0_116 = arith.constant 0 : index
    %c0_117 = arith.constant 0 : index
    %157 = vector.load %arg5[%c0_115, %c0_116, %c0_117] : memref<5x128x256xf32, #tpu.memory_space<vmem>>, vector<1x128x256xf32>
    %158 = vector.shape_cast %157 : vector<1x128x256xf32> to vector<128x256xf32>
    %cst_118 = arith.constant dense<0.000000e+00> : vector<10x256xf32>
    %159 = tpu.matmul %156, %158, %cst_118 {dimension_numbers = #tpu.dot_dimension_numbers<[1], [0], [0], [1], [0, 0, 1, 1], [], []>} : vector<10x128xf32>, vector<128x256xf32>, vector<10x256xf32> -> vector<10x256xf32>
    %160 = vector.extract_strided_slice %155 {offsets = [1, 0], sizes = [10, 128], strides = [1, 1]} : vector<14x128xf32> to vector<10x128xf32>
    %c1_119 = arith.constant 1 : index
    %c0_120 = arith.constant 0 : index
    %c0_121 = arith.constant 0 : index
    %161 = vector.load %arg5[%c1_119, %c0_120, %c0_121] : memref<5x128x256xf32, #tpu.memory_space<vmem>>, vector<1x128x256xf32>
    %162 = vector.shape_cast %161 : vector<1x128x256xf32> to vector<128x256xf32>
    %cst_122 = arith.constant dense<0.000000e+00> : vector<10x256xf32>
    %163 = tpu.matmul %160, %162, %cst_122 {dimension_numbers = #tpu.dot_dimension_numbers<[1], [0], [0], [1], [0, 0, 1, 1], [], []>} : vector<10x128xf32>, vector<128x256xf32>, vector<10x256xf32> -> vector<10x256xf32>
    %164 = arith.addf %159, %163 : vector<10x256xf32>
    %165 = vector.extract_strided_slice %155 {offsets = [2, 0], sizes = [10, 128], strides = [1, 1]} : vector<14x128xf32> to vector<10x128xf32>
    %c2_123 = arith.constant 2 : index
    %c0_124 = arith.constant 0 : index
    %c0_125 = arith.constant 0 : index
    %166 = vector.load %arg5[%c2_123, %c0_124, %c0_125] : memref<5x128x256xf32, #tpu.memory_space<vmem>>, vector<1x128x256xf32>
    %167 = vector.shape_cast %166 : vector<1x128x256xf32> to vector<128x256xf32>
    %cst_126 = arith.constant dense<0.000000e+00> : vector<10x256xf32>
    %168 = tpu.matmul %165, %167, %cst_126 {dimension_numbers = #tpu.dot_dimension_numbers<[1], [0], [0], [1], [0, 0, 1, 1], [], []>} : vector<10x128xf32>, vector<128x256xf32>, vector<10x256xf32> -> vector<10x256xf32>
    %169 = arith.addf %164, %168 : vector<10x256xf32>
    %170 = vector.extract_strided_slice %155 {offsets = [3, 0], sizes = [10, 128], strides = [1, 1]} : vector<14x128xf32> to vector<10x128xf32>
    %c3_127 = arith.constant 3 : index
    %c0_128 = arith.constant 0 : index
    %c0_129 = arith.constant 0 : index
    %171 = vector.load %arg5[%c3_127, %c0_128, %c0_129] : memref<5x128x256xf32, #tpu.memory_space<vmem>>, vector<1x128x256xf32>
    %172 = vector.shape_cast %171 : vector<1x128x256xf32> to vector<128x256xf32>
    %cst_130 = arith.constant dense<0.000000e+00> : vector<10x256xf32>
    %173 = tpu.matmul %170, %172, %cst_130 {dimension_numbers = #tpu.dot_dimension_numbers<[1], [0], [0], [1], [0, 0, 1, 1], [], []>} : vector<10x128xf32>, vector<128x256xf32>, vector<10x256xf32> -> vector<10x256xf32>
    %174 = arith.addf %169, %173 : vector<10x256xf32>
    %175 = vector.extract_strided_slice %155 {offsets = [4, 0], sizes = [10, 128], strides = [1, 1]} : vector<14x128xf32> to vector<10x128xf32>
    %c4_131 = arith.constant 4 : index
    %c0_132 = arith.constant 0 : index
    %c0_133 = arith.constant 0 : index
    %176 = vector.load %arg5[%c4_131, %c0_132, %c0_133] : memref<5x128x256xf32, #tpu.memory_space<vmem>>, vector<1x128x256xf32>
    %177 = vector.shape_cast %176 : vector<1x128x256xf32> to vector<128x256xf32>
    %cst_134 = arith.constant dense<0.000000e+00> : vector<10x256xf32>
    %178 = tpu.matmul %175, %177, %cst_134 {dimension_numbers = #tpu.dot_dimension_numbers<[1], [0], [0], [1], [0, 0, 1, 1], [], []>} : vector<10x128xf32>, vector<128x256xf32>, vector<10x256xf32> -> vector<10x256xf32>
    %179 = arith.addf %174, %178 : vector<10x256xf32>
    %180 = vector.broadcast %3 : vector<1x256xf32> to vector<10x256xf32>
    %181 = arith.addf %179, %180 : vector<10x256xf32>
    %cst_135 = arith.constant 0.000000e+00 : f32
    %182 = vector.broadcast %cst_135 : f32 to vector<10x256xf32>
    %183 = arith.maximumf %181, %182 : vector<10x256xf32>
    %cst_136 = arith.constant dense<0.000000e+00> : vector<10x256xf32>
    %184 = tpu.matmul %4, %183, %cst_136 {dimension_numbers = #tpu.dot_dimension_numbers<[1], [0], [0], [1], [0, 0, 1, 1], [], []>} : vector<10x10xf32>, vector<10x256xf32>, vector<10x256xf32> -> vector<10x256xf32>
    %185 = vector.extract_strided_slice %184 {offsets = [0, 0], sizes = [5, 256], strides = [1, 1]} : vector<10x256xf32> to vector<5x256xf32>
    %186 = vector.extract_strided_slice %184 {offsets = [5, 0], sizes = [5, 256], strides = [1, 1]} : vector<10x256xf32> to vector<5x256xf32>
    %187 = arith.maximumf %185, %186 : vector<5x256xf32>
    %cst_137 = arith.constant dense<0.000000e+00> : vector<5x256xf32>
    %188 = tpu.matmul %187, %5, %cst_137 {dimension_numbers = #tpu.dot_dimension_numbers<[1], [0], [0], [1], [0, 0, 1, 1], [], []>} : vector<5x256xf32>, vector<256x256xf32>, vector<5x256xf32> -> vector<5x256xf32>
    %189 = vector.extract_strided_slice %188 {offsets = [0, 0], sizes = [5, 128], strides = [1, 1]} : vector<5x256xf32> to vector<5x128xf32>
    %190 = vector.extract_strided_slice %188 {offsets = [0, 128], sizes = [5, 128], strides = [1, 1]} : vector<5x256xf32> to vector<5x128xf32>
    %191 = arith.maximumf %189, %190 : vector<5x128xf32>
    %192 = vector.extract_strided_slice %191 {offsets = [0, 0], sizes = [1, 128], strides = [1, 1]} : vector<5x128xf32> to vector<1x128xf32>
    %c0_138 = arith.constant 0 : index
    %c0_139 = arith.constant 0 : index
    %c0_140 = arith.constant 0 : index
    %193 = vector.load %arg9[%c0_138, %c0_139, %c0_140] : memref<5x128x128xf32, #tpu.memory_space<vmem>>, vector<1x128x128xf32>
    %194 = vector.shape_cast %193 : vector<1x128x128xf32> to vector<128x128xf32>
    %cst_141 = arith.constant dense<0.000000e+00> : vector<1x128xf32>
    %195 = tpu.matmul %192, %194, %cst_141 {dimension_numbers = #tpu.dot_dimension_numbers<[1], [0], [0], [1], [0, 0, 1, 1], [], []>} : vector<1x128xf32>, vector<128x128xf32>, vector<1x128xf32> -> vector<1x128xf32>
    %196 = vector.extract_strided_slice %191 {offsets = [1, 0], sizes = [1, 128], strides = [1, 1]} : vector<5x128xf32> to vector<1x128xf32>
    %c1_142 = arith.constant 1 : index
    %c0_143 = arith.constant 0 : index
    %c0_144 = arith.constant 0 : index
    %197 = vector.load %arg9[%c1_142, %c0_143, %c0_144] : memref<5x128x128xf32, #tpu.memory_space<vmem>>, vector<1x128x128xf32>
    %198 = vector.shape_cast %197 : vector<1x128x128xf32> to vector<128x128xf32>
    %cst_145 = arith.constant dense<0.000000e+00> : vector<1x128xf32>
    %199 = tpu.matmul %196, %198, %cst_145 {dimension_numbers = #tpu.dot_dimension_numbers<[1], [0], [0], [1], [0, 0, 1, 1], [], []>} : vector<1x128xf32>, vector<128x128xf32>, vector<1x128xf32> -> vector<1x128xf32>
    %200 = arith.addf %195, %199 : vector<1x128xf32>
    %201 = vector.extract_strided_slice %191 {offsets = [2, 0], sizes = [1, 128], strides = [1, 1]} : vector<5x128xf32> to vector<1x128xf32>
    %c2_146 = arith.constant 2 : index
    %c0_147 = arith.constant 0 : index
    %c0_148 = arith.constant 0 : index
    %202 = vector.load %arg9[%c2_146, %c0_147, %c0_148] : memref<5x128x128xf32, #tpu.memory_space<vmem>>, vector<1x128x128xf32>
    %203 = vector.shape_cast %202 : vector<1x128x128xf32> to vector<128x128xf32>
    %cst_149 = arith.constant dense<0.000000e+00> : vector<1x128xf32>
    %204 = tpu.matmul %201, %203, %cst_149 {dimension_numbers = #tpu.dot_dimension_numbers<[1], [0], [0], [1], [0, 0, 1, 1], [], []>} : vector<1x128xf32>, vector<128x128xf32>, vector<1x128xf32> -> vector<1x128xf32>
    %205 = arith.addf %200, %204 : vector<1x128xf32>
    %206 = vector.extract_strided_slice %191 {offsets = [3, 0], sizes = [1, 128], strides = [1, 1]} : vector<5x128xf32> to vector<1x128xf32>
    %c3_150 = arith.constant 3 : index
    %c0_151 = arith.constant 0 : index
    %c0_152 = arith.constant 0 : index
    %207 = vector.load %arg9[%c3_150, %c0_151, %c0_152] : memref<5x128x128xf32, #tpu.memory_space<vmem>>, vector<1x128x128xf32>
    %208 = vector.shape_cast %207 : vector<1x128x128xf32> to vector<128x128xf32>
    %cst_153 = arith.constant dense<0.000000e+00> : vector<1x128xf32>
    %209 = tpu.matmul %206, %208, %cst_153 {dimension_numbers = #tpu.dot_dimension_numbers<[1], [0], [0], [1], [0, 0, 1, 1], [], []>} : vector<1x128xf32>, vector<128x128xf32>, vector<1x128xf32> -> vector<1x128xf32>
    %210 = arith.addf %205, %209 : vector<1x128xf32>
    %211 = vector.extract_strided_slice %191 {offsets = [4, 0], sizes = [1, 128], strides = [1, 1]} : vector<5x128xf32> to vector<1x128xf32>
    %c4_154 = arith.constant 4 : index
    %c0_155 = arith.constant 0 : index
    %c0_156 = arith.constant 0 : index
    %212 = vector.load %arg9[%c4_154, %c0_155, %c0_156] : memref<5x128x128xf32, #tpu.memory_space<vmem>>, vector<1x128x128xf32>
    %213 = vector.shape_cast %212 : vector<1x128x128xf32> to vector<128x128xf32>
    %cst_157 = arith.constant dense<0.000000e+00> : vector<1x128xf32>
    %214 = tpu.matmul %211, %213, %cst_157 {dimension_numbers = #tpu.dot_dimension_numbers<[1], [0], [0], [1], [0, 0, 1, 1], [], []>} : vector<1x128xf32>, vector<128x128xf32>, vector<1x128xf32> -> vector<1x128xf32>
    %215 = arith.addf %210, %214 : vector<1x128xf32>
    %216 = arith.addf %215, %6 : vector<1x128xf32>
    %cst_158 = arith.constant 0.000000e+00 : f32
    %217 = vector.broadcast %cst_158 : f32 to vector<1x128xf32>
    %218 = arith.maximumf %216, %217 : vector<1x128xf32>
    %cst_159 = arith.constant dense<0.000000e+00> : vector<1x128xf32>
    %219 = tpu.matmul %218, %7, %cst_159 {dimension_numbers = #tpu.dot_dimension_numbers<[1], [0], [0], [1], [0, 0, 1, 1], [], []>} : vector<1x128xf32>, vector<128x128xf32>, vector<1x128xf32> -> vector<1x128xf32>
    %220 = arith.addf %219, %8 : vector<1x128xf32>
    %cst_160 = arith.constant 0.000000e+00 : f32
    %221 = vector.broadcast %cst_160 : f32 to vector<1x128xf32>
    %222 = arith.maximumf %220, %221 : vector<1x128xf32>
    %cst_161 = arith.constant dense<0.000000e+00> : vector<1x128xf32>
    %223 = tpu.matmul %222, %9, %cst_161 {dimension_numbers = #tpu.dot_dimension_numbers<[1], [0], [0], [1], [0, 0, 1, 1], [], []>} : vector<1x128xf32>, vector<128x128xf32>, vector<1x128xf32> -> vector<1x128xf32>
    %224 = arith.addf %223, %10 : vector<1x128xf32>
    %225 = tpu.concatenate %117, %224 in 0 : vector<1x128xf32>, vector<1x128xf32> -> vector<2x128xf32>
    %226 = tpu.iota {dimensions = array<i32: 1>} : vector<2x128xi32>
    %c10_i32 = arith.constant 10 : i32
    %227 = vector.broadcast %c10_i32 : i32 to vector<2x128xi32>
    %228 = arith.cmpi slt, %226, %227 : vector<2x128xi32>
    %cst_162 = arith.constant -1.000000e+30 : f32
    %229 = vector.broadcast %cst_162 : f32 to vector<2x128xf32>
    %230 = arith.select %228, %225, %229 : vector<2x128xi1>, vector<2x128xf32>
    %cst_163 = arith.constant dense<0xFF800000> : vector<2xf32>
    %231 = vector.multi_reduction <maximumf>, %230, %cst_163 [1] : vector<2x128xf32> to vector<2xf32>
    %232 = vector.shape_cast %231 : vector<2xf32> to vector<2x1xf32>
    %233 = vector.broadcast %232 : vector<2x1xf32> to vector<2x128xf32>
    %234 = arith.subf %230, %233 : vector<2x128xf32>
    %235 = math.exp %234 : vector<2x128xf32>
    %cst_164 = arith.constant dense<0.000000e+00> : vector<2xf32>
    %236 = vector.multi_reduction <add>, %235, %cst_164 [1] : vector<2x128xf32> to vector<2xf32>
    %237 = vector.shape_cast %236 : vector<2xf32> to vector<2x1xf32>
    %238 = math.log %237 : vector<2x1xf32>
    %239 = vector.broadcast %238 : vector<2x1xf32> to vector<2x128xf32>
    %240 = arith.subf %234, %239 : vector<2x128xf32>
    %c0_165 = arith.constant 0 : index
    %c0_166 = arith.constant 0 : index
    %241 = vector.load %arg15[%c0_165, %c0_166] : memref<2x128xf32, #tpu.memory_space<vmem>>, vector<2x128xf32>
    tpu.vector_store %arg15[%c0_165, %c0_166], %240 {strides = array<i32>} : memref<2x128xf32, #tpu.memory_space<vmem>>, vector<2x128xf32>,
    return
  }
}

</mosaic_0001>

<bundles_post_ra>
// kernel: lenet_forward.1
= control target key start
LH: loop header
LB: loop body
LE: loop exit
PB: predicated region body
PF: predicated region fallthrough
CT: control target
= control target key end

     0   :  { %s8311_s0 = inlined_call_operand.hbm [shape: f32[2,32,32], index: 0, kind: input, shape index: {}]   ;;  %s8312_s1 = inlined_call_operand.hbm [shape: f32[5,32,256], index: 1, kind: input, shape index: {}]   ;;  %s8313_s2 = inlined_call_operand.vmem [shape: f32[1,256], index: 2, kind: input, shape index: {}]   ;;  %s8314_s3 = inlined_call_operand.hbm [shape: f32[28,28], index: 3, kind: input, shape index: {}]   ;;  %s8315_s4 = inlined_call_operand.hbm [shape: f32[256,256], index: 4, kind: input, shape index: {}]   ;;  %s8316_s5 = inlined_call_operand.hbm [shape: f32[5,128,256], index: 5, kind: input, shape index: {}]   ;;  %s8317_s6 = inlined_call_operand.vmem [shape: f32[1,256], index: 6, kind: input, shape index: {}]   ;;  %s8318_s7 = inlined_call_operand.vmem [shape: f32[10,10], index: 7, kind: input, shape index: {}]   ;;  %s8319_s8 = inlined_call_operand.hbm [shape: f32[256,256], index: 8, kind: input, shape index: {}]   ;;  %s8320_s9 = inlined_call_operand.hbm [shape: f32[5,128,128], index: 9, kind: input, shape index: {}]   ;;  %s8321_s10 = inlined_call_operand.vmem [shape: f32[1,128], index: 10, kind: input, shape index: {}]   ;;  %s8322_s11 = inlined_call_operand.hbm [shape: f32[128,128], index: 11, kind: input, shape index: {}]   ;;  %s8323_s12 = inlined_call_operand.vmem [shape: f32[1,128], index: 12, kind: input, shape index: {}]   ;;  %s8324_s13 = inlined_call_operand.hbm [shape: f32[128,128], index: 13, kind: input, shape index: {}]   ;;  %s8325_s14 = inlined_call_operand.vmem [shape: f32[1,128], index: 14, kind: input, shape index: {}]   ;;  %s8326_s15 = inlined_call_operand.hbm [shape: f32[2,128], index: 15, kind: output, shape index: {}]  }
   0x1   :  { %8521 = sst [smem:[#allocation203_spill]] %s8326_s15 }
   0x2   :  { %20 = vsyncpa [#allocation3], 0 }
   0x3   :  { %21 = vsyncpa [#allocation6], 0 }
   0x4   :  { %22 = vsyncpa [#allocation9], 0 }
   0x5   :  { %23 = vsyncpa [#allocation12], 0 }
   0x6   :  { %24 = vsyncpa [#allocation15], 0 }
   0x7   :  { %25 = vsyncpa [#allocation4], 0  ;;  %s6616_s18 = smov [#allocation5]   ;;  %s6384_s22 = scalar_lea.hbm %s8312_s1, 5120 }
   0x8   :  { %s43_s19 = sshll.u32 %s6616_s18, 4  ;;  %p6385_p0 = scmp.ne.s32.totalorder %s8312_s1, %s6384_s22  ;;  %s44_s19 = int_to_ptr.vmem [resolvable:$true] %s43_s19 }
   0x9   :  { %p6388_p1 = scmp.lt.u32.totalorder %s6384_s22, %s8312_s1 }
   0xb   :  { %p6390_p2 = pnand %p6388_p1, %p6385_p0 }
   0xd   :  { %6393 = shalt.err (!%p6390_p2)
}
   0xe   :  { %s6394_s27 = scalar_lea.vmem %s44_s19, 5120  ;;  %p6399_p4 = scmp.lt.s32.totalorder %s44_s19, %s44_s19 }
   0xf   :  { %p6395_p3 = scmp.ne.s32.totalorder %s44_s19, %s6394_s27  ;;  %p6400_p5 = scmp.lt.s32.totalorder %s6394_s27, %s6394_s27 }
  0x11   :  { %p6401_p6 = por %p6400_p5, %p6399_p4 }
  0x13   :  { %p6402_p7 = pnand %p6401_p6, %p6395_p3 }
  0x15   :  { %6405 = shalt.err (!%p6402_p7)
}
  0x16   :  { %s6617_s28 = smov 256   ;;  %s6618_s29 = smov 16  }
  0x17   :  { %49 = dma.hbm_to_vmem [thread:$0]  %s8312_s1, 5120, %s44_s19, [#allocation6], %s6617_s28, %s6617_s28, %s6618_s29  }
  0x18   :  { %s6619_s17 = smov [#allocation8]   ;;  %s6620_s20 = smov [#allocation11]  }
  0x19   :  { %s69_s18 = sshll.u32 %s6619_s17, 4  ;;  %s97_s21 = sshll.u32 %s6620_s20, 4  ;;  %s70_s18 = int_to_ptr.vmem [resolvable:$true] %s69_s18  ;;  %s98_s21 = int_to_ptr.vmem [resolvable:$true] %s97_s21 }
  0x1a   :  { %s6406_s24 = scalar_lea.hbm %s8315_s4, 8192 }
  0x1b   :  { %p6407_p8 = scmp.ne.s32.totalorder %s8315_s4, %s6406_s24  ;;  %p6410_p9 = scmp.lt.u32.totalorder %s6406_s24, %s8315_s4 }
  0x1d   :  { %p6412_p10 = pnand %p6410_p9, %p6407_p8 }
  0x1f   :  { %6415 = shalt.err (!%p6412_p10)
}
  0x20   :  { %s6416_s1 = scalar_lea.vmem %s70_s18, 8192  ;;  %p6421_p12 = scmp.lt.s32.totalorder %s70_s18, %s70_s18 }
  0x21   :  { %p6417_p11 = scmp.ne.s32.totalorder %s70_s18, %s6416_s1  ;;  %p6422_p13 = scmp.lt.s32.totalorder %s6416_s1, %s6416_s1 }
  0x23   :  { %p6423_p0 = por %p6422_p13, %p6421_p12 }
  0x25   :  { %p6424_p1 = pnand %p6423_p0, %p6417_p11 }
  0x27   :  { %6427 = shalt.err (!%p6424_p1)
}
  0x28   :  { %75 = dma.hbm_to_vmem [thread:$0]  %s8315_s4, 8192, %s70_s18, [#allocation9], %s6617_s28, %s6617_s28, %s6618_s29  }
  0x29   :  { %s6428_s17 = scalar_lea.hbm %s8319_s8, 8192 }
  0x2a   :  { %p6429_p2 = scmp.ne.s32.totalorder %s8319_s8, %s6428_s17  ;;  %p6432_p3 = scmp.lt.u32.totalorder %s6428_s17, %s8319_s8 }
  0x2c   :  { %p6434_p4 = pnand %p6432_p3, %p6429_p2 }
  0x2e   :  { %6437 = shalt.err (!%p6434_p4)
}
  0x2f   :  { %s6438_s25 = scalar_lea.vmem %s98_s21, 8192  ;;  %p6443_p6 = scmp.lt.s32.totalorder %s98_s21, %s98_s21 }
  0x30   :  { %p6439_p5 = scmp.ne.s32.totalorder %s98_s21, %s6438_s25  ;;  %p6444_p7 = scmp.lt.s32.totalorder %s6438_s25, %s6438_s25 }
  0x32   :  { %p6445_p8 = por %p6444_p7, %p6443_p6 }
  0x34   :  { %p6446_p9 = pnand %p6445_p8, %p6439_p5 }
  0x36   :  { %6449 = shalt.err (!%p6446_p9)
}
  0x37   :  { %103 = dma.hbm_to_vmem [thread:$0]  %s8319_s8, 8192, %s98_s21, [#allocation12], %s6617_s28, %s6617_s28, %s6618_s29  }
  0x38   :  { %s6621_s26 = smov [#allocation14]   ;;  %s6622_s1 = smov [#allocation2]  }
  0x39   :  { %s123_s27 = sshll.u32 %s6621_s26, 4  ;;  %s31_s19 = sshll.u32 %s6622_s1, 4  ;;  %s124_s27 = int_to_ptr.vmem [resolvable:$true] %s123_s27  ;;  %s32_s19 = int_to_ptr.vmem [resolvable:$true] %s31_s19 }
  0x3a   :  { %s6450_s15 = scalar_lea.hbm %s8322_s11, 2048 }
  0x3b   :  { %p6451_p10 = scmp.ne.s32.totalorder %s8322_s11, %s6450_s15  ;;  %p6454_p11 = scmp.lt.u32.totalorder %s6450_s15, %s8322_s11 }
  0x3d   :  { %p6456_p12 = pnand %p6454_p11, %p6451_p10 }
  0x3f   :  { %6459 = shalt.err (!%p6456_p12)
}
  0x40   :  { %s6460_s8 = scalar_lea.vmem %s124_s27, 2048  ;;  %p6465_p0 = scmp.lt.s32.totalorder %s124_s27, %s124_s27 }
  0x41   :  { %p6461_p13 = scmp.ne.s32.totalorder %s124_s27, %s6460_s8  ;;  %p6466_p1 = scmp.lt.s32.totalorder %s6460_s8, %s6460_s8 }
  0x43   :  { %p6467_p2 = por %p6466_p1, %p6465_p0 }
  0x45   :  { %p6468_p3 = pnand %p6467_p2, %p6461_p13 }
  0x47   :  { %6471 = shalt.err (!%p6468_p3)
}
  0x48   :  { %s6623_s21 = smov 128   ;;  %s6624_s24 = smov 8  }
  0x49   :  { %129 = dma.hbm_to_vmem [thread:$0]  %s8322_s11, 2048, %s124_s27, [#allocation15], %s6623_s21, %s6623_s21, %s6624_s24  }
  0x4a   :  { %s6472_s1 = scalar_lea.hbm %s8311_s0, 1024 }
  0x4b   :  { %p6473_p4 = scmp.ne.s32.totalorder %s8311_s0, %s6472_s1  ;;  %p6476_p5 = scmp.lt.u32.totalorder %s6472_s1, %s8311_s0 }
  0x4d   :  { %p6478_p6 = pnand %p6476_p5, %p6473_p4 }
  0x4f   :  { %6481 = shalt.err (!%p6478_p6)
}
  0x50   :  { %s6482_s20 = scalar_lea.vmem %s32_s19, 1024  ;;  %p6487_p8 = scmp.lt.s32.totalorder %s32_s19, %s32_s19 }
  0x51   :  { %p6483_p7 = scmp.ne.s32.totalorder %s32_s19, %s6482_s20  ;;  %p6488_p9 = scmp.lt.s32.totalorder %s6482_s20, %s6482_s20 }
  0x53   :  { %p6489_p10 = por %p6488_p9, %p6487_p8 }
  0x55   :  { %p6490_p11 = pnand %p6489_p10, %p6483_p7 }
  0x57   :  { %6493 = shalt.err (!%p6490_p11)
}
  0x58   :  { %37 = dma.hbm_to_vmem [thread:$0]  %s8311_s0, 1024, %s32_s19, [#allocation3], %s6623_s21, %s6623_s21, %s6624_s24  }
  0x59   :  { %s6625_s22 = smov [#allocation7]   ;;  %s6626_s8 = smov [#allocation10]  }
  0x5a   :  { %s57_s23 = sshll.u32 %s6625_s22, 4  ;;  %s81_s25 = sshll.u32 %s6626_s8, 4  ;;  %s58_s23 = int_to_ptr.vmem [resolvable:$true] %s57_s23  ;;  %s82_s25 = int_to_ptr.vmem [resolvable:$true] %s81_s25 }
  0x5b   :  { %s6494_s26 = scalar_lea.hbm %s8314_s3, 512 }
  0x5c   :  { %p6495_p12 = scmp.ne.s32.totalorder %s8314_s3, %s6494_s26  ;;  %p6498_p13 = scmp.lt.u32.totalorder %s6494_s26, %s8314_s3 }
  0x5e   :  { %p6500_p0 = pnand %p6498_p13, %p6495_p12 }
  0x60   :  { %6503 = shalt.err (!%p6500_p0)
}
  0x61   :  { %s6504_s0 = scalar_lea.vmem %s58_s23, 512  ;;  %p6509_p2 = scmp.lt.s32.totalorder %s58_s23, %s58_s23 }
  0x62   :  { %p6505_p1 = scmp.ne.s32.totalorder %s58_s23, %s6504_s0  ;;  %p6510_p3 = scmp.lt.s32.totalorder %s6504_s0, %s6504_s0 }
  0x64   :  { %p6511_p4 = por %p6510_p3, %p6509_p2 }
  0x66   :  { %p6512_p5 = pnand %p6511_p4, %p6505_p1 }
  0x68   :  { %6515 = shalt.err (!%p6512_p5)
}
  0x69   :  { %63 = dma.hbm_to_vmem [thread:$0]  %s8314_s3, 512, %s58_s23, [#allocation6], %s6623_s21, %s6623_s21, %s6624_s24  }
  0x6a   :  { %s6516_s27 = scalar_lea.hbm %s8316_s5, 20480 }
  0x6b   :  { %p6517_p6 = scmp.ne.s32.totalorder %s8316_s5, %s6516_s27  ;;  %p6520_p7 = scmp.lt.u32.totalorder %s6516_s27, %s8316_s5 }
  0x6d   :  { %p6522_p8 = pnand %p6520_p7, %p6517_p6 }
  0x6f   :  { %6525 = shalt.err (!%p6522_p8)
}
  0x70   :  { %s6526_s26 = scalar_lea.vmem %s82_s25, 20480  ;;  %p6531_p10 = scmp.lt.s32.totalorder %s82_s25, %s82_s25 }
  0x71   :  { %p6527_p9 = scmp.ne.s32.totalorder %s82_s25, %s6526_s26  ;;  %p6532_p11 = scmp.lt.s32.totalorder %s6526_s26, %s6526_s26 }
  0x73   :  { %p6533_p12 = por %p6532_p11, %p6531_p10 }
  0x75   :  { %p6534_p13 = pnand %p6533_p12, %p6527_p9 }
  0x77   :  { %6537 = shalt.err (!%p6534_p13)
}
  0x78   :  { %87 = dma.hbm_to_vmem [thread:$0]  %s8316_s5, 20480, %s82_s25, [#allocation9], %s6617_s28, %s6617_s28, %s6618_s29  }
  0x79   :  { %s6627_s1 = smov [#allocation13]   ;;  %s6628_s16 = smov [#allocation16]  }
  0x7a   :  { %s109_s30 = sshll.u32 %s6627_s1, 4  ;;  %s137_s15 = sshll.u32 %s6628_s16, 4  ;;  %s110_s30 = int_to_ptr.vmem [resolvable:$true] %s109_s30  ;;  %s138_s15 = int_to_ptr.vmem [resolvable:$true] %s137_s15 }
  0x7b   :  { %s6538_s17 = scalar_lea.hbm %s8320_s9, 10240 }
  0x7c   :  { %p6539_p0 = scmp.ne.s32.totalorder %s8320_s9, %s6538_s17  ;;  %p6542_p1 = scmp.lt.u32.totalorder %s6538_s17, %s8320_s9 }
  0x7e   :  { %p6544_p2 = pnand %p6542_p1, %p6539_p0 }
  0x80   :  { %6547 = shalt.err (!%p6544_p2)
}
  0x81   :  { %s6548_s5 = scalar_lea.vmem %s110_s30, 10240  ;;  %p6553_p4 = scmp.lt.s32.totalorder %s110_s30, %s110_s30 }
  0x82   :  { %p6549_p3 = scmp.ne.s32.totalorder %s110_s30, %s6548_s5  ;;  %p6554_p5 = scmp.lt.s32.totalorder %s6548_s5, %s6548_s5 }
  0x84   :  { %p6555_p6 = por %p6554_p5, %p6553_p4 }
  0x86   :  { %p6556_p7 = pnand %p6555_p6, %p6549_p3 }
  0x88   :  { %6559 = shalt.err (!%p6556_p7)
}
  0x89   :  { %115 = dma.hbm_to_vmem [thread:$0]  %s8320_s9, 10240, %s110_s30, [#allocation12], %s6623_s21, %s6623_s21, %s6624_s24  }
  0x8a   :  { %s6560_s4 = scalar_lea.hbm %s8324_s13, 2048 }
  0x8b   :  { %p6561_p8 = scmp.ne.s32.totalorder %s8324_s13, %s6560_s4  ;;  %p6564_p9 = scmp.lt.u32.totalorder %s6560_s4, %s8324_s13 }
  0x8d   :  { %p6566_p10 = pnand %p6564_p9, %p6561_p8 }
  0x8f   :  { %6569 = shalt.err (!%p6566_p10)
}
  0x90   :  { %s6570_s1 = scalar_lea.vmem %s138_s15, 2048  ;;  %p6575_p12 = scmp.lt.s32.totalorder %s138_s15, %s138_s15 }
  0x91   :  { %p6571_p11 = scmp.ne.s32.totalorder %s138_s15, %s6570_s1  ;;  %p6576_p13 = scmp.lt.s32.totalorder %s6570_s1, %s6570_s1 }
  0x93   :  { %p6577_p0 = por %p6576_p13, %p6575_p12 }
  0x95   :  { %p6578_p1 = pnand %p6577_p0, %p6571_p11 }
  0x97   :  { %6581 = shalt.err (!%p6578_p1)
}
  0x98   :  { %143 = dma.hbm_to_vmem [thread:$0]  %s8324_s13, 2048, %s138_s15, [#allocation15], %s6623_s21, %s6623_s21, %s6624_s24  }
  0x99   :  { %6604 = dma.done.wait [#allocation3], 1024  }
  0x9a   :  { %6605 = vsyncadd [#allocation3], 4294966272 }
  0x9b   :  { %6606 = dma.done.wait [#allocation6], 5632  }
  0x9c   :  { %6607 = vsyncadd [#allocation6], 4294961664 }
  0x9d   :  { %6608 = dma.done.wait [#allocation9], 28672  }
  0x9e   :  { %6609 = vsyncadd [#allocation9], 4294938624 }
  0x9f   :  { %6610 = dma.done.wait [#allocation12], 18432  }
  0xa0   :  { %6611 = vsyncadd [#allocation12], 4294948864 }
  0xa1   :  { %6612 = dma.done.wait [#allocation15], 4096  }
  0xa2   :  { %6613 = vsyncadd [#allocation15], 4294963200  ;;  %v8331_v0 = vmov 0.0   ;;  %v358_v1 = vld [vmem:[#allocation5 + $0x48] sm:$0xff]  ;;  %v360_v2 = vld [vmem:[#allocation5 + $0x58] sm:$0xff]  ;;  %vm369_vm0 = vcmask 1046528  }
  0xa3   :  { %450 = vmatprep.mubr.f32.mxu0 %v8331_v0  ;;  %1048 = vmatprep.mubr.f32.mxu1 %v8331_v0  ;;  %v357_v3 = vld [vmem:[#allocation5 + $0x40] sm:$0xff]  ;;  %v6851_v4 = vpack.c.bf16 %v360_v2, %v358_v1  ;;  %v359_v5 = vld [vmem:[#allocation5 + $0x50] sm:$0xff]  ;;  %v362_v6 = vld [vmem:[#allocation5 + $0x68] sm:$0xff]  ;;  %vm377_vm1 = vcmask 261120   ;;  %vm825_vm2 = vcmask 1043456   ;;  %vm581_vm3 = vcmask 1045504  }
  0xa4   :  { %v364_v7 = vld [vmem:[#allocation5 + $0x78] sm:$0xff]  ;;  %v6853_v8 = vpack.c.bf16 %v359_v5, %v357_v3  ;;  %v361_v10 = vld [vmem:[#allocation5 + $0x60] sm:$0xff]  ;;  %v363_v11 = vld [vmem:[#allocation5 + $0x70] sm:$0xff]  ;;  %vm703_vm4 = vcmask 1044480   ;;  %vm6630_vm5 = vmmov 1   ;;  %vm965_vm7 = vcmask 228352  }
  0xa5   :  { %v6855_v9 = vpack.c.bf16 %v364_v7, %v362_v6  ;;  %v6857_v12 = vld [vmem:[#allocation2] sm:$0xff]  ;;  %5236 = vmatprep.subr.bf16.mxu0 %v6851_v4  ;;  %v6860_v13 = vld [vmem:[#allocation2 + $0x8] sm:$0xff]  ;;  %v6863_v15 = vpack.c.bf16 %v363_v11, %v361_v10  ;;  %v6867_v18 = vld [vmem:[#allocation2 + $0x10] sm:$0xff]  ;;  %vm1079_vm8 = vcmask 1041408   ;;  %vm1779_vm10 = vcmask 80896  }
  0xa6   :  { %v349_v14 = vld [vmem:[#allocation5 + $0x8] sm:$0xff]  ;;  %5238 = vmatpush1.bf16.msra.mxu0 %v6853_v8  ;;  %v370_v16 = vrot.slane %v6857_v12, 1  ;;  %v371_v17 = vrot.slane %v6860_v13, 1  ;;  %v351_v19 = vld [vmem:[#allocation5 + $0x18] sm:$0xff]  ;;  %v348_v21 = vld [vmem:[#allocation5] sm:$0xff]  ;;  %v373_v25 = vrot.slane %v6867_v18, 1 }
  0xa7   :  { %5240 = vmatprep.subr.bf16.mxu0 %v6855_v9  ;;  %v6870_v20 = vpack.c.bf16 %v351_v19, %v349_v14  ;;  %v350_v22 = vld [vmem:[#allocation5 + $0x10] sm:$0xff]  ;;  %v353_v23 = vld [vmem:[#allocation5 + $0x28] sm:$0xff]  ;;  %v355_v24 = vld [vmem:[#allocation5 + $0x38] sm:$0xff]  ;;  %v826_v34 = vrot.slane %v6857_v12, 4  ;;  %v827_v35 = vrot.slane %v6860_v13, 4  ;;  %v829_v37 = vrot.slane %v6867_v18, 4 }
  0xa8   :  { %v372_v26 = vsel %vm369_vm0, %v370_v16, %v371_v17  ;;  %v6875_v27 = vpack.c.bf16 %v350_v22, %v348_v21  ;;  %v6878_v28 = vld [vmem:[#allocation2 + $0x18] sm:$0xff]  ;;  %v6880_v29 = vpack.c.bf16 %v355_v24, %v353_v23  ;;  %v352_v30 = vld [vmem:[#allocation5 + $0x20] sm:$0xff]  ;;  %v354_v31 = vld [vmem:[#allocation5 + $0x30] sm:$0xff]  ;;  %v374_v36 = vsel %vm369_vm0, %v371_v17, %v373_v25 }
  0xa9   :  { %v574_v32 = vld [vmem:[#allocation5 + $0x88] sm:$0xff]  ;;  %v576_v33 = vld [vmem:[#allocation5 + $0x98] sm:$0xff]  ;;  %v375_v38 = vrot.slane %v6878_v28, 1  ;;  %v6890_v39 = vpack.c.bf16 %v354_v31, %v352_v30  ;;  %v6893_v40 = vsel %vm825_vm2, %v826_v34, %v827_v35  ;;  %v831_v41 = vrot.slane %v6878_v28, 4  ;;  %v573_v46 = vld [vmem:[#allocation5 + $0x80] sm:$0xff] }
  0xaa   :  { %5242 = vmatpush1.bf16.msra.mxu0 %v6863_v15  ;;  %v6897_v42 = vpack.c.bf16 %v576_v33, %v574_v32  ;;  %v6900_v43 = vsel %vm825_vm2, %v827_v35, %v829_v37  ;;  %v575_v47 = vld [vmem:[#allocation5 + $0x90] sm:$0xff]  ;;  %v578_v48 = vld [vmem:[#allocation5 + $0xa8] sm:$0xff]  ;;  %v580_v49 = vld [vmem:[#allocation5 + $0xb8] sm:$0xff]  ;;  %v582_v58 = vrot.slane %v6857_v12, 2  ;;  %v583_v59 = vrot.slane %v6860_v13, 2 }
  0xab   :  { %5244 = vmatprep.subr.bf16.mxu0 %v6870_v20  ;;  %v6905_v44 = vsel %vm825_vm2, %v829_v37, %v831_v41  ;;  %v376_v45 = vsel %vm369_vm0, %v373_v25, %v375_v38  ;;  %v6916_v50 = vpack.c.bf16 %v575_v47, %v573_v46  ;;  %v6918_v51 = vpack.c.bf16 %v580_v49, %v578_v48  ;;  %v577_v52 = vld [vmem:[#allocation5 + $0xa0] sm:$0xff]  ;;  %v579_v53 = vld [vmem:[#allocation5 + $0xb0] sm:$0xff]  ;;  %v696_v54 = vld [vmem:[#allocation5 + $0xc8] sm:$0xff] }
  0xac   :  { %v698_v55 = vld [vmem:[#allocation5 + $0xd8] sm:$0xff]  ;;  %v6924_v56 = vpack.c.bf16 %v579_v53, %v577_v52  ;;  %v695_v60 = vld [vmem:[#allocation5 + $0xc0] sm:$0xff]  ;;  %v697_v61 = vld [vmem:[#allocation5 + $0xd0] sm:$0xff]  ;;  %v584_v1 = vsel %vm581_vm3, %v582_v58, %v583_v59  ;;  %v585_v2 = vrot.slane %v6867_v18, 2  ;;  %v587_v16 = vrot.slane %v6878_v28, 2 }
  0xad   :  { %4447 = vmatmul.mubr.msk.f32.vlgmr.msra.gmra.mrb[0].mxu0 %vm377_vm1, %v372_v26  ;;  %v6927_v57 = vpack.c.bf16 %v698_v55, %v696_v54  ;;  %v700_v62 = vld [vmem:[#allocation5 + $0xe8] sm:$0xff]  ;;  %v702_v63 = vld [vmem:[#allocation5 + $0xf8] sm:$0xff]  ;;  %v6944_v3 = vpack.c.bf16 %v697_v61, %v695_v60  ;;  %v699_v6 = vld [vmem:[#allocation5 + $0xe0] sm:$0xff]  ;;  %v704_v22 = vrot.slane %v6857_v12, 3  ;;  %v705_v23 = vrot.slane %v6860_v13, 3 }
  0xae   :  { %456 = vmatprep.mubr.f32.mxu0 %v8331_v0  ;;  %5246 = vmatpush1.bf16.msra.mxu0 %v6875_v27  ;;  %v6946_v5 = vpack.c.bf16 %v702_v63, %v700_v62  ;;  %v701_v7 = vld [vmem:[#allocation5 + $0xf0] sm:$0xff]  ;;  %v818_v10 = vld [vmem:[#allocation5 + $0x108] sm:$0xff]  ;;  %v820_v11 = vld [vmem:[#allocation5 + $0x118] sm:$0xff]  ;;  %v586_v14 = vsel %vm581_vm3, %v583_v59, %v585_v2  ;;  %v588_v21 = vsel %vm581_vm3, %v585_v2, %v587_v16  ;;  %v707_v32 = vrot.slane %v6867_v18, 3 }
  0xaf   :  { %5248 = vmatprep.subr.bf16.mxu0 %v6880_v29  ;;  %v6953_v17 = vpack.c.bf16 %v701_v7, %v699_v6  ;;  %v6956_v19 = vpack.c.bf16 %v820_v11, %v818_v10  ;;  %v817_v24 = vld [vmem:[#allocation5 + $0x100] sm:$0xff]  ;;  %v819_v25 = vld [vmem:[#allocation5 + $0x110] sm:$0xff]  ;;  %v822_v26 = vld [vmem:[#allocation5 + $0x128] sm:$0xff]  ;;  %v706_v31 = vsel %vm703_vm4, %v704_v22, %v705_v23  ;;  %vm1873_vm11 = vcmask 1042432  }
  0xb0   :  { %v824_v30 = vld [vmem:[#allocation5 + $0x138] sm:$0xff]  ;;  %v6971_v33 = vpack.c.bf16 %v819_v25, %v817_v24  ;;  %v823_v35 = vld [vmem:[#allocation5 + $0x130] sm:$0xff]  ;;  %vm7030_vm6 = vmpackc.low %vm825_vm2, %vm6630_vm5  ;;  %vm6632_vm12 = vmmov 0   ;;  %vm4409_vm13 = vcmask 1040384  }
  0xb1   :  { %4448 = vmatmul.mubr.msk.f32.gmra.mrb[2].mxu0 %vm377_vm1, %v374_v36  ;;  %v6973_v34 = vpack.c.bf16 %v824_v30, %v822_v26  ;;  %v709_v36 = vrot.slane %v6878_v28, 3  ;;  %v181_v24 = vld [vmem:[#allocation8 + $0x18] sm:$0xff]  ;;  %vm7529_vm9 = vmpackc.low %vm1079_vm8, %vm6630_vm5 }
  0xb2   :  { %462 = vmatprep.mubr.f32.mxu0 %v8331_v0  ;;  %5250 = vmatpush1.bf16.msra.mxu0 %v6890_v39 }
  0xb3   :  { %5252 = vmatprep.subr.bf16.mxu0 %v6897_v42 }
  0xb5   :  { %4449 = vmatmul.mubr.msk.f32.gmra.mrb[4].mxu0 %vm377_vm1, %v376_v45 }
  0xb6   :  { %468 = vmatprep.mubr.f32.mxu0 %v8331_v0 }
  0xb9   :  { %4450 = vmatmul.mubr.msk.f32.gmra.mrb[6].mxu0 %vm377_vm1, %v375_v38  ;;  %v8328_v38 = vlaneseq }
  0xba   :  { %547 = vmatprep.mubr.f32.mxu0 %v8331_v0 }
  0xbd   :  { %4451 = vmatmul.mubr.msk.f32.vlgmr.msra.gmra.mrb[0].mxu0 %vm377_vm1, %v6857_v12  ;;  %v821_v12 = vld [vmem:[#allocation5 + $0x120] sm:$0xff] }
  0xbe   :  { %553 = vmatprep.mubr.f32.mxu0 %v8331_v0  ;;  %5254 = vmatpush1.bf16.msra.mxu0 %v6916_v50  ;;  %v6980_v37 = vpack.c.bf16 %v823_v35, %v821_v12  ;;  %v178_v35 = vld [vmem:[#allocation8] sm:$0xff] }
  0xbf   :  { %5256 = vmatprep.subr.bf16.mxu0 %v6918_v51 }
  0xc1   :  { %4452 = vmatmul.mubr.msk.f32.gmra.mrb[2].mxu0 %vm377_vm1, %v6860_v13  ;;  %v708_v13 = vsel %vm703_vm4, %v705_v23, %v707_v32  ;;  %v179_v23 = vld [vmem:[#allocation8 + $0x8] sm:$0xff] }
  0xc2   :  { %559 = vmatprep.mubr.f32.mxu0 %v8331_v0  ;;  %5258 = vmatpush1.bf16.msra.mxu0 %v6924_v56  ;;  %v7034_v12 = vpack.c.bf16 %v181_v24, %v179_v23  ;;  %v196_v23 = vld [vmem:[#allocation8 + $0x90] sm:$0xff]  ;;  %v199_v24 = vld [vmem:[#allocation8 + $0xa8] sm:$0xff] }
  0xc3   :  { %5260 = vmatprep.subr.bf16.mxu0 %v6927_v57 }
  0xc5   :  { %4453 = vmatmul.mubr.msk.f32.gmra.mrb[4].mxu0 %vm377_vm1, %v6867_v18  ;;  %v710_v18 = vsel %vm703_vm4, %v707_v32, %v709_v36 }
  0xc6   :  { %565 = vmatprep.mubr.f32.mxu0 %v8331_v0 }
  0xc9   :  { %4454 = vmatmul.mubr.msk.f32.gmra.mrb[6].mxu0 %vm377_vm1, %v6878_v28 }
  0xca   :  { %661 = vmatprep.mubr.f32.mxu0 %v8331_v0 }
  0xcd   :  { %4455 = vmatmul.mubr.msk.f32.vlgmr.msra.gmra.mrb[0].mxu0 %vm377_vm1, %v584_v1 }
  0xce   :  { %667 = vmatprep.mubr.f32.mxu0 %v8331_v0  ;;  %5262 = vmatpush1.bf16.msra.mxu0 %v6944_v3 }
  0xcf   :  { %5264 = vmatprep.subr.bf16.mxu0 %v6946_v5 }
  0xd1   :  { %4456 = vmatmul.mubr.msk.f32.gmra.mrb[2].mxu0 %vm377_vm1, %v586_v14 }
  0xd2   :  { %673 = vmatprep.mubr.f32.mxu0 %v8331_v0  ;;  %5266 = vmatpush1.bf16.msra.mxu0 %v6953_v17 }
  0xd3   :  { %5268 = vmatprep.subr.bf16.mxu0 %v6956_v19 }
  0xd5   :  { %4457 = vmatmul.mubr.msk.f32.gmra.mrb[4].mxu0 %vm377_vm1, %v588_v21 }
  0xd6   :  { %679 = vmatprep.mubr.f32.mxu0 %v8331_v0 }
  0xd9   :  { %4458 = vmatmul.mubr.msk.f32.gmra.mrb[6].mxu0 %vm377_vm1, %v587_v16 }
  0xda   :  { %783 = vmatprep.mubr.f32.mxu0 %v8331_v0 }
  0xdd   :  { %4459 = vmatmul.mubr.msk.f32.vlgmr.msra.gmra.mrb[0].mxu0 %vm377_vm1, %v706_v31 }
  0xde   :  { %789 = vmatprep.mubr.f32.mxu0 %v8331_v0  ;;  %5270 = vmatpush1.bf16.msra.mxu0 %v6971_v33 }
  0xdf   :  { %5272 = vmatprep.subr.bf16.mxu0 %v6973_v34 }
  0xe1   :  { %4460 = vmatmul.mubr.msk.f32.gmra.mrb[2].mxu0 %vm377_vm1, %v708_v13  ;;  %v180_v13 = vld [vmem:[#allocation8 + $0x10] sm:$0xff] }
  0xe2   :  { %795 = vmatprep.mubr.f32.mxu0 %v8331_v0  ;;  %5274 = vmatpush1.bf16.msra.mxu0 %v6980_v37 }
  0xe5   :  { %4461 = vmatmul.mubr.msk.f32.gmra.mrb[4].mxu0 %vm377_vm1, %v710_v18  ;;  %v185_v18 = vld [vmem:[#allocation8 + $0x38] sm:$0xff] }
  0xe6   :  { %801 = vmatprep.mubr.f32.mxu0 %v8331_v0 }
  0xe9   :  { %4462 = vmatmul.mubr.msk.f32.gmra.mrb[6].mxu0 %vm377_vm1, %v709_v36  ;;  %v183_v36 = vld [vmem:[#allocation8 + $0x28] sm:$0xff] }
  0xea   :  { %905 = vmatprep.mubr.f32.mxu0 %v8331_v0 }
  0xed   :  { %4463 = vmatmul.mubr.msk.f32.vlgmr.msra.gmra.mrb[0].mxu0 %vm377_vm1, %v6893_v40  ;;  %v7005_v40 = vshrl.u32 %v8328_v38, 7  ;;  %v236_v38 = vld [vmem:[#allocation8 + $0x1d0] sm:$0xff] }
  0xee   :  { %911 = vmatprep.mubr.f32.mxu0 %v8331_v0 }
  0xef   :  { %v8330_v45 = vsub.s32 0, %v7005_v40 }
  0xf1   :  { %4464 = vmatmul.mubr.msk.f32.gmra.mrb[2].mxu0 %vm377_vm1, %v6900_v43  ;;  %v173_v43 = vld [vmem:[%s8313_s2] sm:$0x3] }
  0xf2   :  { %917 = vmatprep.mubr.f32.mxu0 %v8331_v0  ;;  %v7014_v46 = vrot.slane %v173_v43, %v8330_v45  ;;  %v240_v45 = vld [vmem:[#allocation8 + $0x1f0] sm:$0xff] }
  0xf5   :  { %4465 = vmatmul.mubr.msk.f32.gmra.mrb[4].mxu0 %vm377_vm1, %v6905_v44  ;;  %v8329_v44 = vsub.s32 1, %v7005_v40 }
  0xf6   :  { %923 = vmatprep.mubr.f32.mxu0 %v8331_v0 }
  0xf9   :  { %4466 = vmatmul.mubr.msk.f32.gmra.mrb[6].mxu0 %vm377_vm1, %v831_v41  ;;  %v7018_v41 = vrot.slane %v173_v43, %v8329_v44  ;;  %v174_v43 = vld [vmem:[#allocation7] sm:$0xff] }
  0xfa   :  { %1313 = vmatprep.mubr.f32.mxu0 %v8331_v0 }
 0x1c0   :  { %v907_v28 = vpop.f32.mrb[0].mxu0 }
 0x1c1   :  { %v909_v47 = vpop.f32.mrb[1].mxu0  ;;  %v949_v48 = vadd.f32 %v7014_v46, %v907_v28  ;;  %v7040_v28 = vpack.c.bf16 %v180_v13, %v178_v35  ;;  %v200_v35 = vld [vmem:[#allocation8 + $0xb0] sm:$0xff]  ;;  %v203_v13 = vld [vmem:[#allocation8 + $0xc8] sm:$0xff] }
 0x1c2   :  { %v950_v49 = vadd.f32 %v7018_v41, %v909_v47  ;;  %v7043_v47 = vpack.c.bf16 %v185_v18, %v183_v36  ;;  %v205_v36 = vld [vmem:[#allocation8 + $0xd8] sm:$0xff] }
 0x1c3   :  { %v957_v58 = vmax.f32 %v949_v48, 0.0  ;;  %8524 = vst [vmem:[#allocation24_spill] sm:$0xff] %v7040_v28  ;;  %v182_v48 = vld [vmem:[#allocation8 + $0x20] sm:$0xff] }
 0x1c4   :  { %v913_v52 = vpop.f32.mrb[2].mxu0  ;;  %v958_v60 = vmax.f32 %v950_v49, 0.0  ;;  %8525 = vst [vmem:[#allocation25_spill] sm:$0xff] %v7043_v47  ;;  %v184_v49 = vld [vmem:[#allocation8 + $0x30] sm:$0xff] }
 0x1c5   :  { %v951_v53 = vadd.f32 %v7014_v46, %v913_v52  ;;  %v915_v54 = vpop.f32.mrb[3].mxu0  ;;  %v187_v52 = vld [vmem:[#allocation8 + $0x48] sm:$0xff] }
 0x1c6   :  { %v952_v55 = vadd.f32 %v7018_v41, %v915_v54  ;;  %v175_v54 = vld [vmem:[#allocation7 + $0x8] sm:$0xff] }
 0x1c7   :  { %v959_v59 = vmax.f32 %v951_v53, 0.0  ;;  %v189_v53 = vld [vmem:[#allocation8 + $0x58] sm:$0xff] }
 0x1c8   :  { %v960_v61 = vmax.f32 %v952_v55, 0.0  ;;  %v919_v62 = vpop.f32.mrb[4].mxu0  ;;  %v7048_v55 = vpack.c.bf16 %v184_v49, %v182_v48  ;;  %v202_v48 = vld [vmem:[#allocation8 + $0xc0] sm:$0xff]  ;;  %v204_v49 = vld [vmem:[#allocation8 + $0xd0] sm:$0xff] }
 0x1c9   :  { %v921_v63 = vpop.f32.mrb[5].mxu0  ;;  %v5277_v1 = vpack.c.bf16 %v959_v59, %v957_v58  ;;  %v953_v6 = vadd.f32 %v7014_v46, %v919_v62  ;;  %v7051_v58 = vpack.c.bf16 %v189_v53, %v187_v52  ;;  %v186_v59 = vld [vmem:[#allocation8 + $0x40] sm:$0xff]  ;;  %v193_v62 = vld [vmem:[#allocation8 + $0x78] sm:$0xff]  ;;  %v207_v52 = vld [vmem:[#allocation8 + $0xe8] sm:$0xff] }
 0x1ca   :  { %v5275_v2 = vpack.c.bf16 %v960_v61, %v958_v60  ;;  %v954_v7 = vadd.f32 %v7018_v41, %v921_v63  ;;  %8526 = vst [vmem:[#allocation26_spill] sm:$0xff] %v7048_v55  ;;  %v188_v60 = vld [vmem:[#allocation8 + $0x50] sm:$0xff]  ;;  %v191_v61 = vld [vmem:[#allocation8 + $0x68] sm:$0xff]  ;;  %v209_v53 = vld [vmem:[#allocation8 + $0xf8] sm:$0xff] }
 0x1cb   :  { %v961_v21 = vmax.f32 %v953_v6, 0.0  ;;  %8527 = vst [vmem:[#allocation27_spill] sm:$0xff] %v7051_v58  ;;  %v176_v63 = vld [vmem:[#allocation7 + $0x10] sm:$0xff]  ;;  %v190_v6 = vld [vmem:[#allocation8 + $0x60] sm:$0xff] }
 0x1cc   :  { %v925_v10 = vpop.f32.mrb[6].mxu0  ;;  %5276 = vmatprep.subr.bf16.mxu1 %v5275_v2  ;;  %v962_v25 = vmax.f32 %v954_v7, 0.0  ;;  %v7059_v2 = vpack.c.bf16 %v193_v62, %v191_v61  ;;  %v192_v7 = vld [vmem:[#allocation8 + $0x70] sm:$0xff]  ;;  %v211_v62 = vld [vmem:[#allocation8 + $0x108] sm:$0xff] }
 0x1cd   :  { %v955_v11 = vadd.f32 %v7014_v46, %v925_v10  ;;  %v927_v14 = vpop.f32.mrb[7].mxu0  ;;  %5278 = vmatpush1.bf16.msra.mxu1 %v5277_v1  ;;  %v7056_v1 = vpack.c.bf16 %v188_v60, %v186_v59  ;;  %v195_v10 = vld [vmem:[#allocation8 + $0x88] sm:$0xff]  ;;  %v7086_v59 = vpack.c.bf16 %v209_v53, %v207_v52  ;;  %v206_v60 = vld [vmem:[#allocation8 + $0xe0] sm:$0xff]  ;;  %v208_v61 = vld [vmem:[#allocation8 + $0xf0] sm:$0xff] }
 0x1ce   :  { %v956_v16 = vadd.f32 %v7018_v41, %v927_v14  ;;  %8529 = vst [vmem:[#allocation29_spill] sm:$0xff] %v7059_v2  ;;  %v177_v14 = vld [vmem:[#allocation7 + $0x18] sm:$0xf]  ;;  %v220_v52 = vld [vmem:[#allocation8 + $0x150] sm:$0xff]  ;;  %v223_v53 = vld [vmem:[#allocation8 + $0x168] sm:$0xff] }
 0x1cf   :  { %v963_v22 = vmax.f32 %v955_v11, 0.0  ;;  %8528 = vst [vmem:[#allocation28_spill] sm:$0xff] %v7056_v1  ;;  %v197_v11 = vld [vmem:[#allocation8 + $0x98] sm:$0xff]  ;;  %8537 = vst [vmem:[#allocation37_spill] sm:$0xff] %v7086_v59 }
 0x1d0   :  { %v964_v26 = vmax.f32 %v956_v16, 0.0  ;;  %v7064_v16 = vpack.c.bf16 %v192_v7, %v190_v6  ;;  %v7089_v6 = vpack.c.bf16 %v208_v61, %v206_v60  ;;  %v225_v60 = vld [vmem:[#allocation8 + $0x178] sm:$0xff] }
 0x1d1   :  { %v5282_v30 = vpack.c.bf16 %v963_v22, %v961_v21  ;;  %v7067_v21 = vpack.c.bf16 %v197_v11, %v195_v10  ;;  %v194_v22 = vld [vmem:[#allocation8 + $0x80] sm:$0xff]  ;;  %v212_v11 = vld [vmem:[#allocation8 + $0x110] sm:$0xff] }
 0x1d2   :  { %v5279_v32 = vpack.c.bf16 %v964_v26, %v962_v25  ;;  %8530 = vst [vmem:[#allocation30_spill] sm:$0xff] %v7064_v16  ;;  %v201_v25 = vld [vmem:[#allocation8 + $0xb8] sm:$0xff]  ;;  %v7071_v26 = vpack.c.bf16 %v196_v23, %v194_v22  ;;  %8538 = vst [vmem:[#allocation38_spill] sm:$0xff] %v7089_v6  ;;  %v210_v10 = vld [vmem:[#allocation8 + $0x100] sm:$0xff] }
 0x1d3   :  { %8531 = vst [vmem:[#allocation31_spill] sm:$0xff] %v7067_v21  ;;  %v217_v22 = vld [vmem:[#allocation8 + $0x138] sm:$0xff]  ;;  %v7095_v23 = vpack.c.bf16 %v212_v11, %v210_v10  ;;  %v224_v10 = vld [vmem:[#allocation8 + $0x170] sm:$0xff] }
 0x1d4   :  { %5281 = vmatprep.subr.msk.bf16.mxu1 %vm7030_vm6, %v5279_v32  ;;  %8532 = vst [vmem:[#allocation32_spill] sm:$0xff] %v7071_v26  ;;  %v198_v32 = vld [vmem:[#allocation8 + $0xa0] sm:$0xff] }
 0x1d5   :  { %5284 = vmatpush1.bf16.msk.msra.mxu1 %vm7030_vm6, %v5282_v30  ;;  %v7074_v30 = vpack.c.bf16 %v201_v25, %v199_v24  ;;  %v7077_v18 = vpack.c.bf16 %v200_v35, %v198_v32  ;;  %8540 = vst [vmem:[#allocation40_spill] sm:$0xff] %v7095_v23  ;;  %v214_v25 = vld [vmem:[#allocation8 + $0x120] sm:$0xff]  ;;  %v216_v32 = vld [vmem:[#allocation8 + $0x130] sm:$0xff]  ;;  %v219_v35 = vld [vmem:[#allocation8 + $0x148] sm:$0xff] }
 0x1d6   :  { %5286 = vmatprep.subr.bf16.mxu1 %v7034_v12  ;;  %v8716_v31 = vld [vmem:[#allocation27_spill] sm:$0xff] }
 0x1d7   :  { %8533 = vst [vmem:[#allocation33_spill] sm:$0xff] %v7074_v30  ;;  %8534 = vst [vmem:[#allocation34_spill] sm:$0xff] %v7077_v18 }
 0x1d8   :  { %4469 = vmatmul.mubr.msk.f32.vlgmr.msra.gmra.mrb[0].mxu1 %vm965_vm7, %v174_v43  ;;  %v7080_v43 = vpack.c.bf16 %v205_v36, %v203_v13  ;;  %v221_v13 = vld [vmem:[#allocation8 + $0x158] sm:$0xff]  ;;  %v7101_v36 = vpack.c.bf16 %v216_v32, %v214_v25  ;;  %v226_v32 = vld [vmem:[#allocation8 + $0x180] sm:$0xff] }
 0x1d9   :  { %1054 = vmatprep.mubr.f32.mxu1 %v8331_v0  ;;  %5288 = vmatpush1.bf16.msra.mxu1 %v7040_v28  ;;  %v1187_v28 = vld [vmem:[#allocation10 + $0x50] sm:$0xff] }
 0x1da   :  { %5290 = vmatprep.subr.bf16.mxu1 %v7043_v47  ;;  %8535 = vst [vmem:[#allocation35_spill] sm:$0xff] %v7080_v43  ;;  %8542 = vst [vmem:[#allocation42_spill] sm:$0xff] %v7101_v36 }
 0x1dc   :  { %4470 = vmatmul.mubr.msk.f32.gmra.mrb[2].mxu1 %vm965_vm7, %v175_v54  ;;  %v7083_v54 = vpack.c.bf16 %v204_v49, %v202_v48  ;;  %v7104_v48 = vpack.c.bf16 %v221_v13, %v219_v35  ;;  %v218_v49 = vld [vmem:[#allocation8 + $0x140] sm:$0xff]  ;;  %v228_v35 = vld [vmem:[#allocation8 + $0x190] sm:$0xff] }
 0x1dd   :  { %1060 = vmatprep.mubr.f32.mxu1 %v8331_v0  ;;  %5292 = vmatpush1.bf16.msra.mxu1 %v7048_v55  ;;  %v7107_v61 = vpack.c.bf16 %v220_v52, %v218_v49  ;;  %v7119_v13 = vpack.c.bf16 %v228_v35, %v226_v32  ;;  %v231_v49 = vld [vmem:[#allocation8 + $0x1a8] sm:$0xff]  ;;  %v233_v52 = vld [vmem:[#allocation8 + $0x1b8] sm:$0xff]  ;;  %v234_v35 = vld [vmem:[#allocation8 + $0x1c0] sm:$0xff] }
 0x1de   :  { %5294 = vmatprep.subr.bf16.mxu1 %v7051_v58  ;;  %8536 = vst [vmem:[#allocation36_spill] sm:$0xff] %v7083_v54  ;;  %8543 = vst [vmem:[#allocation43_spill] sm:$0xff] %v7104_v48  ;;  %v7131_v44 = vpack.c.bf16 %v236_v38, %v234_v35  ;;  %v1210_v38 = vld [vmem:[#allocation10 + $0x100] sm:$0xff]  ;;  %v1188_v58 = vld [vmem:[#allocation10 + $0x58] sm:$0xff] }
 0x1df   :  { %8544 = vst [vmem:[#allocation44_spill] sm:$0xff] %v7107_v61  ;;  %8548 = vst [vmem:[#allocation48_spill] sm:$0xff] %v7119_v13 }
 0x1e0   :  { %4471 = vmatmul.mubr.msk.f32.gmra.mrb[4].mxu1 %vm965_vm7, %v176_v63  ;;  %v213_v63 = vld [vmem:[#allocation8 + $0x118] sm:$0xff]  ;;  %8552 = vst [vmem:[#allocation52_spill] sm:$0xff] %v7131_v44 }
 0x1e1   :  { %1066 = vmatprep.mubr.f32.mxu1 %v8331_v0  ;;  %5296 = vmatpush1.bf16.msra.mxu1 %v7056_v1  ;;  %v7092_v7 = vpack.c.bf16 %v213_v63, %v211_v62  ;;  %v7110_v62 = vpack.c.bf16 %v225_v60, %v223_v53  ;;  %v222_v63 = vld [vmem:[#allocation8 + $0x160] sm:$0xff]  ;;  %v7123_v53 = vpack.c.bf16 %v233_v52, %v231_v49  ;;  %v239_v49 = vld [vmem:[#allocation8 + $0x1e8] sm:$0xff]  ;;  %v241_v52 = vld [vmem:[#allocation8 + $0x1f8] sm:$0xff] }
 0x1e2   :  { %5298 = vmatprep.subr.bf16.mxu1 %v7059_v2  ;;  %v7113_v11 = vpack.c.bf16 %v224_v10, %v222_v63  ;;  %v230_v60 = vld [vmem:[#allocation8 + $0x1a0] sm:$0xff]  ;;  %v232_v63 = vld [vmem:[#allocation8 + $0x1b0] sm:$0xff]  ;;  %v1186_v1 = vld [vmem:[#allocation10 + $0x48] sm:$0xff] }
 0x1e3   :  { %8539 = vst [vmem:[#allocation39_spill] sm:$0xff] %v7092_v7  ;;  %8545 = vst [vmem:[#allocation45_spill] sm:$0xff] %v7110_v62  ;;  %v7125_v10 = vpack.c.bf16 %v232_v63, %v230_v60  ;;  %v7135_v60 = vpack.c.bf16 %v241_v52, %v239_v49  ;;  %v238_v63 = vld [vmem:[#allocation8 + $0x1e0] sm:$0xff] }
 0x1e4   :  { %4472 = vmatmul.mubr.msk.f32.gmra.mrb[6].mxu1 %vm965_vm7, %v177_v14  ;;  %v215_v14 = vld [vmem:[#allocation8 + $0x128] sm:$0xff]  ;;  %8546 = vst [vmem:[#allocation46_spill] sm:$0xff] %v7113_v11  ;;  %8549 = vst [vmem:[#allocation49_spill] sm:$0xff] %v7123_v53  ;;  %v7137_v0 = vpack.c.bf16 %v240_v45, %v238_v63  ;;  %v1214_v52 = vld [vmem:[#allocation10 + $0x120] sm:$0xff] }
 0x1e5   :  { %5300 = vmatpush1.bf16.msra.mxu1 %v7064_v16  ;;  %v7098_v24 = vpack.c.bf16 %v217_v22, %v215_v14  ;;  %v227_v14 = vld [vmem:[#allocation8 + $0x188] sm:$0xff]  ;;  %v229_v22 = vld [vmem:[#allocation8 + $0x198] sm:$0xff]  ;;  %8550 = vst [vmem:[#allocation50_spill] sm:$0xff] %v7125_v10  ;;  %8553 = vst [vmem:[#allocation53_spill] sm:$0xff] %v7135_v60 }
 0x1e6   :  { %5302 = vmatprep.subr.bf16.mxu1 %v7067_v21  ;;  %v7117_v25 = vpack.c.bf16 %v229_v22, %v227_v14  ;;  %v235_v14 = vld [vmem:[#allocation8 + $0x1c8] sm:$0xff]  ;;  %v237_v22 = vld [vmem:[#allocation8 + $0x1d8] sm:$0xff]  ;;  %8554 = vst [vmem:[#allocation54_spill] sm:$0xff] %v7137_v0 }
 0x1e7   :  { %8541 = vst [vmem:[#allocation41_spill] sm:$0xff] %v7098_v24  ;;  %v7129_v32 = vpack.c.bf16 %v237_v22, %v235_v14  ;;  %v1211_v14 = vld [vmem:[#allocation10 + $0x108] sm:$0xff]  ;;  %v1213_v22 = vld [vmem:[#allocation10 + $0x118] sm:$0xff] }
 0x1e8   :  { %8547 = vst [vmem:[#allocation47_spill] sm:$0xff] %v7117_v25  ;;  %v7141_v35 = vpack.c.bf16 %v1213_v22, %v1211_v14  ;;  %v1219_v45 = vld [vmem:[#allocation10 + $0x148] sm:$0xff]  ;;  %v1221_v63 = vld [vmem:[#allocation10 + $0x158] sm:$0xff]  ;;  %v1218_v22 = vld [vmem:[#allocation10 + $0x140] sm:$0xff] }
 0x1e9   :  { %5304 = vmatpush1.bf16.msra.mxu1 %v7071_v26  ;;  %8551 = vst [vmem:[#allocation51_spill] sm:$0xff] %v7129_v32  ;;  %v7152_v14 = vpack.c.bf16 %v1221_v63, %v1219_v45 }
 0x1ea   :  { %5306 = vmatprep.subr.bf16.mxu1 %v7074_v30  ;;  %5350 = vmatprep.subr.bf16.mxu0 %v7141_v35 }
 0x1ed   :  { %5308 = vmatpush1.bf16.msra.mxu1 %v7077_v18 }
 0x1ee   :  { %5310 = vmatprep.subr.bf16.mxu1 %v7080_v43 }
 0x1f1   :  { %5312 = vmatpush1.bf16.msra.mxu1 %v7083_v54 }
 0x1f2   :  { %5314 = vmatprep.subr.bf16.mxu1 %v7086_v59 }
 0x1f5   :  { %5316 = vmatpush1.bf16.msra.mxu1 %v7089_v6 }
 0x1f6   :  { %5318 = vmatprep.subr.bf16.mxu1 %v7092_v7 }
 0x1f9   :  { %5320 = vmatpush1.bf16.msra.mxu1 %v7095_v23 }
 0x1fa   :  { %5322 = vmatprep.subr.bf16.mxu1 %v7098_v24 }
 0x1fd   :  { %5324 = vmatpush1.bf16.msra.mxu1 %v7101_v36  ;;  %v1232_v36 = vld [vmem:[#allocation10 + $0x1b0] sm:$0xff] }
 0x1fe   :  { %5326 = vmatprep.subr.bf16.mxu1 %v7104_v48  ;;  %v1230_v48 = vld [vmem:[#allocation10 + $0x1a0] sm:$0xff] }
 0x201   :  { %5328 = vmatpush1.bf16.msra.mxu1 %v7107_v61  ;;  %v1228_v61 = vld [vmem:[#allocation10 + $0x190] sm:$0xff] }
 0x202   :  { %5330 = vmatprep.subr.bf16.mxu1 %v7110_v62  ;;  %v1226_v62 = vld [vmem:[#allocation10 + $0x180] sm:$0xff] }
 0x205   :  { %5332 = vmatpush1.bf16.msra.mxu1 %v7113_v11  ;;  %v1224_v11 = vld [vmem:[#allocation10 + $0x170] sm:$0xff] }
 0x206   :  { %5334 = vmatprep.subr.bf16.mxu1 %v7117_v25  ;;  %v1222_v25 = vld [vmem:[#allocation10 + $0x160] sm:$0xff] }
 0x207   :  { %v7161_v45 = vpack.c.bf16 %v1224_v11, %v1222_v25  ;;  %v7173_v11 = vpack.c.bf16 %v1232_v36, %v1230_v48 }
 0x209   :  { %5336 = vmatpush1.bf16.msra.mxu1 %v7119_v13  ;;  %v1216_v13 = vld [vmem:[#allocation10 + $0x130] sm:$0xff] }
 0x20a   :  { %5338 = vmatprep.subr.bf16.mxu1 %v7123_v53 }
 0x20d   :  { %5340 = vmatpush1.bf16.msra.mxu1 %v7125_v10  ;;  %v1215_v10 = vld [vmem:[#allocation10 + $0x128] sm:$0xff] }
 0x20e   :  { %5342 = vmatprep.subr.bf16.mxu1 %v7129_v32  ;;  %v1212_v32 = vld [vmem:[#allocation10 + $0x110] sm:$0xff] }
 0x20f   :  { %v7143_v53 = vpack.c.bf16 %v1212_v32, %v1210_v38  ;;  %v1223_v32 = vld [vmem:[#allocation10 + $0x168] sm:$0xff]  ;;  %v1225_v38 = vld [vmem:[#allocation10 + $0x178] sm:$0xff] }
 0x211   :  { %5344 = vmatpush1.bf16.msra.mxu1 %v7131_v44  ;;  %v1217_v44 = vld [vmem:[#allocation10 + $0x138] sm:$0xff]  ;;  %5352 = vmatpush1.bf16.msra.mxu0 %v7143_v53 }
 0x212   :  { %5346 = vmatprep.subr.bf16.mxu1 %v7135_v60  ;;  %v7145_v49 = vpack.c.bf16 %v1217_v44, %v1215_v10  ;;  %v1220_v60 = vld [vmem:[#allocation10 + $0x150] sm:$0xff]  ;;  %v7158_v10 = vpack.c.bf16 %v1225_v38, %v1223_v32  ;;  %v7167_v32 = vpack.c.bf16 %v1228_v61, %v1226_v62 }
 0x213   :  { %v7155_v44 = vpack.c.bf16 %v1220_v60, %v1218_v22  ;;  %v1231_v60 = vld [vmem:[#allocation10 + $0x1a8] sm:$0xff]  ;;  %v1233_v22 = vld [vmem:[#allocation10 + $0x1b8] sm:$0xff] }
 0x214   :  { %5354 = vmatprep.subr.bf16.mxu0 %v7145_v49  ;;  %v7170_v38 = vpack.c.bf16 %v1233_v22, %v1231_v60 }
 0x215   :  { %5348 = vmatpush1.bf16.msra.mxu1 %v7137_v0  ;;  %v7149_v0 = vpack.c.bf16 %v1216_v13, %v1214_v52  ;;  %v1227_v13 = vld [vmem:[#allocation10 + $0x188] sm:$0xff]  ;;  %v1229_v52 = vld [vmem:[#allocation10 + $0x198] sm:$0xff] }
 0x216   :  { %v7164_v63 = vpack.c.bf16 %v1229_v52, %v1227_v13 }
 0x217   :  { %5356 = vmatpush1.bf16.msra.mxu0 %v7149_v0 }
 0x218   :  { %5358 = vmatprep.subr.bf16.mxu0 %v7152_v14 }
 0x21b   :  { %5360 = vmatpush1.bf16.msra.mxu0 %v7155_v44 }
 0x21c   :  { %5362 = vmatprep.subr.bf16.mxu0 %v7158_v10 }
 0x21f   :  { %5364 = vmatpush1.bf16.msra.mxu0 %v7161_v45 }
 0x220   :  { %5366 = vmatprep.subr.bf16.mxu0 %v7164_v63 }
 0x223   :  { %5368 = vmatpush1.bf16.msra.mxu0 %v7167_v32 }
 0x224   :  { %5370 = vmatprep.subr.bf16.mxu0 %v7170_v38 }
 0x227   :  { %5372 = vmatpush1.bf16.msra.mxu0 %v7173_v11 }
 0x2ab   :  { %v1050_v25 = vpop.f32.mrb[0].mxu1 }
 0x2ac   :  { %v1052_v13 = vpop.f32.mrb[1].mxu1 }
 0x2af   :  { %v1056_v52 = vpop.f32.mrb[2].mxu1 }
 0x2b0   :  { %v1058_v24 = vpop.f32.mrb[3].mxu1  ;;  %v1080_v62 = vrot.slane %v1056_v52, 6 }
 0x2b1   :  { %v1083_v22 = vrot.slane %v1058_v24, 6 }
 0x2b3   :  { %v1062_v61 = vpop.f32.mrb[4].mxu1 }
 0x2b4   :  { %v1081_v23 = vrot.slane %v1062_v61, 6  ;;  %v1064_v60 = vpop.f32.mrb[5].mxu1 }
 0x2b5   :  { %v1084_v7 = vrot.slane %v1064_v60, 6  ;;  %v1235_v60 = vld [vmem:[#allocation10 + $0x1c8] sm:$0xff] }
 0x2b6   :  { %v1082_v6 = vsel %vm1079_vm8, %v1080_v62, %v1081_v23  ;;  %v1237_v62 = vld [vmem:[#allocation10 + $0x1d8] sm:$0xff] }
 0x2b7   :  { %v1094_v59 = vmax.f32 %v1050_v25, %v1082_v6  ;;  %v1068_v36 = vpop.f32.mrb[6].mxu1  ;;  %v1085_v48 = vsel %vm1079_vm8, %v1083_v22, %v1084_v7  ;;  %v7181_v6 = vpack.c.bf16 %v1237_v62, %v1235_v60  ;;  %v1234_v25 = vld [vmem:[#allocation10 + $0x1c0] sm:$0xff]  ;;  %v1236_v22 = vld [vmem:[#allocation10 + $0x1d0] sm:$0xff] }
 0x2b8   :  { %v1086_v54 = vrot.slane %v1068_v36, 6  ;;  %v1070_v43 = vpop.f32.mrb[7].mxu1  ;;  %v1095_v18 = vmax.f32 %v1052_v13, %v1085_v48  ;;  %v7183_v36 = vpack.c.bf16 %v1236_v22, %v1234_v25  ;;  %v1179_v48 = vld [vmem:[#allocation10 + $0x10] sm:$0xff]  ;;  %v1182_v22 = vld [vmem:[#allocation10 + $0x28] sm:$0xff] }
 0x2b9   :  { %v1088_v30 = vrot.slane %v1070_v43, 6  ;;  %5374 = vmatprep.subr.bf16.mxu0 %v7181_v6  ;;  %v1241_v43 = vld [vmem:[#allocation10 + $0x1f8] sm:$0xff] }
 0x2ba   :  { %1162 = vmatprep.mubr.f32.mxu1 %v1095_v18  ;;  %v1087_v26 = vsel %vm1079_vm8, %v1081_v23, %v1086_v54  ;;  %5376 = vmatpush1.bf16.msra.mxu0 %v7183_v36  ;;  %v1239_v18 = vld [vmem:[#allocation10 + $0x1e8] sm:$0xff] }
 0x2bb   :  { %1163 = vmatmul.mubr.f32.vlgmr.msra.gmra.mrb[8].mxu1 %v1094_v59  ;;  %v1089_v21 = vsel %vm1079_vm8, %v1084_v7, %v1088_v30  ;;  %v1096_v61 = vmax.f32 %v1056_v52, %v1087_v26  ;;  %v7187_v54 = vpack.c.bf16 %v1241_v43, %v1239_v18  ;;  %v1238_v26 = vld [vmem:[#allocation10 + $0x1e0] sm:$0xff]  ;;  %v1178_v30 = vld [vmem:[#allocation10 + $0x8] sm:$0xff]  ;;  %v1180_v59 = vld [vmem:[#allocation10 + $0x18] sm:$0xff] }
 0x2bc   :  { %v1097_v16 = vmax.f32 %v1058_v24, %v1089_v21  ;;  %v1240_v21 = vld [vmem:[#allocation10 + $0x1f0] sm:$0xff]  ;;  %v7193_v7 = vpack.c.bf16 %v1180_v59, %v1178_v30  ;;  %v1177_v52 = vld [vmem:[#allocation10] sm:$0xff]  ;;  %v1184_v18 = vld [vmem:[#allocation10 + $0x38] sm:$0xff] }
 0x2bd   :  { %5378 = vmatprep.subr.bf16.mxu0 %v7187_v54  ;;  %v7200_v25 = vpack.c.bf16 %v1179_v48, %v1177_v52  ;;  %v7210_v52 = vpack.c.bf16 %v1184_v18, %v1182_v22  ;;  %v1181_v48 = vld [vmem:[#allocation10 + $0x20] sm:$0xff]  ;;  %v8557_v18 = vmov 0.0  }
 0x2be   :  { %1168 = vmatprep.mubr.f32.mxu1 %v1097_v16  ;;  %v7189_v16 = vpack.c.bf16 %v1240_v21, %v1238_v26 }
 0x2bf   :  { %1169 = vmatmul.mubr.f32.gmra.mrb[10].mxu1 %v1096_v61  ;;  %8555 = vst [vmem:[#allocation55_spill] sm:$0xff] %v7200_v25  ;;  %8556 = vst [vmem:[#allocation56_spill] sm:$0xff] %v7210_v52 }
 0x2c0   :  { %5380 = vmatpush1.bf16.msra.mxu0 %v7189_v16 }
 0x2c1   :  { %5382 = vmatprep.subr.bf16.mxu0 %v7193_v7 }
 0x38e   :  { %v1164_v23 = vpop.f32.mrb[8].mxu1 }
 0x38f   :  { %v1166_v24 = vpop.f32.mrb[9].mxu1 }
 0x390   :  { %v7196_v13 = vmax.f32 %v1164_v23, %v1166_v24 }
 0x392   :  { %v1170_v61 = vpop.f32.mrb[10].mxu1  ;;  %v1244_v43 = vrot.slane %v7196_v13, 1  ;;  %v1436_v26 = vrot.slane %v7196_v13, 2  ;;  %v1555_v21 = vrot.slane %v7196_v13, 3  ;;  %v1674_v30 = vrot.slane %v7196_v13, 4 }
 0x393   :  { %v1172_v60 = vpop.f32.mrb[11].mxu1 }
 0x394   :  { %v7198_v62 = vmax.f32 %v1170_v61, %v1172_v60  ;;  %v1183_v60 = vld [vmem:[#allocation10 + $0x30] sm:$0xff] }
 0x396   :  { %v1245_v59 = vrot.slane %v7198_v62, 1  ;;  %v8363_v23 = vrot.slane %v7198_v62, 2  ;;  %v8365_v24 = vrot.slane %v7198_v62, 3  ;;  %v8366_v61 = vrot.slane %v7198_v62, 4 }
 0x398   :  { %v1246_v2 = vsel %vm369_vm0, %v1244_v43, %v1245_v59  ;;  %v7216_v55 = vsel %vm581_vm3, %v1436_v26, %v8363_v23  ;;  %v7221_v47 = vsel %vm703_vm4, %v1555_v21, %v8365_v24  ;;  %v7226_v22 = vsel %vm825_vm2, %v1674_v30, %v8366_v61  ;;  %v1185_v23 = vld [vmem:[#allocation10 + $0x40] sm:$0xff]  ;;  %v1190_v21 = vld [vmem:[#allocation10 + $0x68] sm:$0xff]  ;;  %v1192_v24 = vld [vmem:[#allocation10 + $0x78] sm:$0xff] }
 0x399   :  { %1314 = vmatmul.mubr.f32.vlgmr.msra.gmra.mrb[8].mxu0 %v1246_v2  ;;  %v7230_v43 = vpack.c.bf16 %v1183_v60, %v1181_v48  ;;  %v7233_v26 = vpack.c.bf16 %v1188_v58, %v1186_v1  ;;  %v7236_v30 = vpack.c.bf16 %v1187_v28, %v1185_v23  ;;  %v7240_v2 = vpack.c.bf16 %v1192_v24, %v1190_v21  ;;  %v1189_v48 = vld [vmem:[#allocation10 + $0x60] sm:$0xff]  ;;  %v1191_v60 = vld [vmem:[#allocation10 + $0x70] sm:$0xff]  ;;  %v1194_v61 = vld [vmem:[#allocation10 + $0x88] sm:$0xff] }
 0x39a   :  { %5384 = vmatpush1.bf16.msra.mxu0 %v7200_v25  ;;  %1319 = vmatprep.mubr.f32.mxu0 %v8557_v18  ;;  %v1196_v58 = vld [vmem:[#allocation10 + $0x98] sm:$0xff]  ;;  %v7243_v1 = vpack.c.bf16 %v1191_v60, %v1189_v48  ;;  %v1193_v28 = vld [vmem:[#allocation10 + $0x80] sm:$0xff]  ;;  %v1195_v23 = vld [vmem:[#allocation10 + $0x90] sm:$0xff] }
 0x39b   :  { %8558 = vst [vmem:[#allocation57_spill] sm:$0xff] %v7230_v43  ;;  %5386 = vmatprep.subr.bf16.mxu0 %v7210_v52  ;;  %8559 = vst [vmem:[#allocation58_spill] sm:$0xff] %v7233_v26  ;;  %v1200_v52 = vld [vmem:[#allocation10 + $0xb8] sm:$0xff]  ;;  %v7249_v24 = vpack.c.bf16 %v1195_v23, %v1193_v28  ;;  %v1202_v48 = vld [vmem:[#allocation10 + $0xc8] sm:$0xff] }
 0x39c   :  { %8560 = vst [vmem:[#allocation59_spill] sm:$0xff] %v7236_v30  ;;  %8561 = vst [vmem:[#allocation60_spill] sm:$0xff] %v7240_v2  ;;  %v1204_v60 = vld [vmem:[#allocation10 + $0xd8] sm:$0xff]  ;;  %v1206_v28 = vld [vmem:[#allocation10 + $0xe8] sm:$0xff] }
 0x39d   :  { %1320 = vmatmul.mubr.f32.gmra.mrb[10].mxu0 %v1245_v59  ;;  %8562 = vst [vmem:[#allocation61_spill] sm:$0xff] %v7243_v1  ;;  %v7246_v59 = vpack.c.bf16 %v1196_v58, %v1194_v61  ;;  %8564 = vst [vmem:[#allocation63_spill] sm:$0xff] %v7249_v24  ;;  %v7258_v58 = vpack.c.bf16 %v1204_v60, %v1202_v48  ;;  %v1208_v23 = vld [vmem:[#allocation10 + $0xf8] sm:$0xff] }
 0x39e   :  { %5388 = vmatpush1.bf16.msra.mxu0 %v7230_v43  ;;  %1390 = vmatprep.mubr.f32.mxu0 %v8557_v18  ;;  %v1198_v43 = vld [vmem:[#allocation10 + $0xa8] sm:$0xff] }
 0x39f   :  { %5390 = vmatprep.subr.bf16.mxu0 %v7233_v26  ;;  %8563 = vst [vmem:[#allocation62_spill] sm:$0xff] %v7246_v59  ;;  %v7252_v21 = vpack.c.bf16 %v1200_v52, %v1198_v43  ;;  %v1197_v26 = vld [vmem:[#allocation10 + $0xa0] sm:$0xff]  ;;  %8567 = vst [vmem:[#allocation66_spill] sm:$0xff] %v7258_v58  ;;  %v7264_v43 = vpack.c.bf16 %v1208_v23, %v1206_v28 }
 0x3a1   :  { %8565 = vst [vmem:[#allocation64_spill] sm:$0xff] %v7252_v21  ;;  %8569 = vst [vmem:[#allocation68_spill] sm:$0xff] %v7264_v43 }
 0x3a2   :  { %5392 = vmatpush1.bf16.msra.mxu0 %v7236_v30  ;;  %v1199_v30 = vld [vmem:[#allocation10 + $0xb0] sm:$0xff] }
 0x3a3   :  { %5394 = vmatprep.subr.bf16.mxu0 %v7240_v2  ;;  %v7255_v61 = vpack.c.bf16 %v1199_v30, %v1197_v26  ;;  %v1201_v2 = vld [vmem:[#allocation10 + $0xc0] sm:$0xff]  ;;  %v1405_v26 = vld [vmem:[#allocation10 + $0x208] sm:$0xff]  ;;  %v1407_v30 = vld [vmem:[#allocation10 + $0x218] sm:$0xff] }
 0x3a4   :  { %v7270_v60 = vpack.c.bf16 %v1407_v30, %v1405_v26  ;;  %v1414_v30 = vld [vmem:[#allocation10 + $0x250] sm:$0xff] }
 0x3a5   :  { %8566 = vst [vmem:[#allocation65_spill] sm:$0xff] %v7255_v61 }
 0x3a6   :  { %5396 = vmatpush1.bf16.msra.mxu0 %v7243_v1  ;;  %v1203_v1 = vld [vmem:[#allocation10 + $0xd0] sm:$0xff]  ;;  %8571 = vst [vmem:[#allocation70_spill] sm:$0xff] %v7270_v60 }
 0x3a7   :  { %5398 = vmatprep.subr.bf16.mxu0 %v7246_v59  ;;  %v7261_v52 = vpack.c.bf16 %v1203_v1, %v1201_v2  ;;  %v1205_v59 = vld [vmem:[#allocation10 + $0xe0] sm:$0xff]  ;;  %v1409_v2 = vld [vmem:[#allocation10 + $0x228] sm:$0xff]  ;;  %v1411_v1 = vld [vmem:[#allocation10 + $0x238] sm:$0xff] }
 0x3a8   :  { %v7276_v23 = vpack.c.bf16 %v1411_v1, %v1409_v2  ;;  %v1417_v2 = vld [vmem:[#allocation10 + $0x268] sm:$0xff]  ;;  %v1419_v1 = vld [vmem:[#allocation10 + $0x278] sm:$0xff] }
 0x3a9   :  { %8568 = vst [vmem:[#allocation67_spill] sm:$0xff] %v7261_v52 }
 0x3aa   :  { %5400 = vmatpush1.bf16.msra.mxu0 %v7249_v24  ;;  %v1207_v24 = vld [vmem:[#allocation10 + $0xf0] sm:$0xff]  ;;  %8573 = vst [vmem:[#allocation72_spill] sm:$0xff] %v7276_v23 }
 0x3ab   :  { %5402 = vmatprep.subr.bf16.mxu0 %v7252_v21  ;;  %v7267_v48 = vpack.c.bf16 %v1207_v24, %v1205_v59  ;;  %v1404_v21 = vld [vmem:[#allocation10 + $0x200] sm:$0xff]  ;;  %v1413_v59 = vld [vmem:[#allocation10 + $0x248] sm:$0xff]  ;;  %v1415_v24 = vld [vmem:[#allocation10 + $0x258] sm:$0xff] }
 0x3ad   :  { %8570 = vst [vmem:[#allocation69_spill] sm:$0xff] %v7267_v48 }
 0x3ae   :  { %5404 = vmatpush1.bf16.msra.mxu0 %v7255_v61  ;;  %v1406_v61 = vld [vmem:[#allocation10 + $0x210] sm:$0xff] }
 0x3af   :  { %5406 = vmatprep.subr.bf16.mxu0 %v7258_v58  ;;  %v7273_v28 = vpack.c.bf16 %v1406_v61, %v1404_v21  ;;  %v1408_v58 = vld [vmem:[#allocation10 + $0x220] sm:$0xff]  ;;  %v7284_v21 = vpack.c.bf16 %v1415_v24, %v1413_v59  ;;  %v1421_v59 = vld [vmem:[#allocation10 + $0x288] sm:$0xff]  ;;  %v1423_v24 = vld [vmem:[#allocation10 + $0x298] sm:$0xff] }
 0x3b0   :  { %v1412_v61 = vld [vmem:[#allocation10 + $0x240] sm:$0xff] }
 0x3b1   :  { %8572 = vst [vmem:[#allocation71_spill] sm:$0xff] %v7273_v28  ;;  %8575 = vst [vmem:[#allocation74_spill] sm:$0xff] %v7284_v21 }
 0x3b2   :  { %5408 = vmatpush1.bf16.msra.mxu0 %v7261_v52  ;;  %v1410_v52 = vld [vmem:[#allocation10 + $0x230] sm:$0xff] }
 0x3b3   :  { %5410 = vmatprep.subr.bf16.mxu0 %v7264_v43  ;;  %v7281_v26 = vpack.c.bf16 %v1410_v52, %v1408_v58  ;;  %v1416_v58 = vld [vmem:[#allocation10 + $0x260] sm:$0xff]  ;;  %v1418_v52 = vld [vmem:[#allocation10 + $0x270] sm:$0xff] }
 0x3b5   :  { %8574 = vst [vmem:[#allocation73_spill] sm:$0xff] %v7281_v26 }
 0x3b6   :  { %5412 = vmatpush1.bf16.msra.mxu0 %v7267_v48  ;;  %v1427_v48 = vld [vmem:[#allocation10 + $0x2b8] sm:$0xff] }
 0x3b7   :  { %5414 = vmatprep.subr.bf16.mxu0 %v7270_v60  ;;  %v7288_v60 = vpack.c.bf16 %v1414_v30, %v1412_v61  ;;  %v1420_v61 = vld [vmem:[#allocation10 + $0x280] sm:$0xff]  ;;  %v1422_v30 = vld [vmem:[#allocation10 + $0x290] sm:$0xff] }
 0x3b9   :  { %1391 = vmatmul.mubr.f32.vlgmr.msra.gmra.mrb[8].mxu0 %v7196_v13  ;;  %8576 = vst [vmem:[#allocation75_spill] sm:$0xff] %v7288_v60  ;;  %v7292_v13 = vpack.c.bf16 %v1419_v1, %v1417_v2  ;;  %v7301_v2 = vpack.c.bf16 %v1422_v30, %v1420_v61  ;;  %v1433_v61 = vld [vmem:[#allocation10 + $0x2e8] sm:$0xff]  ;;  %v1435_v30 = vld [vmem:[#allocation10 + $0x2f8] sm:$0xff] }
 0x3ba   :  { %5416 = vmatpush1.bf16.msra.mxu0 %v7273_v28  ;;  %1396 = vmatprep.mubr.f32.mxu0 %v8557_v18  ;;  %v7298_v28 = vpack.c.bf16 %v1423_v24, %v1421_v59 }
 0x3bb   :  { %5418 = vmatprep.subr.bf16.mxu0 %v7276_v23  ;;  %8577 = vst [vmem:[#allocation76_spill] sm:$0xff] %v7292_v13  ;;  %v7295_v23 = vpack.c.bf16 %v1418_v52, %v1416_v58  ;;  %8580 = vst [vmem:[#allocation79_spill] sm:$0xff] %v7301_v2  ;;  %v1429_v58 = vld [vmem:[#allocation10 + $0x2c8] sm:$0xff]  ;;  %v1431_v52 = vld [vmem:[#allocation10 + $0x2d8] sm:$0xff] }
 0x3bc   :  { %8579 = vst [vmem:[#allocation78_spill] sm:$0xff] %v7298_v28  ;;  %v7310_v24 = vpack.c.bf16 %v1431_v52, %v1429_v58 }
 0x3bd   :  { %1397 = vmatmul.mubr.f32.gmra.mrb[10].mxu0 %v7198_v62  ;;  %8578 = vst [vmem:[#allocation77_spill] sm:$0xff] %v7295_v23 }
 0x3be   :  { %5420 = vmatpush1.bf16.msra.mxu0 %v7281_v26  ;;  %1505 = vmatprep.mubr.f32.mxu0 %v8557_v18  ;;  %v1425_v26 = vld [vmem:[#allocation10 + $0x2a8] sm:$0xff]  ;;  %8583 = vst [vmem:[#allocation82_spill] sm:$0xff] %v7310_v24 }
 0x3bf   :  { %5422 = vmatprep.subr.bf16.mxu0 %v7284_v21  ;;  %v7304_v1 = vpack.c.bf16 %v1427_v48, %v1425_v26  ;;  %v1424_v21 = vld [vmem:[#allocation10 + $0x2a0] sm:$0xff]  ;;  %v7316_v26 = vpack.c.bf16 %v1435_v30, %v1433_v61 }
 0x3c1   :  { %8581 = vst [vmem:[#allocation80_spill] sm:$0xff] %v7304_v1  ;;  %8585 = vst [vmem:[#allocation84_spill] sm:$0xff] %v7316_v26 }
 0x3c2   :  { %5424 = vmatpush1.bf16.msra.mxu0 %v7288_v60  ;;  %v1426_v60 = vld [vmem:[#allocation10 + $0x2b0] sm:$0xff] }
 0x3c3   :  { %5426 = vmatprep.subr.bf16.mxu0 %v7292_v13  ;;  %v7307_v59 = vpack.c.bf16 %v1426_v60, %v1424_v21  ;;  %v1428_v13 = vld [vmem:[#allocation10 + $0x2c0] sm:$0xff]  ;;  %v1524_v60 = vld [vmem:[#allocation10 + $0x308] sm:$0xff]  ;;  %v1526_v21 = vld [vmem:[#allocation10 + $0x318] sm:$0xff] }
 0x3c4   :  { %v7322_v52 = vpack.c.bf16 %v1526_v21, %v1524_v60  ;;  %v1533_v21 = vld [vmem:[#allocation10 + $0x350] sm:$0xff] }
 0x3c5   :  { %8582 = vst [vmem:[#allocation81_spill] sm:$0xff] %v7307_v59 }
 0x3c6   :  { %5428 = vmatpush1.bf16.msra.mxu0 %v7295_v23  ;;  %v1430_v23 = vld [vmem:[#allocation10 + $0x2d0] sm:$0xff]  ;;  %8587 = vst [vmem:[#allocation86_spill] sm:$0xff] %v7322_v52 }
 0x3c7   :  { %5430 = vmatprep.subr.bf16.mxu0 %v7298_v28  ;;  %v7313_v48 = vpack.c.bf16 %v1430_v23, %v1428_v13  ;;  %v1432_v28 = vld [vmem:[#allocation10 + $0x2e0] sm:$0xff]  ;;  %v1528_v23 = vld [vmem:[#allocation10 + $0x328] sm:$0xff]  ;;  %v1530_v13 = vld [vmem:[#allocation10 + $0x338] sm:$0xff] }
 0x3c8   :  { %v7328_v30 = vpack.c.bf16 %v1530_v13, %v1528_v23  ;;  %v1536_v23 = vld [vmem:[#allocation10 + $0x368] sm:$0xff]  ;;  %v1538_v13 = vld [vmem:[#allocation10 + $0x378] sm:$0xff] }
 0x3c9   :  { %8584 = vst [vmem:[#allocation83_spill] sm:$0xff] %v7313_v48 }
 0x3ca   :  { %5432 = vmatpush1.bf16.msra.mxu0 %v7301_v2  ;;  %v1434_v2 = vld [vmem:[#allocation10 + $0x2f0] sm:$0xff]  ;;  %8589 = vst [vmem:[#allocation88_spill] sm:$0xff] %v7328_v30 }
 0x3cb   :  { %5434 = vmatprep.subr.bf16.mxu0 %v7304_v1  ;;  %v7319_v58 = vpack.c.bf16 %v1434_v2, %v1432_v28  ;;  %v1523_v1 = vld [vmem:[#allocation10 + $0x300] sm:$0xff]  ;;  %v1532_v28 = vld [vmem:[#allocation10 + $0x348] sm:$0xff]  ;;  %v1534_v2 = vld [vmem:[#allocation10 + $0x358] sm:$0xff] }
 0x3cd   :  { %8586 = vst [vmem:[#allocation85_spill] sm:$0xff] %v7319_v58 }
 0x3ce   :  { %5436 = vmatpush1.bf16.msra.mxu0 %v7307_v59  ;;  %v1525_v59 = vld [vmem:[#allocation10 + $0x310] sm:$0xff] }
 0x3cf   :  { %5438 = vmatprep.subr.bf16.mxu0 %v7310_v24  ;;  %v7325_v61 = vpack.c.bf16 %v1525_v59, %v1523_v1  ;;  %v1527_v24 = vld [vmem:[#allocation10 + $0x320] sm:$0xff]  ;;  %v7336_v1 = vpack.c.bf16 %v1534_v2, %v1532_v28  ;;  %v1537_v28 = vld [vmem:[#allocation10 + $0x370] sm:$0xff]  ;;  %v1540_v2 = vld [vmem:[#allocation10 + $0x388] sm:$0xff] }
 0x3d0   :  { %v1531_v59 = vld [vmem:[#allocation10 + $0x340] sm:$0xff] }
 0x3d1   :  { %8588 = vst [vmem:[#allocation87_spill] sm:$0xff] %v7325_v61  ;;  %8591 = vst [vmem:[#allocation90_spill] sm:$0xff] %v7336_v1 }
 0x3d2   :  { %5440 = vmatpush1.bf16.msra.mxu0 %v7313_v48  ;;  %v1529_v48 = vld [vmem:[#allocation10 + $0x330] sm:$0xff] }
 0x3d3   :  { %5442 = vmatprep.subr.bf16.mxu0 %v7316_v26  ;;  %v7333_v60 = vpack.c.bf16 %v1529_v48, %v1527_v24  ;;  %v7345_v24 = vpack.c.bf16 %v1538_v13, %v1536_v23  ;;  %v1535_v48 = vld [vmem:[#allocation10 + $0x360] sm:$0xff] }
 0x3d5   :  { %8590 = vst [vmem:[#allocation89_spill] sm:$0xff] %v7333_v60  ;;  %8594 = vst [vmem:[#allocation92_spill] sm:$0xff] %v7345_v24 }
 0x3d6   :  { %5444 = vmatpush1.bf16.msra.mxu0 %v7319_v58  ;;  %v1546_v58 = vld [vmem:[#allocation10 + $0x3b8] sm:$0xff] }
 0x3d7   :  { %5446 = vmatprep.subr.bf16.mxu0 %v7322_v52  ;;  %v8592_v52 = vrot.slane %v7198_v62, 2 }
 0x3d9   :  { %1506 = vmatmul.mubr.f32.vlgmr.msra.gmra.mrb[8].mxu0 %v7216_v55  ;;  %v7341_v55 = vpack.c.bf16 %v1533_v21, %v1531_v59  ;;  %v1539_v59 = vld [vmem:[#allocation10 + $0x380] sm:$0xff]  ;;  %v1541_v21 = vld [vmem:[#allocation10 + $0x390] sm:$0xff] }
 0x3da   :  { %5448 = vmatpush1.bf16.msra.mxu0 %v7325_v61  ;;  %1511 = vmatprep.mubr.f32.mxu0 %v8557_v18  ;;  %v7348_v61 = vpack.c.bf16 %v1537_v28, %v1535_v48  ;;  %v7354_v23 = vpack.c.bf16 %v1541_v21, %v1539_v59  ;;  %v1548_v48 = vld [vmem:[#allocation10 + $0x3c8] sm:$0xff]  ;;  %v1550_v28 = vld [vmem:[#allocation10 + $0x3d8] sm:$0xff] }
 0x3db   :  { %5450 = vmatprep.subr.bf16.mxu0 %v7328_v30  ;;  %8593 = vst [vmem:[#allocation91_spill] sm:$0xff] %v7341_v55  ;;  %v1542_v30 = vld [vmem:[#allocation10 + $0x398] sm:$0xff]  ;;  %v1552_v59 = vld [vmem:[#allocation10 + $0x3e8] sm:$0xff] }
 0x3dc   :  { %8595 = vst [vmem:[#allocation93_spill] sm:$0xff] %v7348_v61  ;;  %8597 = vst [vmem:[#allocation95_spill] sm:$0xff] %v7354_v23  ;;  %v1554_v21 = vld [vmem:[#allocation10 + $0x3f8] sm:$0xff] }
 0x3dd   :  { %1512 = vmatmul.mubr.f32.gmra.mrb[10].mxu0 %v8592_v52  ;;  %v7351_v52 = vpack.c.bf16 %v1542_v30, %v1540_v2  ;;  %v7363_v2 = vpack.c.bf16 %v1550_v28, %v1548_v48 }
 0x3de   :  { %5452 = vmatpush1.bf16.msra.mxu0 %v7333_v60  ;;  %1624 = vmatprep.mubr.f32.mxu0 %v8557_v18  ;;  %v1544_v60 = vld [vmem:[#allocation10 + $0x3a8] sm:$0xff] }
 0x3df   :  { %5454 = vmatprep.subr.bf16.mxu0 %v7336_v1  ;;  %8596 = vst [vmem:[#allocation94_spill] sm:$0xff] %v7351_v52  ;;  %v7357_v13 = vpack.c.bf16 %v1546_v58, %v1544_v60  ;;  %v1543_v1 = vld [vmem:[#allocation10 + $0x3a0] sm:$0xff]  ;;  %8600 = vst [vmem:[#allocation98_spill] sm:$0xff] %v7363_v2  ;;  %v7369_v60 = vpack.c.bf16 %v1554_v21, %v1552_v59 }
 0x3e1   :  { %8598 = vst [vmem:[#allocation96_spill] sm:$0xff] %v7357_v13  ;;  %8602 = vst [vmem:[#allocation100_spill] sm:$0xff] %v7369_v60 }
 0x3e2   :  { %5456 = vmatpush1.bf16.msra.mxu0 %v7341_v55  ;;  %v1545_v55 = vld [vmem:[#allocation10 + $0x3b0] sm:$0xff] }
 0x3e3   :  { %5458 = vmatprep.subr.bf16.mxu0 %v7345_v24  ;;  %v7360_v30 = vpack.c.bf16 %v1545_v55, %v1543_v1  ;;  %v1547_v24 = vld [vmem:[#allocation10 + $0x3c0] sm:$0xff]  ;;  %v1643_v1 = vld [vmem:[#allocation10 + $0x408] sm:$0xff]  ;;  %v1645_v55 = vld [vmem:[#allocation10 + $0x418] sm:$0xff] }
 0x3e4   :  { %v7375_v28 = vpack.c.bf16 %v1645_v55, %v1643_v1  ;;  %v1652_v55 = vld [vmem:[#allocation10 + $0x450] sm:$0xff] }
 0x3e5   :  { %8599 = vst [vmem:[#allocation97_spill] sm:$0xff] %v7360_v30 }
 0x3e6   :  { %5460 = vmatpush1.bf16.msra.mxu0 %v7348_v61  ;;  %v1549_v61 = vld [vmem:[#allocation10 + $0x3d0] sm:$0xff]  ;;  %8604 = vst [vmem:[#allocation102_spill] sm:$0xff] %v7375_v28 }
 0x3e7   :  { %5462 = vmatprep.subr.bf16.mxu0 %v7351_v52  ;;  %v7366_v58 = vpack.c.bf16 %v1549_v61, %v1547_v24  ;;  %v1551_v52 = vld [vmem:[#allocation10 + $0x3e0] sm:$0xff]  ;;  %v1647_v61 = vld [vmem:[#allocation10 + $0x428] sm:$0xff]  ;;  %v1649_v24 = vld [vmem:[#allocation10 + $0x438] sm:$0xff] }
 0x3e8   :  { %v7381_v21 = vpack.c.bf16 %v1649_v24, %v1647_v61  ;;  %v1655_v61 = vld [vmem:[#allocation10 + $0x468] sm:$0xff]  ;;  %v1657_v24 = vld [vmem:[#allocation10 + $0x478] sm:$0xff] }
 0x3e9   :  { %8601 = vst [vmem:[#allocation99_spill] sm:$0xff] %v7366_v58 }
 0x3ea   :  { %5464 = vmatpush1.bf16.msra.mxu0 %v7354_v23  ;;  %v1553_v23 = vld [vmem:[#allocation10 + $0x3f0] sm:$0xff]  ;;  %8606 = vst [vmem:[#allocation104_spill] sm:$0xff] %v7381_v21 }
 0x3eb   :  { %5466 = vmatprep.subr.bf16.mxu0 %v7357_v13  ;;  %v7372_v48 = vpack.c.bf16 %v1553_v23, %v1551_v52  ;;  %v1642_v13 = vld [vmem:[#allocation10 + $0x400] sm:$0xff]  ;;  %v1651_v52 = vld [vmem:[#allocation10 + $0x448] sm:$0xff]  ;;  %v1653_v23 = vld [vmem:[#allocation10 + $0x458] sm:$0xff] }
 0x3ed   :  { %8603 = vst [vmem:[#allocation101_spill] sm:$0xff] %v7372_v48 }
 0x3ee   :  { %5468 = vmatpush1.bf16.msra.mxu0 %v7360_v30  ;;  %v1644_v30 = vld [vmem:[#allocation10 + $0x410] sm:$0xff] }
 0x3ef   :  { %5470 = vmatprep.subr.bf16.mxu0 %v7363_v2  ;;  %v7378_v59 = vpack.c.bf16 %v1644_v30, %v1642_v13  ;;  %v1646_v2 = vld [vmem:[#allocation10 + $0x420] sm:$0xff]  ;;  %v7389_v13 = vpack.c.bf16 %v1653_v23, %v1651_v52  ;;  %v1656_v52 = vld [vmem:[#allocation10 + $0x470] sm:$0xff]  ;;  %v1659_v23 = vld [vmem:[#allocation10 + $0x488] sm:$0xff] }
 0x3f0   :  { %v1650_v30 = vld [vmem:[#allocation10 + $0x440] sm:$0xff] }
 0x3f1   :  { %8605 = vst [vmem:[#allocation103_spill] sm:$0xff] %v7378_v59  ;;  %8608 = vst [vmem:[#allocation106_spill] sm:$0xff] %v7389_v13 }
 0x3f2   :  { %5472 = vmatpush1.bf16.msra.mxu0 %v7366_v58  ;;  %v1648_v58 = vld [vmem:[#allocation10 + $0x430] sm:$0xff] }
 0x3f3   :  { %5474 = vmatprep.subr.bf16.mxu0 %v7369_v60  ;;  %v7386_v1 = vpack.c.bf16 %v1648_v58, %v1646_v2  ;;  %v7398_v2 = vpack.c.bf16 %v1657_v24, %v1655_v61  ;;  %v1654_v58 = vld [vmem:[#allocation10 + $0x460] sm:$0xff]  ;;  %v1978_v60 = vld [vmem:[#allocation13 + $0xa8] sm:$0xff] }
 0x3f5   :  { %8607 = vst [vmem:[#allocation105_spill] sm:$0xff] %v7386_v1  ;;  %8611 = vst [vmem:[#allocation108_spill] sm:$0xff] %v7398_v2 }
 0x3f6   :  { %5476 = vmatpush1.bf16.msra.mxu0 %v7372_v48  ;;  %v1665_v48 = vld [vmem:[#allocation10 + $0x4b8] sm:$0xff] }
 0x3f7   :  { %5478 = vmatprep.subr.bf16.mxu0 %v7375_v28  ;;  %v8609_v28 = vrot.slane %v7198_v62, 3 }
 0x3f9   :  { %1625 = vmatmul.mubr.f32.vlgmr.msra.gmra.mrb[8].mxu0 %v7221_v47  ;;  %v7394_v47 = vpack.c.bf16 %v1652_v55, %v1650_v30  ;;  %v1658_v30 = vld [vmem:[#allocation10 + $0x480] sm:$0xff]  ;;  %v1660_v55 = vld [vmem:[#allocation10 + $0x490] sm:$0xff] }
 0x3fa   :  { %5480 = vmatpush1.bf16.msra.mxu0 %v7378_v59  ;;  %1630 = vmatprep.mubr.f32.mxu0 %v8557_v18  ;;  %v7401_v59 = vpack.c.bf16 %v1656_v52, %v1654_v58  ;;  %v7407_v61 = vpack.c.bf16 %v1660_v55, %v1658_v30  ;;  %v1667_v58 = vld [vmem:[#allocation10 + $0x4c8] sm:$0xff]  ;;  %v1669_v52 = vld [vmem:[#allocation10 + $0x4d8] sm:$0xff] }
 0x3fb   :  { %5482 = vmatprep.subr.bf16.mxu0 %v7381_v21  ;;  %8610 = vst [vmem:[#allocation107_spill] sm:$0xff] %v7394_v47  ;;  %v1661_v21 = vld [vmem:[#allocation10 + $0x498] sm:$0xff]  ;;  %v1671_v30 = vld [vmem:[#allocation10 + $0x4e8] sm:$0xff] }
 0x3fc   :  { %8612 = vst [vmem:[#allocation109_spill] sm:$0xff] %v7401_v59  ;;  %8614 = vst [vmem:[#allocation111_spill] sm:$0xff] %v7407_v61  ;;  %v1673_v55 = vld [vmem:[#allocation10 + $0x4f8] sm:$0xff] }
 0x3fd   :  { %1631 = vmatmul.mubr.f32.gmra.mrb[10].mxu0 %v8609_v28  ;;  %v7404_v28 = vpack.c.bf16 %v1661_v21, %v1659_v23  ;;  %v7416_v23 = vpack.c.bf16 %v1669_v52, %v1667_v58  ;;  %v245_v58 = vld [vmem:[#allocation11] sm:$0xff] }
 0x3fe   :  { %5484 = vmatpush1.bf16.msra.mxu0 %v7386_v1  ;;  %1743 = vmatprep.mubr.f32.mxu0 %v8557_v18  ;;  %v1663_v1 = vld [vmem:[#allocation10 + $0x4a8] sm:$0xff] }
 0x3ff   :  { %5486 = vmatprep.subr.bf16.mxu0 %v7389_v13  ;;  %8613 = vst [vmem:[#allocation110_spill] sm:$0xff] %v7404_v28  ;;  %v7410_v24 = vpack.c.bf16 %v1665_v48, %v1663_v1  ;;  %v1662_v13 = vld [vmem:[#allocation10 + $0x4a0] sm:$0xff]  ;;  %8617 = vst [vmem:[#allocation114_spill] sm:$0xff] %v7416_v23  ;;  %v7422_v1 = vpack.c.bf16 %v1673_v55, %v1671_v30  ;;  %v252_v30 = vld [vmem:[#allocation11 + $0x38] sm:$0xff] }
 0x401   :  { %8615 = vst [vmem:[#allocation112_spill] sm:$0xff] %v7410_v24  ;;  %8619 = vst [vmem:[#allocation116_spill] sm:$0xff] %v7422_v1 }
 0x402   :  { %5488 = vmatpush1.bf16.msra.mxu0 %v7394_v47  ;;  %v1664_v47 = vld [vmem:[#allocation10 + $0x4b0] sm:$0xff] }
 0x403   :  { %5490 = vmatprep.subr.bf16.mxu0 %v7398_v2  ;;  %v7413_v21 = vpack.c.bf16 %v1664_v47, %v1662_v13  ;;  %v1666_v2 = vld [vmem:[#allocation10 + $0x4c0] sm:$0xff]  ;;  %v246_v47 = vld [vmem:[#allocation11 + $0x8] sm:$0xff] }
 0x405   :  { %8616 = vst [vmem:[#allocation113_spill] sm:$0xff] %v7413_v21 }
 0x406   :  { %5492 = vmatpush1.bf16.msra.mxu0 %v7401_v59  ;;  %v1668_v59 = vld [vmem:[#allocation10 + $0x4d0] sm:$0xff] }
 0x407   :  { %5494 = vmatprep.subr.bf16.mxu0 %v7404_v28  ;;  %v7419_v48 = vpack.c.bf16 %v1668_v59, %v1666_v2  ;;  %v1670_v28 = vld [vmem:[#allocation10 + $0x4e0] sm:$0xff]  ;;  %v8621_v59 = vrot.slane %v7198_v62, 4  ;;  %v248_v2 = vld [vmem:[#allocation11 + $0x18] sm:$0xff] }
 0x408   :  { %v7434_v52 = vpack.c.bf16 %v248_v2, %v246_v47  ;;  %v256_v62 = vld [vmem:[#allocation11 + $0x58] sm:$0xff]  ;;  %v253_v2 = vld [vmem:[#allocation11 + $0x40] sm:$0xff] }
 0x409   :  { %8618 = vst [vmem:[#allocation115_spill] sm:$0xff] %v7419_v48 }
 0x40a   :  { %5496 = vmatpush1.bf16.msra.mxu0 %v7407_v61  ;;  %v1672_v61 = vld [vmem:[#allocation10 + $0x4f0] sm:$0xff]  ;;  %8622 = vst [vmem:[#allocation118_spill] sm:$0xff] %v7434_v52  ;;  %5516 = vmatprep.subr.bf16.mxu1 %v7434_v52  ;;  %v257_v52 = vld [vmem:[#allocation11 + $0x60] sm:$0xff] }
 0x40b   :  { %5498 = vmatprep.subr.bf16.mxu0 %v7410_v24  ;;  %v7425_v13 = vpack.c.bf16 %v1672_v61, %v1670_v28  ;;  %v247_v28 = vld [vmem:[#allocation11 + $0x10] sm:$0xff]  ;;  %v250_v61 = vld [vmem:[#allocation11 + $0x28] sm:$0xff] }
 0x40c   :  { %v7436_v55 = vpack.c.bf16 %v247_v28, %v245_v58  ;;  %v258_v58 = vld [vmem:[#allocation11 + $0x68] sm:$0xff]  ;;  %v260_v28 = vld [vmem:[#allocation11 + $0x78] sm:$0xff] }
 0x40d   :  { %8620 = vst [vmem:[#allocation117_spill] sm:$0xff] %v7425_v13 }
 0x40e   :  { %5500 = vmatpush1.bf16.msra.mxu0 %v7413_v21  ;;  %8623 = vst [vmem:[#allocation119_spill] sm:$0xff] %v7436_v55  ;;  %5518 = vmatpush1.bf16.msra.mxu1 %v7436_v55  ;;  %v259_v55 = vld [vmem:[#allocation11 + $0x70] sm:$0xff] }
 0x40f   :  { %5502 = vmatprep.subr.bf16.mxu0 %v7416_v23  ;;  %v255_v23 = vld [vmem:[#allocation11 + $0x50] sm:$0xff] }
 0x412   :  { %5504 = vmatpush1.bf16.msra.mxu0 %v7419_v48  ;;  %v254_v48 = vld [vmem:[#allocation11 + $0x48] sm:$0xff] }
 0x413   :  { %5506 = vmatprep.subr.bf16.mxu0 %v7422_v1  ;;  %v251_v1 = vld [vmem:[#allocation11 + $0x30] sm:$0xff]  ;;  %v7445_v47 = vpack.c.bf16 %v256_v62, %v254_v48  ;;  %v7454_v48 = vpack.c.bf16 %v259_v55, %v257_v52  ;;  %v270_v52 = vld [vmem:[#allocation11 + $0xc8] sm:$0xff]  ;;  %v272_v55 = vld [vmem:[#allocation11 + $0xd8] sm:$0xff] }
 0x415   :  { %8626 = vst [vmem:[#allocation122_spill] sm:$0xff] %v7445_v47  ;;  %8629 = vst [vmem:[#allocation125_spill] sm:$0xff] %v7454_v48 }
 0x416   :  { %5508 = vmatpush1.bf16.msra.mxu0 %v7425_v13  ;;  %v7438_v13 = vpack.c.bf16 %v252_v30, %v250_v61  ;;  %v7448_v61 = vpack.c.bf16 %v255_v23, %v253_v2  ;;  %v7451_v30 = vpack.c.bf16 %v260_v28, %v258_v58  ;;  %v266_v23 = vld [vmem:[#allocation11 + $0xa8] sm:$0xff]  ;;  %v268_v2 = vld [vmem:[#allocation11 + $0xb8] sm:$0xff] }
 0x417   :  { %v7463_v28 = vpack.c.bf16 %v268_v2, %v266_v23 }
 0x418   :  { %8624 = vst [vmem:[#allocation120_spill] sm:$0xff] %v7438_v13  ;;  %5520 = vmatprep.subr.bf16.mxu1 %v7438_v13  ;;  %8627 = vst [vmem:[#allocation123_spill] sm:$0xff] %v7448_v61  ;;  %v261_v13 = vld [vmem:[#allocation11 + $0x80] sm:$0xff] }
 0x419   :  { %1744 = vmatmul.mubr.f32.vlgmr.msra.gmra.mrb[8].mxu0 %v7226_v22  ;;  %v249_v22 = vld [vmem:[#allocation11 + $0x20] sm:$0xff]  ;;  %8628 = vst [vmem:[#allocation124_spill] sm:$0xff] %v7451_v30  ;;  %8632 = vst [vmem:[#allocation128_spill] sm:$0xff] %v7463_v28 }
 0x41a   :  { %1749 = vmatprep.mubr.f32.mxu0 %v8557_v18 }
 0x41d   :  { %1750 = vmatmul.mubr.f32.gmra.mrb[10].mxu0 %v8621_v59  ;;  %v7442_v59 = vpack.c.bf16 %v251_v1, %v249_v22  ;;  %v262_v1 = vld [vmem:[#allocation11 + $0x88] sm:$0xff]  ;;  %v264_v22 = vld [vmem:[#allocation11 + $0x98] sm:$0xff] }
 0x41e   :  { %1856 = vmatprep.mubr.f32.mxu0 %v8557_v18  ;;  %v7457_v62 = vpack.c.bf16 %v264_v22, %v262_v1  ;;  %v7469_v22 = vpack.c.bf16 %v272_v55, %v270_v52 }
 0x41f   :  { %8625 = vst [vmem:[#allocation121_spill] sm:$0xff] %v7442_v59  ;;  %5522 = vmatpush1.bf16.msra.mxu1 %v7442_v59  ;;  %v263_v59 = vld [vmem:[#allocation11 + $0x90] sm:$0xff] }
 0x420   :  { %5524 = vmatprep.subr.bf16.mxu1 %v7445_v47  ;;  %8630 = vst [vmem:[#allocation126_spill] sm:$0xff] %v7457_v62  ;;  %v7460_v58 = vpack.c.bf16 %v263_v59, %v261_v13  ;;  %v265_v47 = vld [vmem:[#allocation11 + $0xa0] sm:$0xff]  ;;  %8634 = vst [vmem:[#allocation130_spill] sm:$0xff] %v7469_v22  ;;  %v274_v13 = vld [vmem:[#allocation11 + $0xe8] sm:$0xff] }
 0x421   :  { %v276_v59 = vld [vmem:[#allocation11 + $0xf8] sm:$0xff] }
 0x422   :  { %8631 = vst [vmem:[#allocation127_spill] sm:$0xff] %v7460_v58  ;;  %v7475_v2 = vpack.c.bf16 %v276_v59, %v274_v13 }
 0x423   :  { %5526 = vmatpush1.bf16.msra.mxu1 %v7448_v61  ;;  %v267_v61 = vld [vmem:[#allocation11 + $0xb0] sm:$0xff] }
 0x424   :  { %5528 = vmatprep.subr.bf16.mxu1 %v7451_v30  ;;  %v7466_v1 = vpack.c.bf16 %v267_v61, %v265_v47  ;;  %v269_v30 = vld [vmem:[#allocation11 + $0xc0] sm:$0xff]  ;;  %8636 = vst [vmem:[#allocation132_spill] sm:$0xff] %v7475_v2  ;;  %v278_v47 = vld [vmem:[#allocation11 + $0x108] sm:$0xff]  ;;  %v280_v61 = vld [vmem:[#allocation11 + $0x118] sm:$0xff] }
 0x425   :  { %v7481_v55 = vpack.c.bf16 %v280_v61, %v278_v47 }
 0x426   :  { %8633 = vst [vmem:[#allocation129_spill] sm:$0xff] %v7466_v1 }
 0x427   :  { %5530 = vmatpush1.bf16.msra.mxu1 %v7454_v48  ;;  %v271_v48 = vld [vmem:[#allocation11 + $0xd0] sm:$0xff]  ;;  %8638 = vst [vmem:[#allocation134_spill] sm:$0xff] %v7481_v55 }
 0x428   :  { %5532 = vmatprep.subr.bf16.mxu1 %v7457_v62  ;;  %v7472_v23 = vpack.c.bf16 %v271_v48, %v269_v30  ;;  %v273_v62 = vld [vmem:[#allocation11 + $0xe0] sm:$0xff]  ;;  %v282_v30 = vld [vmem:[#allocation11 + $0x128] sm:$0xff]  ;;  %v284_v48 = vld [vmem:[#allocation11 + $0x138] sm:$0xff] }
 0x429   :  { %v7487_v59 = vpack.c.bf16 %v284_v48, %v282_v30 }
 0x42a   :  { %8635 = vst [vmem:[#allocation131_spill] sm:$0xff] %v7472_v23 }
 0x42b   :  { %5534 = vmatpush1.bf16.msra.mxu1 %v7460_v58  ;;  %v275_v58 = vld [vmem:[#allocation11 + $0xf0] sm:$0xff]  ;;  %8640 = vst [vmem:[#allocation136_spill] sm:$0xff] %v7487_v59 }
 0x42c   :  { %5536 = vmatprep.subr.bf16.mxu1 %v7463_v28  ;;  %v7478_v52 = vpack.c.bf16 %v275_v58, %v273_v62  ;;  %v277_v28 = vld [vmem:[#allocation11 + $0x100] sm:$0xff]  ;;  %v286_v62 = vld [vmem:[#allocation11 + $0x148] sm:$0xff]  ;;  %v288_v58 = vld [vmem:[#allocation11 + $0x158] sm:$0xff] }
 0x42d   :  { %v7493_v61 = vpack.c.bf16 %v288_v58, %v286_v62 }
 0x42e   :  { %8637 = vst [vmem:[#allocation133_spill] sm:$0xff] %v7478_v52 }
 0x42f   :  { %5538 = vmatpush1.bf16.msra.mxu1 %v7466_v1  ;;  %v279_v1 = vld [vmem:[#allocation11 + $0x110] sm:$0xff]  ;;  %8642 = vst [vmem:[#allocation138_spill] sm:$0xff] %v7493_v61 }
 0x430   :  { %5540 = vmatprep.subr.bf16.mxu1 %v7469_v22  ;;  %v7484_v13 = vpack.c.bf16 %v279_v1, %v277_v28  ;;  %v281_v22 = vld [vmem:[#allocation11 + $0x120] sm:$0xff]  ;;  %v290_v28 = vld [vmem:[#allocation11 + $0x168] sm:$0xff]  ;;  %v292_v1 = vld [vmem:[#allocation11 + $0x178] sm:$0xff] }
 0x431   :  { %v7499_v48 = vpack.c.bf16 %v292_v1, %v290_v28  ;;  %v8650_v1 = vsub.s32 1, %v7005_v40 }
 0x432   :  { %8639 = vst [vmem:[#allocation135_spill] sm:$0xff] %v7484_v13 }
 0x433   :  { %5542 = vmatpush1.bf16.msra.mxu1 %v7472_v23  ;;  %v283_v23 = vld [vmem:[#allocation11 + $0x130] sm:$0xff]  ;;  %8644 = vst [vmem:[#allocation140_spill] sm:$0xff] %v7499_v48 }
 0x434   :  { %5544 = vmatprep.subr.bf16.mxu1 %v7475_v2  ;;  %v7490_v47 = vpack.c.bf16 %v283_v23, %v281_v22  ;;  %v285_v2 = vld [vmem:[#allocation11 + $0x140] sm:$0xff]  ;;  %v294_v22 = vld [vmem:[#allocation11 + $0x188] sm:$0xff]  ;;  %v296_v23 = vld [vmem:[#allocation11 + $0x198] sm:$0xff] }
 0x435   :  { %v7505_v58 = vpack.c.bf16 %v296_v23, %v294_v22 }
 0x436   :  { %8641 = vst [vmem:[#allocation137_spill] sm:$0xff] %v7490_v47 }
 0x437   :  { %5546 = vmatpush1.bf16.msra.mxu1 %v7478_v52  ;;  %v287_v52 = vld [vmem:[#allocation11 + $0x150] sm:$0xff]  ;;  %8646 = vst [vmem:[#allocation142_spill] sm:$0xff] %v7505_v58 }
 0x438   :  { %5548 = vmatprep.subr.bf16.mxu1 %v7481_v55  ;;  %v7496_v30 = vpack.c.bf16 %v287_v52, %v285_v2  ;;  %v289_v55 = vld [vmem:[#allocation11 + $0x160] sm:$0xff] }
 0x439   :  { %v242_v52 = vld [vmem:[%s8317_s6] sm:$0x3] }
 0x43a   :  { %8643 = vst [vmem:[#allocation139_spill] sm:$0xff] %v7496_v30  ;;  %v7521_v22 = vrot.slane %v242_v52, %v8650_v1  ;;  %v304_v1 = vld [vmem:[#allocation11 + $0x1d8] sm:$0xff] }
 0x43b   :  { %5550 = vmatpush1.bf16.msra.mxu1 %v7484_v13  ;;  %v291_v13 = vld [vmem:[#allocation11 + $0x170] sm:$0xff] }
 0x43c   :  { %5552 = vmatprep.subr.bf16.mxu1 %v7487_v59  ;;  %v7502_v62 = vpack.c.bf16 %v291_v13, %v289_v55  ;;  %v293_v59 = vld [vmem:[#allocation11 + $0x180] sm:$0xff]  ;;  %v8648_v55 = vsub.s32 0, %v7005_v40  ;;  %8651 = vst [vmem:[#allocation145_spill] sm:$0xff] %v7521_v22  ;;  %v8652_v40 = vmov 0 }
 0x43d   :  { %v8653_v40 = vsel %vm7529_vm9, 4294967295, %v8652_v40 }
 0x43e   :  { %8645 = vst [vmem:[#allocation141_spill] sm:$0xff] %v7502_v62  ;;  %v7517_v13 = vrot.slane %v242_v52, %v8648_v55  ;;  %8654 = vst [vmem:[#allocation146_spill] sm:$0xff] %v8653_v40 }
 0x43f   :  { %5554 = vmatpush1.bf16.msra.mxu1 %v7490_v47  ;;  %v295_v47 = vld [vmem:[#allocation11 + $0x190] sm:$0xff] }
 0x440   :  { %5556 = vmatprep.subr.bf16.mxu1 %v7493_v61  ;;  %v7508_v2 = vpack.c.bf16 %v295_v47, %v293_v59  ;;  %8649 = vst [vmem:[#allocation144_spill] sm:$0xff] %v7517_v13 }
 0x442   :  { %8647 = vst [vmem:[#allocation143_spill] sm:$0xff] %v7508_v2 }
 0x443   :  { %5558 = vmatpush1.bf16.msra.mxu1 %v7496_v30 }
 0x444   :  { %5560 = vmatprep.subr.bf16.mxu1 %v7499_v48 }
 0x447   :  { %5562 = vmatpush1.bf16.msra.mxu1 %v7502_v62 }
 0x448   :  { %5564 = vmatprep.subr.bf16.mxu1 %v7505_v58 }
 0x44b   :  { %5566 = vmatpush1.bf16.msra.mxu1 %v7508_v2 }
 0x4ec   :  { %v1745_v28 = vpop.f32.mrb[8].mxu0 }
 0x4ed   :  { %v1747_v23 = vpop.f32.mrb[9].mxu0  ;;  %v1771_v59 = vadd.f32 %v7517_v13, %v1745_v28  ;;  %v302_v28 = vld [vmem:[#allocation11 + $0x1c8] sm:$0xff] }
 0x4ee   :  { %v1772_v47 = vadd.f32 %v7521_v22, %v1747_v23  ;;  %v7552_v23 = vpack.c.bf16 %v304_v1, %v302_v28  ;;  %v2223_v28 = vld [vmem:[#allocation13 + $0x180] sm:$0xff]  ;;  %v2224_v1 = vld [vmem:[#allocation13 + $0x188] sm:$0xff] }
 0x4ef   :  { %v1775_v30 = vmax.f32 %v1771_v59, 0.0  ;;  %v301_v59 = vld [vmem:[#allocation11 + $0x1c0] sm:$0xff] }
 0x4f0   :  { %v1751_v58 = vpop.f32.mrb[10].mxu0  ;;  %v1776_v55 = vmax.f32 %v1772_v47, 0.0  ;;  %8657 = vst [vmem:[#allocation149_spill] sm:$0xff] %v7552_v23  ;;  %v303_v47 = vld [vmem:[#allocation11 + $0x1d0] sm:$0xff] }
 0x4f1   :  { %v1773_v2 = vadd.f32 %v7517_v13, %v1751_v58  ;;  %v1753_v62 = vpop.f32.mrb[11].mxu0  ;;  %v299_v58 = vld [vmem:[#allocation11 + $0x1b0] sm:$0xff] }
 0x4f2   :  { %v1774_v48 = vadd.f32 %v7521_v22, %v1753_v62  ;;  %v243_v62 = vld [vmem:[%s8318_s7] sm:$0xff] }
 0x4f3   :  { %v1777_v61 = vmax.f32 %v1773_v2, 0.0 }
 0x4f4   :  { %v1778_v21 = vmax.f32 %v1774_v48, 0.0 }
 0x4f5   :  { %v5512_v24 = vpack.c.bf16 %v1777_v61, %v1775_v30  ;;  %v244_v61 = vld [vmem:[%s8318_s7 + $0x8] sm:$0x3]  ;;  %v300_v30 = vld [vmem:[#allocation11 + $0x1b8] sm:$0xff] }
 0x4f6   :  { %v5509_v52 = vpack.c.bf16 %v1778_v21, %v1776_v55  ;;  %v298_v21 = vld [vmem:[#allocation11 + $0x1a8] sm:$0xff]  ;;  %v7554_v55 = vpack.c.bf16 %v303_v47, %v301_v59  ;;  %v7566_v59 = vpack.c.bf16 %v2224_v1, %v2223_v28  ;;  %v2225_v47 = vld [vmem:[#allocation13 + $0x190] sm:$0xff]  ;;  %v2230_v1 = vld [vmem:[#allocation13 + $0x1b8] sm:$0xff] }
 0x4f7   :  { %v7546_v48 = vpack.c.bf16 %v300_v30, %v298_v21  ;;  %v305_v21 = vld [vmem:[#allocation11 + $0x1e0] sm:$0xff]  ;;  %v307_v30 = vld [vmem:[#allocation11 + $0x1f0] sm:$0xff] }
 0x4f8   :  { %5511 = vmatprep.subr.msk.bf16.mxu0 %vm7529_vm9, %v5509_v52  ;;  %8658 = vst [vmem:[#allocation150_spill] sm:$0xff] %v7554_v55  ;;  %v306_v52 = vld [vmem:[#allocation11 + $0x1e8] sm:$0xff]  ;;  %8661 = vst [vmem:[#allocation153_spill] sm:$0xff] %v7566_v59  ;;  %v2229_v28 = vld [vmem:[#allocation13 + $0x1b0] sm:$0xff] }
 0x4f9   :  { %5514 = vmatpush1.bf16.msk.msra.mxu0 %vm7529_vm9, %v5512_v24  ;;  %8655 = vst [vmem:[#allocation147_spill] sm:$0xff] %v7546_v48  ;;  %v297_v24 = vld [vmem:[#allocation11 + $0x1a0] sm:$0xff]  ;;  %5568 = vmatprep.subr.bf16.mxu1 %v7546_v48 }
 0x4fa   :  { %v7548_v2 = vpack.c.bf16 %v299_v58, %v297_v24  ;;  %v7560_v24 = vpack.c.bf16 %v307_v30, %v305_v21  ;;  %v8469_v58 = vmov 0.0|0.0   ;;  %v2227_v21 = vld [vmem:[#allocation13 + $0x1a0] sm:$0xff]  ;;  %v2228_v30 = vld [vmem:[#allocation13 + $0x1a8] sm:$0xff] }
 0x4fb   :  { %5651 = vmatprep.subr.bf16.mxu0 %v8469_v58 }
 0x4fc   :  { %4475 = vmatmul.mubr.msk.f32.vlgmr.msra.gmra.mrb[12].mxu0 %vm1779_vm10, %v243_v62  ;;  %8656 = vst [vmem:[#allocation148_spill] sm:$0xff] %v7548_v2  ;;  %5570 = vmatpush1.bf16.msra.mxu1 %v7548_v2  ;;  %v308_v62 = vld [vmem:[#allocation11 + $0x1f8] sm:$0xff]  ;;  %8660 = vst [vmem:[#allocation152_spill] sm:$0xff] %v7560_v24 }
 0x4fd   :  { %1862 = vmatprep.mubr.f32.mxu0 %v8557_v18  ;;  %5572 = vmatprep.subr.bf16.mxu1 %v7552_v23 }
 0x4fe   :  { %5653 = vmatpush3.bf16.msra.mxu0 %v7566_v59  ;;  %v8670_v59 = vmov 0.0|0.0  }
 0x4ff   :  { %5654 = vmatprep.subr.bf16.mxu0 %v8469_v58 }
 0x500   :  { %4476 = vmatmul.mubr.msk.f32.gmra.mrb[14].mxu0 %vm1779_vm10, %v244_v61  ;;  %5574 = vmatpush1.bf16.msra.mxu1 %v7554_v55  ;;  %v7558_v61 = vpack.c.bf16 %v308_v62, %v306_v52  ;;  %v2226_v52 = vld [vmem:[#allocation13 + $0x198] sm:$0xff] }
 0x501   :  { %v7570_v62 = vpack.c.bf16 %v2226_v52, %v2225_v47  ;;  %v2231_v47 = vld [vmem:[#allocation13 + $0x1c0] sm:$0xff]  ;;  %v2232_v52 = vld [vmem:[#allocation13 + $0x1c8] sm:$0xff]  ;;  %4882 = vmatprep.mubr.msk.f32.mxu0 %vm6632_vm12, %v8557_v18 }
 0x502   :  { %8659 = vst [vmem:[#allocation151_spill] sm:$0xff] %v7558_v61  ;;  %5576 = vmatprep.subr.bf16.mxu1 %v7558_v61  ;;  %v7578_v61 = vpack.c.bf16 %v2230_v1, %v2229_v28  ;;  %v7582_v55 = vpack.c.bf16 %v2232_v52, %v2231_v47  ;;  %v2235_v28 = vld [vmem:[#allocation13 + $0x1e0] sm:$0xff]  ;;  %v2236_v1 = vld [vmem:[#allocation13 + $0x1e8] sm:$0xff] }
 0x503   :  { %8662 = vst [vmem:[#allocation154_spill] sm:$0xff] %v7570_v62  ;;  %5656 = vmatpush3.bf16.msra.mxu0 %v7570_v62  ;;  %v7590_v2 = vpack.c.bf16 %v2236_v1, %v2235_v28  ;;  %v1976_v62 = vld [vmem:[#allocation13 + $0x98] sm:$0xff] }
 0x504   :  { %5578 = vmatpush1.bf16.msra.mxu1 %v7560_v24  ;;  %5657 = vmatprep.subr.bf16.mxu0 %v8469_v58  ;;  %v7574_v24 = vpack.c.bf16 %v2228_v30, %v2227_v21  ;;  %8664 = vst [vmem:[#allocation156_spill] sm:$0xff] %v7578_v61  ;;  %8665 = vst [vmem:[#allocation157_spill] sm:$0xff] %v7582_v55  ;;  %v2233_v21 = vld [vmem:[#allocation13 + $0x1d0] sm:$0xff]  ;;  %v2234_v30 = vld [vmem:[#allocation13 + $0x1d8] sm:$0xff] }
 0x505   :  { %5579 = vmatprep.subr.bf16.mxu1 %v8469_v58  ;;  %v7586_v23 = vpack.c.bf16 %v2234_v30, %v2233_v21  ;;  %8667 = vst [vmem:[#allocation159_spill] sm:$0xff] %v7590_v2 }
 0x506   :  { %8663 = vst [vmem:[#allocation155_spill] sm:$0xff] %v7574_v24 }
 0x507   :  { %5659 = vmatpush3.bf16.msra.mxu0 %v7574_v24  ;;  %8666 = vst [vmem:[#allocation158_spill] sm:$0xff] %v7586_v23 }
 0x508   :  { %5660 = vmatprep.subr.bf16.mxu0 %v8469_v58 }
 0x50b   :  { %5662 = vmatpush3.bf16.msra.mxu0 %v7578_v61 }
 0x50c   :  { %5663 = vmatprep.subr.bf16.mxu0 %v8469_v58 }
 0x50f   :  { %5665 = vmatpush3.bf16.msra.mxu0 %v7582_v55  ;;  %v1974_v55 = vld [vmem:[#allocation13 + $0x88] sm:$0xff] }
 0x510   :  { %5666 = vmatprep.subr.bf16.mxu0 %v8469_v58 }
 0x513   :  { %5668 = vmatpush3.bf16.msra.mxu0 %v7586_v23  ;;  %v1973_v23 = vld [vmem:[#allocation13 + $0x80] sm:$0xff] }
 0x514   :  { %5669 = vmatprep.subr.bf16.mxu0 %v8469_v58 }
 0x517   :  { %5671 = vmatpush3.bf16.msra.mxu0 %v7590_v2  ;;  %v7596_v2 = vpack.c.bf16 %v1974_v55, %v1973_v23  ;;  %v1981_v55 = vld [vmem:[#allocation13 + $0xc0] sm:$0xff] }
 0x518   :  { %5672 = vmatprep.subr.bf16.mxu0 %v8469_v58  ;;  %v1975_v58 = vld [vmem:[#allocation13 + $0x90] sm:$0xff] }
 0x519   :  { %8668 = vst [vmem:[#allocation160_spill] sm:$0xff] %v7596_v2 }
 0x5cf   :  { %v1858_v47 = vpop.f32.mrb[12].mxu0 }
 0x5d0   :  { %v1860_v52 = vpop.f32.mrb[13].mxu0  ;;  %v1874_v40 = vrot.slane %v1858_v47, 5 }
 0x5d1   :  { %v1877_v30 = vrot.slane %v1860_v52, 5 }
 0x5d3   :  { %v1864_v48 = vpop.f32.mrb[14].mxu0 }
 0x5d4   :  { %v1875_v22 = vrot.slane %v1864_v48, 5  ;;  %v1866_v21 = vpop.f32.mrb[15].mxu0  ;;  %v7599_v48 = vpack.c.bf16 %v1976_v62, %v1975_v58  ;;  %v1984_v58 = vld [vmem:[#allocation13 + $0xd8] sm:$0xff] }
 0x5d5   :  { %v1878_v13 = vrot.slane %v1866_v21, 5  ;;  %v1977_v21 = vld [vmem:[#allocation13 + $0xa0] sm:$0xff] }
 0x5d6   :  { %v1876_v61 = vsel %vm1873_vm11, %v1874_v40, %v1875_v22  ;;  %8669 = vst [vmem:[#allocation161_spill] sm:$0xff] %v7599_v48  ;;  %v7603_v22 = vpack.c.bf16 %v1978_v60, %v1977_v21  ;;  %v1980_v40 = vld [vmem:[#allocation13 + $0xb8] sm:$0xff]  ;;  %v1983_v60 = vld [vmem:[#allocation13 + $0xd0] sm:$0xff] }
 0x5d7   :  { %v1882_v24 = vmax.f32 %v1858_v47, %v1876_v61  ;;  %v1879_v28 = vsel %vm1873_vm11, %v1877_v30, %v1878_v13  ;;  %v1979_v13 = vld [vmem:[#allocation13 + $0xb0] sm:$0xff]  ;;  %v1982_v61 = vld [vmem:[#allocation13 + $0xc8] sm:$0xff]  ;;  %v7615_v62 = vpack.c.bf16 %v1984_v58, %v1983_v60  ;;  %v1985_v47 = vld [vmem:[#allocation13 + $0xe0] sm:$0xff] }
 0x5d8   :  { %v1883_v1 = vmax.f32 %v1860_v52, %v1879_v28  ;;  %8671 = vst [vmem:[#allocation162_spill] sm:$0xff] %v7603_v22  ;;  %v7607_v23 = vpack.c.bf16 %v1980_v40, %v1979_v13  ;;  %v1986_v52 = vld [vmem:[#allocation13 + $0xe8] sm:$0xff]  ;;  %v1987_v28 = vld [vmem:[#allocation13 + $0xf0] sm:$0xff]  ;;  %v2238_v40 = vld [vmem:[#allocation13 + $0x1f8] sm:$0xff] }
 0x5d9   :  { %8674 = vst [vmem:[#allocation165_spill] sm:$0xff] %v7615_v62  ;;  %v7619_v30 = vpack.c.bf16 %v1986_v52, %v1985_v47  ;;  %v2237_v13 = vld [vmem:[#allocation13 + $0x1f0] sm:$0xff]  ;;  %v1956_v60 = vld [vmem:[#allocation13] sm:$0xff]  ;;  %v1957_v58 = vld [vmem:[#allocation13 + $0x8] sm:$0xff] }
 0x5da   :  { %1948 = vmatprep.mubr.f32.mxu1 %v1883_v1  ;;  %8672 = vst [vmem:[#allocation163_spill] sm:$0xff] %v7607_v23  ;;  %v1988_v1 = vld [vmem:[#allocation13 + $0xf8] sm:$0xff] }
 0x5db   :  { %1949 = vmatmul.mubr.f32.vlgmr.msra.gmra.mrb[12].mxu1 %v1882_v24  ;;  %v7611_v24 = vpack.c.bf16 %v1982_v61, %v1981_v55  ;;  %8675 = vst [vmem:[#allocation166_spill] sm:$0xff] %v7619_v30  ;;  %v7624_v21 = vpack.c.bf16 %v1988_v1, %v1987_v28  ;;  %v7626_v55 = vpack.c.bf16 %v2238_v40, %v2237_v13  ;;  %v1958_v40 = vld [vmem:[#allocation13 + $0x10] sm:$0xff] }
 0x5dc   :  { %5581 = vmatpush3.bf16.msra.mxu1 %v7596_v2  ;;  %4777 = vmatprep.mubr.msk.f32.mxu1 %vm6632_vm12, %v8557_v18  ;;  %v7638_v28 = vpack.c.bf16 %v1957_v58, %v1956_v60  ;;  %v1961_v60 = vld [vmem:[#allocation13 + $0x28] sm:$0xff] }
 0x5dd   :  { %5582 = vmatprep.subr.bf16.mxu1 %v8670_v59  ;;  %8673 = vst [vmem:[#allocation164_spill] sm:$0xff] %v7611_v24  ;;  %8676 = vst [vmem:[#allocation167_spill] sm:$0xff] %v7624_v21  ;;  %5674 = vmatpush3.bf16.msra.mxu0 %v7626_v55 }
 0x5de   :  { %8677 = vst [vmem:[#allocation168_spill] sm:$0xff] %v7626_v55  ;;  %5699 = vmatprep.subr.bf16.mxu0 %v8670_v59  ;;  %8678 = vst [vmem:[#allocation169_spill] sm:$0xff] %v7638_v28  ;;  %v332_v55 = vld [vmem:[#allocation16 + $0x28] sm:$0xff] }
 0x5e0   :  { %5584 = vmatpush3.bf16.msra.mxu1 %v7599_v48  ;;  %v330_v48 = vld [vmem:[#allocation16 + $0x18] sm:$0xff] }
 0x5e1   :  { %5585 = vmatprep.subr.bf16.mxu1 %v8670_v59 }
 0x5e4   :  { %5587 = vmatpush3.bf16.msra.mxu1 %v7603_v22 }
 0x5e5   :  { %5588 = vmatprep.subr.bf16.mxu1 %v8670_v59 }
 0x5e8   :  { %5590 = vmatpush3.bf16.msra.mxu1 %v7607_v23  ;;  %v328_v23 = vld [vmem:[#allocation16 + $0x8] sm:$0xff] }
 0x5e9   :  { %5591 = vmatprep.subr.bf16.mxu1 %v8670_v59 }
 0x5ec   :  { %5593 = vmatpush3.bf16.msra.mxu1 %v7611_v24 }
 0x5ed   :  { %5594 = vmatprep.subr.bf16.mxu1 %v8670_v59 }
 0x5f0   :  { %5596 = vmatpush3.bf16.msra.mxu1 %v7615_v62  ;;  %v7781_v62 = vld [vmem:[#allocation2 + $0x20] sm:$0xff] }
 0x5f1   :  { %5597 = vmatprep.subr.bf16.mxu1 %v8670_v59  ;;  %v2979_v24 = vrot.slane %v7781_v62, 4 }
 0x5f4   :  { %5599 = vmatpush3.bf16.msra.mxu1 %v7619_v30 }
 0x5f5   :  { %5600 = vmatprep.subr.bf16.mxu1 %v8670_v59 }
 0x5f8   :  { %5602 = vmatpush3.bf16.msra.mxu1 %v7624_v21  ;;  %v1959_v21 = vld [vmem:[#allocation13 + $0x18] sm:$0xff] }
 0x5f9   :  { %5603 = vmatprep.subr.bf16.mxu1 %v8670_v59  ;;  %v7643_v30 = vpack.c.bf16 %v1959_v21, %v1958_v40  ;;  %v1965_v40 = vld [vmem:[#allocation13 + $0x48] sm:$0xff] }
 0x5fb   :  { %8679 = vst [vmem:[#allocation170_spill] sm:$0xff] %v7643_v30 }
 0x6ae   :  { %v1950_v61 = vpop.f32.mrb[12].mxu1 }
 0x6af   :  { %v1952_v47 = vpop.f32.mrb[13].mxu1 }
 0x6b0   :  { %v7636_v52 = vmax.f32 %v1950_v61, %v1952_v47  ;;  %v1960_v61 = vld [vmem:[#allocation13 + $0x20] sm:$0xff]  ;;  %v1962_v47 = vld [vmem:[#allocation13 + $0x30] sm:$0xff] }
 0x6b1   :  { %v7651_v58 = vpack.c.bf16 %v1961_v60, %v1960_v61  ;;  %v1966_v61 = vld [vmem:[#allocation13 + $0x50] sm:$0xff]  ;;  %v1967_v60 = vld [vmem:[#allocation13 + $0x58] sm:$0xff] }
 0x6b2   :  { %v1990_v1 = vrot.slane %v7636_v52, 1  ;;  %v2239_v13 = vrot.slane %v7636_v52, 3 }
 0x6b3   :  { %8680 = vst [vmem:[#allocation171_spill] sm:$0xff] %v7651_v58 }
 0x6b4   :  { %4778 = vmatmul.mubr.f32.vlgmr.msra.gmra.mrb[14].mxu1 %v1990_v1  ;;  %4883 = vmatmul.mubr.f32.vlgmr.msra.gmra.mrb[16].mxu0 %v2239_v13  ;;  %v1963_v1 = vld [vmem:[#allocation13 + $0x38] sm:$0xff]  ;;  %v1964_v13 = vld [vmem:[#allocation13 + $0x40] sm:$0xff] }
 0x6b5   :  { %5605 = vmatpush3.bf16.msra.mxu1 %v7638_v28  ;;  %4812 = vmatprep.mubr.msk.f32.mxu1 %vm6632_vm12, %v8557_v18  ;;  %v7655_v21 = vpack.c.bf16 %v1963_v1, %v1962_v47  ;;  %v7659_v28 = vpack.c.bf16 %v1965_v40, %v1964_v13  ;;  %v1968_v47 = vld [vmem:[#allocation13 + $0x60] sm:$0xff]  ;;  %v1969_v1 = vld [vmem:[#allocation13 + $0x68] sm:$0xff]  ;;  %v1970_v13 = vld [vmem:[#allocation13 + $0x70] sm:$0xff] }
 0x6b6   :  { %5606 = vmatprep.subr.bf16.mxu1 %v8670_v59  ;;  %4952 = vmatprep.mubr.msk.f32.mxu0 %vm6632_vm12, %v8557_v18  ;;  %v1971_v40 = vld [vmem:[#allocation13 + $0x78] sm:$0xff] }
 0x6b7   :  { %8681 = vst [vmem:[#allocation172_spill] sm:$0xff] %v7655_v21  ;;  %8682 = vst [vmem:[#allocation173_spill] sm:$0xff] %v7659_v28 }
 0x6b9   :  { %5608 = vmatpush3.bf16.msra.mxu1 %v7643_v30  ;;  %v7663_v30 = vpack.c.bf16 %v1967_v60, %v1966_v61  ;;  %v2133_v61 = vld [vmem:[#allocation13 + $0x100] sm:$0xff]  ;;  %v2134_v60 = vld [vmem:[#allocation13 + $0x108] sm:$0xff] }
 0x6ba   :  { %5609 = vmatprep.subr.bf16.mxu1 %v8670_v59 }
 0x6bb   :  { %8683 = vst [vmem:[#allocation174_spill] sm:$0xff] %v7663_v30 }
 0x6bd   :  { %5611 = vmatpush3.bf16.msra.mxu1 %v7651_v58  ;;  %v7667_v58 = vpack.c.bf16 %v1969_v1, %v1968_v47  ;;  %v2135_v47 = vld [vmem:[#allocation13 + $0x110] sm:$0xff]  ;;  %v2136_v1 = vld [vmem:[#allocation13 + $0x118] sm:$0xff] }
 0x6be   :  { %5612 = vmatprep.subr.bf16.mxu1 %v8670_v59 }
 0x6bf   :  { %8684 = vst [vmem:[#allocation175_spill] sm:$0xff] %v7667_v58 }
 0x6c1   :  { %5614 = vmatpush3.bf16.msra.mxu1 %v7655_v21  ;;  %v7671_v21 = vpack.c.bf16 %v1971_v40, %v1970_v13  ;;  %v2137_v13 = vld [vmem:[#allocation13 + $0x120] sm:$0xff]  ;;  %v2138_v40 = vld [vmem:[#allocation13 + $0x128] sm:$0xff] }
 0x6c2   :  { %5615 = vmatprep.subr.bf16.mxu1 %v8670_v59 }
 0x6c3   :  { %8685 = vst [vmem:[#allocation176_spill] sm:$0xff] %v7671_v21 }
 0x6c5   :  { %5617 = vmatpush3.bf16.msra.mxu1 %v7659_v28  ;;  %v7675_v28 = vpack.c.bf16 %v2134_v60, %v2133_v61  ;;  %v7686_v61 = vpack.c.bf16 %v2138_v40, %v2137_v13  ;;  %v2139_v60 = vld [vmem:[#allocation13 + $0x130] sm:$0xff]  ;;  %v2144_v40 = vld [vmem:[#allocation13 + $0x158] sm:$0xff] }
 0x6c6   :  { %5618 = vmatprep.subr.bf16.mxu1 %v8670_v59  ;;  %v2143_v13 = vld [vmem:[#allocation13 + $0x150] sm:$0xff] }
 0x6c7   :  { %8686 = vst [vmem:[#allocation177_spill] sm:$0xff] %v7675_v28  ;;  %8688 = vst [vmem:[#allocation179_spill] sm:$0xff] %v7686_v61 }
 0x6c9   :  { %5620 = vmatpush3.bf16.msra.mxu1 %v7663_v30  ;;  %v7680_v30 = vpack.c.bf16 %v2136_v1, %v2135_v47  ;;  %v2141_v47 = vld [vmem:[#allocation13 + $0x140] sm:$0xff]  ;;  %v2142_v1 = vld [vmem:[#allocation13 + $0x148] sm:$0xff] }
 0x6ca   :  { %5621 = vmatprep.subr.bf16.mxu1 %v8670_v59 }
 0x6cb   :  { %8687 = vst [vmem:[#allocation178_spill] sm:$0xff] %v7680_v30 }
 0x6cd   :  { %5623 = vmatpush3.bf16.msra.mxu1 %v7667_v58  ;;  %v7694_v58 = vpack.c.bf16 %v2142_v1, %v2141_v47  ;;  %v2147_v47 = vld [vmem:[#allocation13 + $0x170] sm:$0xff]  ;;  %v2148_v1 = vld [vmem:[#allocation13 + $0x178] sm:$0xff] }
 0x6ce   :  { %5624 = vmatprep.subr.bf16.mxu1 %v8670_v59 }
 0x6cf   :  { %8690 = vst [vmem:[#allocation181_spill] sm:$0xff] %v7694_v58 }
 0x6d1   :  { %5626 = vmatpush3.bf16.msra.mxu1 %v7671_v21  ;;  %v2140_v21 = vld [vmem:[#allocation13 + $0x138] sm:$0xff] }
 0x6d2   :  { %5627 = vmatprep.subr.bf16.mxu1 %v8670_v59 }
 0x6d4   :  { %4813 = vmatmul.mubr.f32.vlgmr.msra.gmra.mrb[16].mxu1 %v7636_v52 }
 0x6d5   :  { %5629 = vmatpush3.bf16.msra.mxu1 %v7675_v28  ;;  %4847 = vmatprep.mubr.msk.f32.mxu1 %vm6632_vm12, %v8557_v18  ;;  %v7690_v28 = vpack.c.bf16 %v2140_v21, %v2139_v60  ;;  %v2145_v21 = vld [vmem:[#allocation13 + $0x160] sm:$0xff]  ;;  %v2146_v60 = vld [vmem:[#allocation13 + $0x168] sm:$0xff] }
 0x6d6   :  { %5630 = vmatprep.subr.bf16.mxu1 %v8670_v59 }
 0x6d7   :  { %8689 = vst [vmem:[#allocation180_spill] sm:$0xff] %v7690_v28 }
 0x6d9   :  { %5632 = vmatpush3.bf16.msra.mxu1 %v7680_v30  ;;  %v7698_v30 = vpack.c.bf16 %v2144_v40, %v2143_v13  ;;  %v2313_v13 = vld [vmem:[#allocation13 + $0x200] sm:$0xff]  ;;  %v2314_v40 = vld [vmem:[#allocation13 + $0x208] sm:$0xff] }
 0x6da   :  { %5633 = vmatprep.subr.bf16.mxu1 %v8670_v59 }
 0x6db   :  { %8691 = vst [vmem:[#allocation182_spill] sm:$0xff] %v7698_v30 }
 0x6dd   :  { %5635 = vmatpush3.bf16.msra.mxu1 %v7686_v61  ;;  %v7702_v61 = vpack.c.bf16 %v2146_v60, %v2145_v21  ;;  %v2315_v21 = vld [vmem:[#allocation13 + $0x210] sm:$0xff]  ;;  %v2316_v60 = vld [vmem:[#allocation13 + $0x218] sm:$0xff] }
 0x6de   :  { %5636 = vmatprep.subr.bf16.mxu1 %v8670_v59 }
 0x6df   :  { %8692 = vst [vmem:[#allocation183_spill] sm:$0xff] %v7702_v61 }
 0x6e1   :  { %5638 = vmatpush3.bf16.msra.mxu1 %v7690_v28  ;;  %v7706_v28 = vpack.c.bf16 %v2148_v1, %v2147_v47  ;;  %v2317_v47 = vld [vmem:[#allocation13 + $0x220] sm:$0xff]  ;;  %v2318_v1 = vld [vmem:[#allocation13 + $0x228] sm:$0xff] }
 0x6e2   :  { %5639 = vmatprep.subr.bf16.mxu1 %v8670_v59 }
 0x6e3   :  { %8693 = vst [vmem:[#allocation184_spill] sm:$0xff] %v7706_v28 }
 0x6e5   :  { %5641 = vmatpush3.bf16.msra.mxu1 %v7694_v58  ;;  %v7710_v58 = vpack.c.bf16 %v2314_v40, %v2313_v13  ;;  %v7721_v13 = vpack.c.bf16 %v2318_v1, %v2317_v47  ;;  %v2319_v40 = vld [vmem:[#allocation13 + $0x230] sm:$0xff]  ;;  %v2324_v1 = vld [vmem:[#allocation13 + $0x258] sm:$0xff] }
 0x6e6   :  { %5642 = vmatprep.subr.bf16.mxu1 %v8670_v59  ;;  %v2323_v47 = vld [vmem:[#allocation13 + $0x250] sm:$0xff] }
 0x6e7   :  { %8694 = vst [vmem:[#allocation185_spill] sm:$0xff] %v7710_v58  ;;  %8696 = vst [vmem:[#allocation187_spill] sm:$0xff] %v7721_v13 }
 0x6e9   :  { %5644 = vmatpush3.bf16.msra.mxu1 %v7698_v30  ;;  %v2149_v30 = vrot.slane %v7636_v52, 2 }
 0x6ea   :  { %5645 = vmatprep.subr.bf16.mxu1 %v8670_v59 }
 0x6ed   :  { %5647 = vmatpush3.bf16.msra.mxu1 %v7702_v61  ;;  %v7715_v61 = vpack.c.bf16 %v2316_v60, %v2315_v21  ;;  %v2321_v21 = vld [vmem:[#allocation13 + $0x240] sm:$0xff]  ;;  %v2322_v60 = vld [vmem:[#allocation13 + $0x248] sm:$0xff] }
 0x6ee   :  { %5648 = vmatprep.subr.bf16.mxu1 %v8670_v59 }
 0x6ef   :  { %8695 = vst [vmem:[#allocation186_spill] sm:$0xff] %v7715_v61 }
 0x6f1   :  { %5650 = vmatpush3.bf16.msra.mxu1 %v7706_v28  ;;  %v2320_v28 = vld [vmem:[#allocation13 + $0x238] sm:$0xff] }
 0x6f2   :  { %5675 = vmatprep.subr.bf16.mxu1 %v8670_v59 }
 0x6f4   :  { %4848 = vmatmul.mubr.f32.vlgmr.msra.gmra.mrb[18].mxu1 %v2149_v30  ;;  %v7725_v30 = vpack.c.bf16 %v2320_v28, %v2319_v40  ;;  %v2325_v28 = vld [vmem:[#allocation13 + $0x260] sm:$0xff]  ;;  %v2326_v40 = vld [vmem:[#allocation13 + $0x268] sm:$0xff] }
 0x6f5   :  { %5677 = vmatpush3.bf16.msra.mxu1 %v7710_v58  ;;  %4917 = vmatprep.mubr.msk.f32.mxu1 %vm6632_vm12, %v8557_v18  ;;  %v7729_v58 = vpack.c.bf16 %v2322_v60, %v2321_v21  ;;  %v2327_v21 = vld [vmem:[#allocation13 + $0x270] sm:$0xff]  ;;  %v2328_v60 = vld [vmem:[#allocation13 + $0x278] sm:$0xff] }
 0x6f6   :  { %5678 = vmatprep.subr.bf16.mxu1 %v8670_v59  ;;  %8697 = vst [vmem:[#allocation188_spill] sm:$0xff] %v7725_v30 }
 0x6f7   :  { %8698 = vst [vmem:[#allocation189_spill] sm:$0xff] %v7729_v58 }
 0x6f9   :  { %5680 = vmatpush3.bf16.msra.mxu1 %v7715_v61  ;;  %v7733_v61 = vpack.c.bf16 %v2324_v1, %v2323_v47  ;;  %v2329_v47 = vrot.slane %v7636_v52, 4  ;;  %v310_v1 = vld [vmem:[#allocation14] sm:$0xff]  ;;  %v315_v52 = vld [vmem:[#allocation14 + $0x28] sm:$0xff] }
 0x6fa   :  { %5681 = vmatprep.subr.bf16.mxu1 %v8670_v59 }
 0x6fb   :  { %8699 = vst [vmem:[#allocation190_spill] sm:$0xff] %v7733_v61 }
 0x6fd   :  { %5683 = vmatpush3.bf16.msra.mxu1 %v7721_v13  ;;  %v7737_v13 = vpack.c.bf16 %v2326_v40, %v2325_v28  ;;  %v311_v28 = vld [vmem:[#allocation14 + $0x8] sm:$0xff]  ;;  %v312_v40 = vld [vmem:[#allocation14 + $0x10] sm:$0xff] }
 0x6fe   :  { %5684 = vmatprep.subr.bf16.mxu1 %v8670_v59 }
 0x6ff   :  { %8700 = vst [vmem:[#allocation191_spill] sm:$0xff] %v7737_v13 }
 0x701   :  { %5686 = vmatpush3.bf16.msra.mxu1 %v7725_v30  ;;  %v7741_v30 = vpack.c.bf16 %v2328_v60, %v2327_v21  ;;  %v314_v60 = vld [vmem:[#allocation14 + $0x20] sm:$0xff] }
 0x702   :  { %5687 = vmatprep.subr.bf16.mxu1 %v8670_v59 }
 0x703   :  { %8701 = vst [vmem:[#allocation192_spill] sm:$0xff] %v7741_v30 }
 0x705   :  { %5689 = vmatpush3.bf16.msra.mxu1 %v7729_v58  ;;  %v317_v58 = vld [vmem:[#allocation14 + $0x38] sm:$0xff] }
 0x706   :  { %5690 = vmatprep.subr.bf16.mxu1 %v8670_v59 }
 0x709   :  { %5692 = vmatpush3.bf16.msra.mxu1 %v7733_v61  ;;  %v7749_v61 = vpack.c.bf16 %v311_v28, %v310_v1  ;;  %v319_v28 = vld [vmem:[#allocation14 + $0x48] sm:$0xff] }
 0x70a   :  { %5693 = vmatprep.subr.bf16.mxu1 %v8670_v59 }
 0x70b   :  { %8702 = vst [vmem:[#allocation193_spill] sm:$0xff] %v7749_v61  ;;  %5701 = vmatpush3.bf16.msra.mxu0 %v7749_v61 }
 0x70c   :  { %5702 = vmatprep.subr.bf16.mxu0 %v8670_v59 }
 0x70d   :  { %5695 = vmatpush3.bf16.msra.mxu1 %v7737_v13  ;;  %v313_v13 = vld [vmem:[#allocation14 + $0x18] sm:$0xff] }
 0x70e   :  { %5696 = vmatprep.subr.bf16.mxu1 %v8670_v59  ;;  %v7752_v21 = vpack.c.bf16 %v313_v13, %v312_v40  ;;  %v318_v13 = vld [vmem:[#allocation14 + $0x40] sm:$0xff] }
 0x70f   :  { %v7764_v40 = vpack.c.bf16 %v319_v28, %v318_v13  ;;  %v324_v13 = vld [vmem:[#allocation14 + $0x70] sm:$0xff]  ;;  %v325_v28 = vld [vmem:[#allocation14 + $0x78] sm:$0xff] }
 0x710   :  { %8703 = vst [vmem:[#allocation194_spill] sm:$0xff] %v7752_v21  ;;  %5704 = vmatpush3.bf16.msra.mxu0 %v7752_v21 }
 0x711   :  { %5698 = vmatpush3.bf16.msra.mxu1 %v7741_v30  ;;  %5705 = vmatprep.subr.bf16.mxu0 %v8670_v59  ;;  %v316_v30 = vld [vmem:[#allocation14 + $0x30] sm:$0xff]  ;;  %8706 = vst [vmem:[#allocation197_spill] sm:$0xff] %v7764_v40 }
 0x712   :  { %5723 = vmatprep.subr.bf16.mxu1 %v8670_v59  ;;  %v7760_v1 = vpack.c.bf16 %v317_v58, %v316_v30  ;;  %v322_v58 = vld [vmem:[#allocation14 + $0x60] sm:$0xff]  ;;  %v323_v30 = vld [vmem:[#allocation14 + $0x68] sm:$0xff] }
 0x714   :  { %4918 = vmatmul.mubr.f32.vlgmr.msra.gmra.mrb[20].mxu1 %v2329_v47  ;;  %v7756_v47 = vpack.c.bf16 %v315_v52, %v314_v60  ;;  %8705 = vst [vmem:[#allocation196_spill] sm:$0xff] %v7760_v1  ;;  %v320_v60 = vld [vmem:[#allocation14 + $0x50] sm:$0xff]  ;;  %v321_v52 = vld [vmem:[#allocation14 + $0x58] sm:$0xff] }
 0x715   :  { %4987 = vmatprep.mubr.msk.f32.mxu1 %vm6632_vm12, %v8557_v18  ;;  %v7768_v21 = vpack.c.bf16 %v321_v52, %v320_v60 }
 0x716   :  { %8704 = vst [vmem:[#allocation195_spill] sm:$0xff] %v7756_v47  ;;  %5707 = vmatpush3.bf16.msra.mxu0 %v7756_v47  ;;  %v7772_v47 = vpack.c.bf16 %v323_v30, %v322_v58 }
 0x717   :  { %5708 = vmatprep.subr.bf16.mxu0 %v8670_v59  ;;  %8707 = vst [vmem:[#allocation198_spill] sm:$0xff] %v7768_v21 }
 0x718   :  { %8708 = vst [vmem:[#allocation199_spill] sm:$0xff] %v7772_v47 }
 0x71a   :  { %5710 = vmatpush3.bf16.msra.mxu0 %v7760_v1  ;;  %v7777_v1 = vpack.c.bf16 %v325_v28, %v324_v13 }
 0x71b   :  { %5711 = vmatprep.subr.bf16.mxu0 %v8670_v59 }
 0x71c   :  { %8709 = vst [vmem:[#allocation200_spill] sm:$0xff] %v7777_v1 }
 0x71e   :  { %5713 = vmatpush3.bf16.msra.mxu0 %v7764_v40 }
 0x71f   :  { %5714 = vmatprep.subr.bf16.mxu0 %v8670_v59 }
 0x722   :  { %5716 = vmatpush3.bf16.msra.mxu0 %v7768_v21 }
 0x723   :  { %5717 = vmatprep.subr.bf16.mxu0 %v8670_v59 }
 0x726   :  { %5719 = vmatpush3.bf16.msra.mxu0 %v7772_v47  ;;  %v7783_v47 = vld [vmem:[#allocation2 + $0x28] sm:$0xff] }
 0x727   :  { %5720 = vmatprep.subr.bf16.mxu0 %v8670_v59  ;;  %v2980_v13 = vrot.slane %v7783_v47, 4 }
 0x729   :  { %v7788_v28 = vsel %vm825_vm2, %v2979_v24, %v2980_v13  ;;  %v329_v24 = vld [vmem:[#allocation16 + $0x10] sm:$0xff] }
 0x72a   :  { %5722 = vmatpush3.bf16.msra.mxu0 %v7777_v1  ;;  %v7790_v1 = vld [vmem:[#allocation2 + $0x30] sm:$0xff]  ;;  %v7807_v2 = vpack.c.bf16 %v330_v48, %v329_v24  ;;  %v335_v24 = vld [vmem:[#allocation16 + $0x40] sm:$0xff] }
 0x72b   :  { %5748 = vmatprep.subr.bf16.mxu0 %v6851_v4  ;;  %v2982_v4 = vrot.slane %v7790_v1, 4 }
 0x787   :  { %v2058_v60 = vpop.f32.mrb[14].mxu1  ;;  %v2307_v52 = vpop.f32.mrb[16].mxu0 }
 0x788   :  { %v4779_v40 = vpop.f32.mrb[15].mxu1  ;;  %v4884_v21 = vpop.f32.mrb[17].mxu0 }
 0x789   :  { %v7794_v21 = vsel %vm825_vm2, %v2980_v13, %v2982_v4  ;;  %v7796_v40 = vld [vmem:[#allocation2 + $0x38] sm:$0xff]  ;;  %v331_v13 = vld [vmem:[#allocation16 + $0x20] sm:$0xff] }
 0x7a7   :  { %v2128_v58 = vpop.f32.mrb[16].mxu1 }
 0x7a8   :  { %v2129_v30 = vadd.f32 %v2128_v58, %v2058_v60  ;;  %v4814_v61 = vpop.f32.mrb[17].mxu1  ;;  %v327_v58 = vld [vmem:[#allocation16] sm:$0xff] }
 0x7a9   :  { %v8518_v61 = vrot.slane %v7796_v40, 4  ;;  %v7804_v22 = vpack.c.bf16 %v328_v23, %v327_v58  ;;  %v333_v23 = vld [vmem:[#allocation16 + $0x30] sm:$0xff]  ;;  %v334_v58 = vld [vmem:[#allocation16 + $0x38] sm:$0xff] }
 0x7aa   :  { %v7815_v48 = vpack.c.bf16 %v334_v58, %v333_v23 }
 0x7ab   :  { %v7802_v60 = vsel %vm825_vm2, %v2982_v4, %v8518_v61  ;;  %8710 = vst [vmem:[#allocation201_spill] sm:$0xff] %v7804_v22  ;;  %5725 = vmatpush3.bf16.msra.mxu1 %v7804_v22  ;;  %v7811_v4 = vpack.c.bf16 %v332_v55, %v331_v13  ;;  %v336_v22 = vld [vmem:[#allocation16 + $0x48] sm:$0xff] }
 0x7ac   :  { %5726 = vmatprep.subr.bf16.mxu1 %v8670_v59 }
 0x7af   :  { %5728 = vmatpush3.bf16.msra.mxu1 %v7807_v2 }
 0x7b0   :  { %5729 = vmatprep.subr.bf16.mxu1 %v8670_v59 }
 0x7b3   :  { %5731 = vmatpush3.bf16.msra.mxu1 %v7811_v4 }
 0x7b4   :  { %5732 = vmatprep.subr.bf16.mxu1 %v8670_v59 }
 0x7b7   :  { %5734 = vmatpush3.bf16.msra.mxu1 %v7815_v48 }
 0x7b8   :  { %5735 = vmatprep.subr.bf16.mxu1 %v8670_v59 }
 0x7c7   :  { %v2217_v26 = vpop.f32.mrb[18].mxu1 }
 0x7c8   :  { %v2221_v43 = vadd.f32 %v2217_v26, %v2129_v30  ;;  %v4849_v25 = vpop.f32.mrb[19].mxu1  ;;  %v337_v26 = vld [vmem:[#allocation16 + $0x50] sm:$0xff]  ;;  %v340_v30 = vld [vmem:[#allocation16 + $0x68] sm:$0xff] }
 0x7c9   :  { %v7819_v25 = vpack.c.bf16 %v336_v22, %v335_v24  ;;  %v309_v22 = vld [vmem:[%s8321_s10] sm:$0x1] }
 0x7ca   :  { %v2311_v61 = vadd.f32 %v2307_v52, %v2221_v43  ;;  %v338_v43 = vld [vmem:[#allocation16 + $0x58] sm:$0xff]  ;;  %v339_v52 = vld [vmem:[#allocation16 + $0x60] sm:$0xff] }
 0x7cb   :  { %5737 = vmatpush3.bf16.msra.mxu1 %v7819_v25  ;;  %v7823_v55 = vpack.c.bf16 %v338_v43, %v337_v26  ;;  %v7827_v13 = vpack.c.bf16 %v340_v30, %v339_v52  ;;  %v2554_v52 = vrot.slane %v7781_v62, 1  ;;  %v2555_v30 = vrot.slane %v7783_v47, 1 }
 0x7cc   :  { %5738 = vmatprep.subr.bf16.mxu1 %v8670_v59 }
 0x7cd   :  { %8711 = vst [vmem:[#allocation202_spill] sm:$0xff] %v7827_v13 }
 0x7cf   :  { %5740 = vmatpush3.bf16.msra.mxu1 %v7823_v55 }
 0x7d0   :  { %5741 = vmatprep.subr.bf16.mxu1 %v8670_v59 }
 0x7d3   :  { %5743 = vmatpush3.bf16.msra.mxu1 %v7827_v13  ;;  %v2556_v13 = vsel %vm369_vm0, %v2554_v52, %v2555_v30 }
 0x7d4   :  { %5744 = vmatprep.subr.bf16.mxu1 %v8670_v59 }
 0x7e7   :  { %v2397_v23 = vpop.f32.mrb[20].mxu1 }
 0x7e8   :  { %v2401_v58 = vadd.f32 %v2397_v23, %v2311_v61  ;;  %v4919_v24 = vpop.f32.mrb[21].mxu1  ;;  %v2557_v61 = vrot.slane %v7790_v1, 1 }
 0x7ea   :  { %v2402_v26 = vadd.f32 %v2401_v58, %v309_v22  ;;  %v2559_v22 = vrot.slane %v7796_v40, 1 }
 0x7ec   :  { %v2403_v43 = vmax.f32 %v2402_v26, 0.0 }
 0x7ee   :  { %4953 = vmatmul.mubr.f32.vlgmr.msra.gmra.mrb[18].mxu0 %v2403_v43 }
 0x7ef   :  { %5750 = vmatpush1.bf16.msra.mxu0 %v6853_v8  ;;  %2633 = vmatprep.mubr.f32.mxu0 %v8557_v18  ;;  %v2558_v8 = vsel %vm369_vm0, %v2555_v30, %v2557_v61 }
 0x7f0   :  { %5752 = vmatprep.subr.bf16.mxu0 %v6855_v9  ;;  %v2560_v9 = vsel %vm369_vm0, %v2557_v61, %v2559_v22 }
 0x7f3   :  { %5754 = vmatpush1.bf16.msra.mxu0 %v6863_v15  ;;  %v2755_v15 = vrot.slane %v7781_v62, 2 }
 0x7f4   :  { %5756 = vmatprep.subr.bf16.mxu0 %v6870_v20  ;;  %v2756_v20 = vrot.slane %v7783_v47, 2 }
 0x7f6   :  { %4477 = vmatmul.mubr.msk.f32.vlgmr.msra.gmra.mrb[20].mxu0 %vm377_vm1, %v2556_v13 }
 0x7f7   :  { %2639 = vmatprep.mubr.f32.mxu0 %v8557_v18  ;;  %5758 = vmatpush1.bf16.msra.mxu0 %v6875_v27  ;;  %v2757_v27 = vsel %vm581_vm3, %v2755_v15, %v2756_v20  ;;  %v8715_v15 = vld [vmem:[#allocation26_spill] sm:$0xff] }
 0x7f8   :  { %5760 = vmatprep.subr.bf16.mxu0 %v6880_v29  ;;  %v2758_v29 = vrot.slane %v7790_v1, 2 }
 0x7fa   :  { %4478 = vmatmul.mubr.msk.f32.gmra.mrb[22].mxu0 %vm377_vm1, %v2558_v8 }
 0x7fb   :  { %2645 = vmatprep.mubr.f32.mxu0 %v8557_v18  ;;  %5762 = vmatpush1.bf16.msra.mxu0 %v6890_v39  ;;  %v2759_v39 = vsel %vm581_vm3, %v2756_v20, %v2758_v29  ;;  %v6379_v20 = vld [vmem:[#allocation7 + $0x10] sm:$0xff] }
 0x7fc   :  { %5764 = vmatprep.subr.bf16.mxu0 %v6897_v42  ;;  %v2760_v42 = vrot.slane %v7796_v40, 2 }
 0x7fe   :  { %4479 = vmatmul.mubr.msk.f32.gmra.mrb[24].mxu0 %vm377_vm1, %v2560_v9  ;;  %v6378_v9 = vld [vmem:[#allocation7 + $0x8] sm:$0xff] }
 0x7ff   :  { %2651 = vmatprep.mubr.f32.mxu0 %v8557_v18 }
 0x802   :  { %4480 = vmatmul.mubr.msk.f32.gmra.mrb[26].mxu0 %vm377_vm1, %v2559_v22  ;;  %v6377_v22 = vld [vmem:[#allocation7] sm:$0xff] }
 0x803   :  { %2730 = vmatprep.mubr.f32.mxu0 %v8557_v18 }
 0x806   :  { %4481 = vmatmul.mubr.msk.f32.vlgmr.msra.gmra.mrb[20].mxu0 %vm377_vm1, %v7781_v62 }
 0x807   :  { %2736 = vmatprep.mubr.f32.mxu0 %v8557_v18  ;;  %5766 = vmatpush1.bf16.msra.mxu0 %v6916_v50  ;;  %v2761_v50 = vsel %vm581_vm3, %v2758_v29, %v2760_v42  ;;  %v6380_v29 = vld [vmem:[#allocation7 + $0x18] sm:$0xf] }
 0x808   :  { %5768 = vmatprep.subr.bf16.mxu0 %v6918_v51  ;;  %v2867_v51 = vrot.slane %v7781_v62, 3 }
 0x80a   :  { %4482 = vmatmul.mubr.msk.f32.gmra.mrb[22].mxu0 %vm377_vm1, %v7783_v47 }
 0x80b   :  { %2742 = vmatprep.mubr.f32.mxu0 %v8557_v18  ;;  %5770 = vmatpush1.bf16.msra.mxu0 %v6924_v56  ;;  %v2868_v56 = vrot.slane %v7783_v47, 3 }
 0x80c   :  { %5772 = vmatprep.subr.bf16.mxu0 %v6927_v57 }
 0x80d   :  { %v2869_v57 = vsel %vm703_vm4, %v2867_v51, %v2868_v56  ;;  %v8722_v51 = vld [vmem:[#allocation33_spill] sm:$0xff] }
 0x80e   :  { %4483 = vmatmul.mubr.msk.f32.gmra.mrb[24].mxu0 %vm377_vm1, %v7790_v1 }
 0x80f   :  { %2748 = vmatprep.mubr.f32.mxu0 %v8557_v18 }
 0x812   :  { %4484 = vmatmul.mubr.msk.f32.gmra.mrb[26].mxu0 %vm377_vm1, %v7796_v40 }
 0x813   :  { %2834 = vmatprep.mubr.f32.mxu0 %v8557_v18 }
 0x816   :  { %4485 = vmatmul.mubr.msk.f32.vlgmr.msra.gmra.mrb[20].mxu0 %vm377_vm1, %v2757_v27  ;;  %v8718_v27 = vld [vmem:[#allocation29_spill] sm:$0xff] }
 0x817   :  { %2840 = vmatprep.mubr.f32.mxu0 %v8557_v18  ;;  %5774 = vmatpush1.bf16.msra.mxu0 %v6944_v3  ;;  %v2870_v3 = vrot.slane %v7790_v1, 3 }
 0x818   :  { %5776 = vmatprep.subr.bf16.mxu0 %v6946_v5 }
 0x819   :  { %v2871_v5 = vsel %vm703_vm4, %v2868_v56, %v2870_v3  ;;  %v8723_v56 = vld [vmem:[#allocation34_spill] sm:$0xff] }
 0x81a   :  { %4486 = vmatmul.mubr.msk.f32.gmra.mrb[22].mxu0 %vm377_vm1, %v2759_v39  ;;  %v8719_v39 = vld [vmem:[#allocation30_spill] sm:$0xff] }
 0x81b   :  { %2846 = vmatprep.mubr.f32.mxu0 %v8557_v18  ;;  %5778 = vmatpush1.bf16.msra.mxu0 %v6953_v17  ;;  %v2872_v17 = vrot.slane %v7796_v40, 3 }
 0x81c   :  { %5780 = vmatprep.subr.bf16.mxu0 %v6956_v19 }
 0x81d   :  { %v2873_v19 = vsel %vm703_vm4, %v2870_v3, %v2872_v17  ;;  %v8725_v3 = vld [vmem:[#allocation36_spill] sm:$0xff] }
 0x81e   :  { %4487 = vmatmul.mubr.msk.f32.gmra.mrb[24].mxu0 %vm377_vm1, %v2761_v50  ;;  %v8721_v50 = vld [vmem:[#allocation32_spill] sm:$0xff] }
 0x81f   :  { %2852 = vmatprep.mubr.f32.mxu0 %v8557_v18 }
 0x822   :  { %4488 = vmatmul.mubr.msk.f32.gmra.mrb[26].mxu0 %vm377_vm1, %v2760_v42  ;;  %v8720_v42 = vld [vmem:[#allocation31_spill] sm:$0xff] }
 0x823   :  { %2946 = vmatprep.mubr.f32.mxu0 %v8557_v18 }
 0x826   :  { %4489 = vmatmul.mubr.msk.f32.vlgmr.msra.gmra.mrb[20].mxu0 %vm377_vm1, %v2869_v57  ;;  %v8724_v57 = vld [vmem:[#allocation35_spill] sm:$0xff] }
 0x827   :  { %2952 = vmatprep.mubr.f32.mxu0 %v8557_v18  ;;  %5782 = vmatpush1.bf16.msra.mxu0 %v6971_v33  ;;  %v341_v33 = vld [vmem:[#allocation16 + $0x70] sm:$0xff] }
 0x828   :  { %5784 = vmatprep.subr.bf16.mxu0 %v6973_v34  ;;  %v342_v34 = vld [vmem:[#allocation16 + $0x78] sm:$0xff] }
 0x82a   :  { %4490 = vmatmul.mubr.msk.f32.gmra.mrb[22].mxu0 %vm377_vm1, %v2871_v5  ;;  %v8726_v5 = vld [vmem:[#allocation37_spill] sm:$0xff] }
 0x82b   :  { %2958 = vmatprep.mubr.f32.mxu0 %v8557_v18  ;;  %5786 = vmatpush1.bf16.msra.mxu0 %v6980_v37  ;;  %v8712_v37 = vrot.slane %v7796_v40, 4 }
 0x82c   :  { %5862 = vmatprep.subr.bf16.mxu0 %v7141_v35 }
 0x82e   :  { %4491 = vmatmul.mubr.msk.f32.gmra.mrb[24].mxu0 %vm377_vm1, %v2873_v19  ;;  %v8728_v19 = vld [vmem:[#allocation39_spill] sm:$0xff] }
 0x82f   :  { %2964 = vmatprep.mubr.f32.mxu0 %v8557_v18 }
 0x832   :  { %4492 = vmatmul.mubr.msk.f32.gmra.mrb[26].mxu0 %vm377_vm1, %v2872_v17  ;;  %v8727_v17 = vld [vmem:[#allocation38_spill] sm:$0xff] }
 0x833   :  { %3058 = vmatprep.mubr.f32.mxu0 %v8557_v18 }
 0x836   :  { %4493 = vmatmul.mubr.msk.f32.vlgmr.msra.gmra.mrb[20].mxu0 %vm377_vm1, %v7788_v28 }
 0x837   :  { %3064 = vmatprep.mubr.f32.mxu0 %v8557_v18  ;;  %5864 = vmatpush1.bf16.msra.mxu0 %v7143_v53  ;;  %v7931_v53 = vpack.c.bf16 %v342_v34, %v341_v33  ;;  %v8729_v33 = vld [vmem:[#allocation40_spill] sm:$0xff]  ;;  %v8730_v34 = vld [vmem:[#allocation41_spill] sm:$0xff] }
 0x838   :  { %5866 = vmatprep.subr.bf16.mxu0 %v7145_v49 }
 0x839   :  { %5746 = vmatpush3.bf16.msra.mxu1 %v7931_v53 }
 0x83a   :  { %4494 = vmatmul.mubr.msk.f32.gmra.mrb[22].mxu0 %vm377_vm1, %v7794_v21 }
 0x83b   :  { %3070 = vmatprep.mubr.f32.mxu0 %v8557_v18  ;;  %5868 = vmatpush1.bf16.msra.mxu0 %v7149_v0  ;;  %v7948_v0 = vld [vmem:[%s8323_s12] sm:$0x1] }
 0x83c   :  { %5870 = vmatprep.subr.bf16.mxu0 %v7152_v14 }
 0x83e   :  { %4495 = vmatmul.mubr.msk.f32.gmra.mrb[24].mxu0 %vm377_vm1, %v7802_v60 }
 0x83f   :  { %3076 = vmatprep.mubr.f32.mxu0 %v8557_v18  ;;  %5872 = vmatpush1.bf16.msra.mxu0 %v7155_v44 }
 0x840   :  { %5874 = vmatprep.subr.bf16.mxu0 %v7158_v10 }
 0x842   :  { %4496 = vmatmul.mubr.msk.f32.gmra.mrb[26].mxu0 %vm377_vm1, %v8712_v37  ;;  %v8731_v37 = vld [vmem:[#allocation42_spill] sm:$0xff] }
 0x843   :  { %5876 = vmatpush1.bf16.msra.mxu0 %v7161_v45  ;;  %3376 = vmatprep.mubr.f32.mxu0 %v8557_v18 }
 0x844   :  { %5878 = vmatprep.subr.bf16.mxu0 %v7164_v63 }
 0x847   :  { %5880 = vmatpush1.bf16.msra.mxu0 %v7167_v32 }
 0x848   :  { %5882 = vmatprep.subr.bf16.mxu0 %v7170_v38 }
 0x84b   :  { %5884 = vmatpush1.bf16.msra.mxu0 %v7173_v11 }
 0x84c   :  { %5886 = vmatprep.subr.bf16.mxu0 %v7181_v6 }
 0x84f   :  { %5888 = vmatpush1.bf16.msra.mxu0 %v7183_v36 }
 0x850   :  { %5890 = vmatprep.subr.bf16.mxu0 %v7187_v54 }
 0x853   :  { %5892 = vmatpush1.bf16.msra.mxu0 %v7189_v16 }
 0x854   :  { %5894 = vmatprep.subr.bf16.mxu0 %v7193_v7 }
 0x8c1   :  { %v2470_v35 = vpop.f32.mrb[18].mxu0 }
 0x8c2   :  { %v2471_v49 = vadd.f32 %v2470_v35, %v7948_v0  ;;  %v4954_v14 = vpop.f32.mrb[19].mxu0  ;;  %v8732_v35 = vld [vmem:[#allocation43_spill] sm:$0xff] }
 0x8c3   :  { %v8734_v14 = vld [vmem:[#allocation45_spill] sm:$0xff] }
 0x8c4   :  { %v2474_v44 = vmax.f32 %v2471_v49, 0.0  ;;  %v8733_v49 = vld [vmem:[#allocation44_spill] sm:$0xff] }
 0x8c6   :  { %4988 = vmatmul.mubr.f32.vlgmr.msra.gmra.mrb[22].mxu1 %v2474_v44  ;;  %v8735_v44 = vld [vmem:[#allocation46_spill] sm:$0xff] }
 0x8c7   :  { %3177 = vmatprep.mubr.f32.mxu1 %v8557_v18 }
 0x909   :  { %v3060_v10 = vpop.f32.mrb[20].mxu0 }
 0x90a   :  { %v3062_v45 = vpop.f32.mrb[21].mxu0  ;;  %v3091_v63 = vadd.f32 %v3060_v10, %v7014_v46  ;;  %v8736_v10 = vld [vmem:[#allocation47_spill] sm:$0xff] }
 0x90b   :  { %v3092_v32 = vadd.f32 %v3062_v45, %v7018_v41  ;;  %v8737_v45 = vld [vmem:[#allocation48_spill] sm:$0xff] }
 0x90c   :  { %v3099_v54 = vmax.f32 %v3091_v63, 0.0  ;;  %v8738_v63 = vld [vmem:[#allocation49_spill] sm:$0xff] }
 0x90d   :  { %v3066_v38 = vpop.f32.mrb[22].mxu0  ;;  %v3100_v7 = vmax.f32 %v3092_v32, 0.0  ;;  %v8739_v32 = vld [vmem:[#allocation50_spill] sm:$0xff] }
 0x90e   :  { %v3093_v11 = vadd.f32 %v3066_v38, %v7014_v46  ;;  %v3068_v6 = vpop.f32.mrb[23].mxu0  ;;  %v8740_v38 = vld [vmem:[#allocation51_spill] sm:$0xff] }
 0x90f   :  { %v3094_v36 = vadd.f32 %v3068_v6, %v7018_v41  ;;  %v8742_v6 = vld [vmem:[#allocation53_spill] sm:$0xff] }
 0x910   :  { %v3101_v16 = vmax.f32 %v3093_v11, 0.0  ;;  %v8741_v11 = vld [vmem:[#allocation52_spill] sm:$0xff] }
 0x911   :  { %v3102_v62 = vmax.f32 %v3094_v36, 0.0  ;;  %v3072_v47 = vpop.f32.mrb[24].mxu0  ;;  %v8743_v36 = vld [vmem:[#allocation54_spill] sm:$0xff] }
 0x912   :  { %v5789_v1 = vpack.c.bf16 %v3101_v16, %v3099_v54  ;;  %v3074_v28 = vpop.f32.mrb[25].mxu0  ;;  %v3095_v40 = vadd.f32 %v3072_v47, %v7014_v46 }
 0x913   :  { %v5787_v21 = vpack.c.bf16 %v3102_v62, %v3100_v7  ;;  %v3096_v60 = vadd.f32 %v3074_v28, %v7018_v41 }
 0x914   :  { %v3103_v26 = vmax.f32 %v3095_v40, 0.0 }
 0x915   :  { %v3078_v13 = vpop.f32.mrb[26].mxu0  ;;  %5788 = vmatprep.subr.bf16.mxu1 %v5787_v21  ;;  %v3104_v52 = vmax.f32 %v3096_v60, 0.0 }
 0x916   :  { %v3097_v23 = vadd.f32 %v3078_v13, %v7014_v46  ;;  %v3080_v58 = vpop.f32.mrb[27].mxu0  ;;  %5790 = vmatpush1.bf16.msra.mxu1 %v5789_v1  ;;  %v8713_v46 = vld [vmem:[#allocation24_spill] sm:$0xff] }
 0x917   :  { %v3098_v24 = vadd.f32 %v3080_v58, %v7018_v41  ;;  %v8714_v41 = vld [vmem:[#allocation25_spill] sm:$0xff] }
 0x918   :  { %v3105_v43 = vmax.f32 %v3097_v23, 0.0 }
 0x919   :  { %v3106_v30 = vmax.f32 %v3098_v24, 0.0 }
 0x91a   :  { %v5794_v61 = vpack.c.bf16 %v3105_v43, %v3103_v26 }
 0x91b   :  { %v5791_v8 = vpack.c.bf16 %v3106_v30, %v3104_v52 }
 0x91d   :  { %5793 = vmatprep.subr.msk.bf16.mxu1 %vm7030_vm6, %v5791_v8 }
 0x91e   :  { %5796 = vmatpush1.bf16.msk.msra.mxu1 %vm7030_vm6, %v5794_v61 }
 0x91f   :  { %5798 = vmatprep.subr.bf16.mxu1 %v7034_v12  ;;  %v8717_v12 = vld [vmem:[#allocation28_spill] sm:$0xff] }
 0x921   :  { %4499 = vmatmul.mubr.msk.f32.vlgmr.msra.gmra.mrb[24].mxu1 %vm965_vm7, %v6377_v22 }
 0x922   :  { %3183 = vmatprep.mubr.f32.mxu1 %v8557_v18  ;;  %5800 = vmatpush1.bf16.msra.mxu1 %v8713_v46 }
 0x923   :  { %5802 = vmatprep.subr.bf16.mxu1 %v8714_v41 }
 0x925   :  { %4500 = vmatmul.mubr.msk.f32.gmra.mrb[26].mxu1 %vm965_vm7, %v6378_v9 }
 0x926   :  { %3189 = vmatprep.mubr.f32.mxu1 %v8557_v18  ;;  %5804 = vmatpush1.bf16.msra.mxu1 %v8715_v15 }
 0x927   :  { %5806 = vmatprep.subr.bf16.mxu1 %v8716_v31 }
 0x929   :  { %4501 = vmatmul.mubr.msk.f32.gmra.mrb[28].mxu1 %vm965_vm7, %v6379_v20 }
 0x92a   :  { %3195 = vmatprep.mubr.f32.mxu1 %v8557_v18  ;;  %5808 = vmatpush1.bf16.msra.mxu1 %v8717_v12 }
 0x92b   :  { %5810 = vmatprep.subr.bf16.mxu1 %v8718_v27 }
 0x92d   :  { %4502 = vmatmul.mubr.msk.f32.gmra.mrb[30].mxu1 %vm965_vm7, %v6380_v29 }
 0x92e   :  { %5812 = vmatpush1.bf16.msra.mxu1 %v8719_v39 }
 0x92f   :  { %5814 = vmatprep.subr.bf16.mxu1 %v8720_v42 }
 0x932   :  { %5816 = vmatpush1.bf16.msra.mxu1 %v8721_v50 }
 0x933   :  { %5818 = vmatprep.subr.bf16.mxu1 %v8722_v51 }
 0x936   :  { %5820 = vmatpush1.bf16.msra.mxu1 %v8723_v56 }
 0x937   :  { %5822 = vmatprep.subr.bf16.mxu1 %v8724_v57 }
 0x93a   :  { %5824 = vmatpush1.bf16.msra.mxu1 %v8725_v3 }
 0x93b   :  { %5826 = vmatprep.subr.bf16.mxu1 %v8726_v5 }
 0x93e   :  { %5828 = vmatpush1.bf16.msra.mxu1 %v8727_v17 }
 0x93f   :  { %5830 = vmatprep.subr.bf16.mxu1 %v8728_v19 }
 0x942   :  { %5832 = vmatpush1.bf16.msra.mxu1 %v8729_v33 }
 0x943   :  { %5834 = vmatprep.subr.bf16.mxu1 %v8730_v34 }
 0x946   :  { %5836 = vmatpush1.bf16.msra.mxu1 %v8731_v37  ;;  %v8744_v37 = vld [vmem:[#allocation55_spill] sm:$0xff] }
 0x947   :  { %5838 = vmatprep.subr.bf16.mxu1 %v8732_v35  ;;  %v8745_v35 = vld [vmem:[#allocation56_spill] sm:$0xff] }
 0x94a   :  { %5840 = vmatpush1.bf16.msra.mxu1 %v8733_v49  ;;  %v8746_v49 = vld [vmem:[#allocation57_spill] sm:$0xff] }
 0x94b   :  { %5842 = vmatprep.subr.bf16.mxu1 %v8734_v14  ;;  %v8747_v14 = vld [vmem:[#allocation58_spill] sm:$0xff] }
 0x94e   :  { %5844 = vmatpush1.bf16.msra.mxu1 %v8735_v44  ;;  %v8748_v44 = vld [vmem:[#allocation59_spill] sm:$0xff] }
 0x94f   :  { %5846 = vmatprep.subr.bf16.mxu1 %v8736_v10  ;;  %v8749_v10 = vld [vmem:[#allocation60_spill] sm:$0xff] }
 0x952   :  { %5848 = vmatpush1.bf16.msra.mxu1 %v8737_v45  ;;  %v8750_v45 = vld [vmem:[#allocation61_spill] sm:$0xff] }
 0x953   :  { %5850 = vmatprep.subr.bf16.mxu1 %v8738_v63  ;;  %v8751_v63 = vld [vmem:[#allocation62_spill] sm:$0xff] }
 0x956   :  { %5852 = vmatpush1.bf16.msra.mxu1 %v8739_v32  ;;  %v8752_v32 = vld [vmem:[#allocation63_spill] sm:$0xff] }
 0x957   :  { %5854 = vmatprep.subr.bf16.mxu1 %v8740_v38  ;;  %v8753_v38 = vld [vmem:[#allocation64_spill] sm:$0xff] }
 0x95a   :  { %5856 = vmatpush1.bf16.msra.mxu1 %v8741_v11  ;;  %v8754_v11 = vld [vmem:[#allocation65_spill] sm:$0xff] }
 0x95b   :  { %5858 = vmatprep.subr.bf16.mxu1 %v8742_v6  ;;  %v8755_v6 = vld [vmem:[#allocation66_spill] sm:$0xff] }
 0x95e   :  { %5860 = vmatpush1.bf16.msra.mxu1 %v8743_v36  ;;  %v8756_v36 = vld [vmem:[#allocation67_spill] sm:$0xff] }
 0x999   :  { %v8003_v54 = vpop.f32.mrb[22].mxu1 }
 0x99a   :  { %v4989_v16 = vpop.f32.mrb[23].mxu1 }
 0x99b   :  { %v8757_v16 = vld [vmem:[#allocation68_spill] sm:$0xff] }
 0x9f4   :  { %v3179_v7 = vpop.f32.mrb[24].mxu1 }
 0x9f5   :  { %v3181_v62 = vpop.f32.mrb[25].mxu1 }
 0x9f8   :  { %v3185_v47 = vpop.f32.mrb[26].mxu1 }
 0x9f9   :  { %v3187_v1 = vpop.f32.mrb[27].mxu1  ;;  %v3208_v21 = vrot.slane %v3185_v47, 6 }
 0x9fa   :  { %v3211_v13 = vrot.slane %v3187_v1, 6 }
 0x9fc   :  { %v3191_v28 = vpop.f32.mrb[28].mxu1 }
 0x9fd   :  { %v3209_v40 = vrot.slane %v3191_v28, 6  ;;  %v3193_v60 = vpop.f32.mrb[29].mxu1  ;;  %v8762_v28 = vld [vmem:[#allocation73_spill] sm:$0xff] }
 0x9fe   :  { %v3212_v23 = vrot.slane %v3193_v60, 6  ;;  %v8765_v60 = vld [vmem:[#allocation76_spill] sm:$0xff] }
 0x9ff   :  { %v3210_v58 = vsel %vm1079_vm8, %v3208_v21, %v3209_v40  ;;  %v8763_v21 = vld [vmem:[#allocation74_spill] sm:$0xff] }
 0xa00   :  { %v3222_v24 = vmax.f32 %v3179_v7, %v3210_v58  ;;  %v3197_v26 = vpop.f32.mrb[30].mxu1  ;;  %v3213_v43 = vsel %vm1079_vm8, %v3211_v13, %v3212_v23  ;;  %v8758_v7 = vld [vmem:[#allocation69_spill] sm:$0xff]  ;;  %v8768_v58 = vld [vmem:[#allocation79_spill] sm:$0xff] }
 0xa01   :  { %v3214_v52 = vrot.slane %v3197_v26, 6  ;;  %v3199_v30 = vpop.f32.mrb[31].mxu1  ;;  %v3223_v61 = vmax.f32 %v3181_v62, %v3213_v43  ;;  %v8759_v62 = vld [vmem:[#allocation70_spill] sm:$0xff]  ;;  %v8766_v13 = vld [vmem:[#allocation77_spill] sm:$0xff] }
 0xa02   :  { %v3216_v8 = vrot.slane %v3199_v30, 6  ;;  %v8770_v26 = vld [vmem:[#allocation81_spill] sm:$0xff]  ;;  %v8771_v43 = vld [vmem:[#allocation82_spill] sm:$0xff]  ;;  %v8773_v30 = vld [vmem:[#allocation84_spill] sm:$0xff] }
 0xa03   :  { %3290 = vmatprep.mubr.f32.mxu1 %v3223_v61  ;;  %v3215_v22 = vsel %vm1079_vm8, %v3209_v40, %v3214_v52  ;;  %v8764_v40 = vld [vmem:[#allocation75_spill] sm:$0xff]  ;;  %v8774_v61 = vld [vmem:[#allocation85_spill] sm:$0xff] }
 0xa04   :  { %3291 = vmatmul.mubr.f32.vlgmr.msra.gmra.mrb[32].mxu1 %v3222_v24  ;;  %v3217_v46 = vsel %vm1079_vm8, %v3212_v23, %v3216_v8  ;;  %v3224_v41 = vmax.f32 %v3185_v47, %v3215_v22  ;;  %v8760_v47 = vld [vmem:[#allocation71_spill] sm:$0xff]  ;;  %v8767_v23 = vld [vmem:[#allocation78_spill] sm:$0xff]  ;;  %v8769_v24 = vld [vmem:[#allocation80_spill] sm:$0xff] }
 0xa05   :  { %v3225_v9 = vmax.f32 %v3187_v1, %v3217_v46  ;;  %v8761_v1 = vld [vmem:[#allocation72_spill] sm:$0xff]  ;;  %v8772_v52 = vld [vmem:[#allocation83_spill] sm:$0xff]  ;;  %v8775_v8 = vld [vmem:[#allocation86_spill] sm:$0xff] }
 0xa06   :  { %v8776_v22 = vld [vmem:[#allocation87_spill] sm:$0xff]  ;;  %v8777_v46 = vld [vmem:[#allocation88_spill] sm:$0xff] }
 0xa07   :  { %3296 = vmatprep.mubr.f32.mxu1 %v3225_v9  ;;  %v8779_v9 = vld [vmem:[#allocation90_spill] sm:$0xff] }
 0xa08   :  { %3297 = vmatmul.mubr.f32.gmra.mrb[34].mxu1 %v3224_v41  ;;  %v8778_v41 = vld [vmem:[#allocation89_spill] sm:$0xff] }
 0xa09   :  { %3802 = vmatprep.mubr.f32.mxu1 %v8557_v18 }
 0xad7   :  { %v3292_v15 = vpop.f32.mrb[32].mxu1 }
 0xad8   :  { %v3294_v31 = vpop.f32.mrb[33].mxu1 }
 0xad9   :  { %v3303_v20 = vmax.f32 %v3292_v15, %v3294_v31  ;;  %v8780_v15 = vld [vmem:[#allocation91_spill] sm:$0xff]  ;;  %v8781_v31 = vld [vmem:[#allocation92_spill] sm:$0xff] }
 0xadb   :  { %v3298_v12 = vpop.f32.mrb[34].mxu1  ;;  %v3307_v39 = vrot.slane %v3303_v20, 1  ;;  %v3466_v42 = vrot.slane %v3303_v20, 2  ;;  %v3552_v50 = vrot.slane %v3303_v20, 3  ;;  %v3638_v51 = vrot.slane %v3303_v20, 4 }
 0xadc   :  { %v3300_v27 = vpop.f32.mrb[35].mxu1 }
 0xadd   :  { %v8010_v29 = vmax.f32 %v3298_v12, %v3300_v27  ;;  %v8783_v12 = vld [vmem:[#allocation94_spill] sm:$0xff]  ;;  %v8784_v27 = vld [vmem:[#allocation95_spill] sm:$0xff] }
 0xadf   :  { %v3308_v56 = vrot.slane %v8010_v29, 1  ;;  %v3467_v57 = vrot.slane %v8010_v29, 2  ;;  %v3553_v3 = vrot.slane %v8010_v29, 3  ;;  %v3639_v5 = vrot.slane %v8010_v29, 4 }
 0xae1   :  { %v3309_v17 = vsel %vm369_vm0, %v3307_v39, %v3308_v56  ;;  %v3468_v19 = vsel %vm581_vm3, %v3466_v42, %v3467_v57  ;;  %v3554_v33 = vsel %vm703_vm4, %v3552_v50, %v3553_v3  ;;  %v8024_v34 = vsel %vm825_vm2, %v3638_v51, %v3639_v5  ;;  %v8785_v39 = vld [vmem:[#allocation96_spill] sm:$0xff]  ;;  %v8786_v42 = vld [vmem:[#allocation97_spill] sm:$0xff]  ;;  %v8787_v50 = vld [vmem:[#allocation98_spill] sm:$0xff] }
 0xae2   :  { %3377 = vmatmul.mubr.f32.vlgmr.msra.gmra.mrb[28].mxu0 %v3309_v17  ;;  %v8788_v51 = vld [vmem:[#allocation99_spill] sm:$0xff]  ;;  %v8791_v17 = vld [vmem:[#allocation102_spill] sm:$0xff] }
 0xae3   :  { %5896 = vmatpush1.bf16.msra.mxu0 %v8744_v37  ;;  %3382 = vmatprep.mubr.f32.mxu0 %v8557_v18  ;;  %v8793_v37 = vld [vmem:[#allocation104_spill] sm:$0xff] }
 0xae4   :  { %5898 = vmatprep.subr.bf16.mxu0 %v8745_v35  ;;  %v8794_v35 = vld [vmem:[#allocation105_spill] sm:$0xff] }
 0xae6   :  { %3383 = vmatmul.mubr.f32.gmra.mrb[30].mxu0 %v3308_v56  ;;  %v8789_v56 = vld [vmem:[#allocation100_spill] sm:$0xff] }
 0xae7   :  { %5900 = vmatpush1.bf16.msra.mxu0 %v8746_v49  ;;  %3453 = vmatprep.mubr.f32.mxu0 %v8557_v18  ;;  %v8795_v49 = vld [vmem:[#allocation106_spill] sm:$0xff] }
 0xae8   :  { %5902 = vmatprep.subr.bf16.mxu0 %v8747_v14  ;;  %v8796_v14 = vld [vmem:[#allocation107_spill] sm:$0xff] }
 0xaeb   :  { %5904 = vmatpush1.bf16.msra.mxu0 %v8748_v44  ;;  %v8797_v44 = vld [vmem:[#allocation108_spill] sm:$0xff] }
 0xaec   :  { %5906 = vmatprep.subr.bf16.mxu0 %v8749_v10  ;;  %v8799_v10 = vld [vmem:[#allocation110_spill] sm:$0xff] }
 0xaef   :  { %5908 = vmatpush1.bf16.msra.mxu0 %v8750_v45  ;;  %v8800_v45 = vld [vmem:[#allocation111_spill] sm:$0xff] }
 0xaf0   :  { %5910 = vmatprep.subr.bf16.mxu0 %v8751_v63  ;;  %v8801_v63 = vld [vmem:[#allocation112_spill] sm:$0xff] }
 0xaf3   :  { %5912 = vmatpush1.bf16.msra.mxu0 %v8752_v32  ;;  %v8802_v32 = vld [vmem:[#allocation113_spill] sm:$0xff] }
 0xaf4   :  { %5914 = vmatprep.subr.bf16.mxu0 %v8753_v38  ;;  %v8804_v38 = vld [vmem:[#allocation115_spill] sm:$0xff] }
 0xaf7   :  { %5916 = vmatpush1.bf16.msra.mxu0 %v8754_v11  ;;  %v8805_v11 = vld [vmem:[#allocation116_spill] sm:$0xff] }
 0xaf8   :  { %5918 = vmatprep.subr.bf16.mxu0 %v8755_v6  ;;  %v8806_v6 = vld [vmem:[#allocation117_spill] sm:$0xff] }
 0xafb   :  { %5920 = vmatpush1.bf16.msra.mxu0 %v8756_v36  ;;  %v8807_v36 = vld [vmem:[#allocation153_spill] sm:$0xff] }
 0xafc   :  { %5922 = vmatprep.subr.bf16.mxu0 %v8757_v16  ;;  %v8808_v16 = vld [vmem:[#allocation154_spill] sm:$0xff] }
 0xaff   :  { %5924 = vmatpush1.bf16.msra.mxu0 %v8758_v7  ;;  %v8809_v7 = vld [vmem:[#allocation155_spill] sm:$0xff] }
 0xb00   :  { %5926 = vmatprep.subr.bf16.mxu0 %v8759_v62  ;;  %v8811_v62 = vld [vmem:[#allocation157_spill] sm:$0xff] }
 0xb02   :  { %3454 = vmatmul.mubr.f32.vlgmr.msra.gmra.mrb[28].mxu0 %v3303_v20  ;;  %v8782_v20 = vld [vmem:[#allocation93_spill] sm:$0xff] }
 0xb03   :  { %5928 = vmatpush1.bf16.msra.mxu0 %v8760_v47  ;;  %3459 = vmatprep.mubr.f32.mxu0 %v8557_v18  ;;  %v8814_v47 = vld [vmem:[#allocation168_spill] sm:$0xff] }
 0xb04   :  { %5930 = vmatprep.subr.bf16.mxu0 %v8761_v1 }
 0xb06   :  { %3460 = vmatmul.mubr.f32.gmra.mrb[30].mxu0 %v8010_v29  ;;  %v8812_v29 = vld [vmem:[#allocation158_spill] sm:$0xff] }
 0xb07   :  { %5932 = vmatpush1.bf16.msra.mxu0 %v8762_v28  ;;  %3535 = vmatprep.mubr.f32.mxu0 %v8557_v18 }
 0xb08   :  { %5934 = vmatprep.subr.bf16.mxu0 %v8763_v21  ;;  %v8815_v21 = vld [vmem:[#allocation144_spill] sm:$0xff] }
 0xb0b   :  { %5936 = vmatpush1.bf16.msra.mxu0 %v8764_v40 }
 0xb0c   :  { %5938 = vmatprep.subr.bf16.mxu0 %v8765_v60  ;;  %v8816_v60 = vld [vmem:[#allocation145_spill] sm:$0xff] }
 0xb0f   :  { %5940 = vmatpush1.bf16.msra.mxu0 %v8766_v13 }
 0xb10   :  { %5942 = vmatprep.subr.bf16.mxu0 %v8767_v23 }
 0xb13   :  { %5944 = vmatpush1.bf16.msra.mxu0 %v8768_v58 }
 0xb14   :  { %5946 = vmatprep.subr.bf16.mxu0 %v8769_v24 }
 0xb17   :  { %5948 = vmatpush1.bf16.msra.mxu0 %v8770_v26 }
 0xb18   :  { %5950 = vmatprep.subr.bf16.mxu0 %v8771_v43 }
 0xb1b   :  { %5952 = vmatpush1.bf16.msra.mxu0 %v8772_v52 }
 0xb1c   :  { %5954 = vmatprep.subr.bf16.mxu0 %v8773_v30 }
 0xb1f   :  { %5956 = vmatpush1.bf16.msra.mxu0 %v8774_v61 }
 0xb20   :  { %5958 = vmatprep.subr.bf16.mxu0 %v8775_v8 }
 0xb22   :  { %3536 = vmatmul.mubr.f32.vlgmr.msra.gmra.mrb[28].mxu0 %v3468_v19  ;;  %v8792_v19 = vld [vmem:[#allocation103_spill] sm:$0xff] }
 0xb23   :  { %5960 = vmatpush1.bf16.msra.mxu0 %v8776_v22  ;;  %3541 = vmatprep.mubr.f32.mxu0 %v8557_v18 }
 0xb24   :  { %5962 = vmatprep.subr.bf16.mxu0 %v8777_v46  ;;  %v8857_v46 = vld [vmem:[#allocation167_spill] sm:$0xff] }
 0xb26   :  { %3542 = vmatmul.mubr.f32.gmra.mrb[30].mxu0 %v3467_v57  ;;  %v8790_v57 = vld [vmem:[#allocation101_spill] sm:$0xff] }
 0xb27   :  { %5964 = vmatpush1.bf16.msra.mxu0 %v8778_v41  ;;  %3621 = vmatprep.mubr.f32.mxu0 %v8557_v18  ;;  %v8818_v41 = vld [vmem:[#allocation118_spill] sm:$0xff] }
 0xb28   :  { %5966 = vmatprep.subr.bf16.mxu0 %v8779_v9  ;;  %v6381_v9 = vld [vmem:[%s8318_s7] sm:$0xff] }
 0xb2b   :  { %5968 = vmatpush1.bf16.msra.mxu0 %v8780_v15  ;;  %v8819_v15 = vld [vmem:[#allocation119_spill] sm:$0xff] }
 0xb2c   :  { %5970 = vmatprep.subr.bf16.mxu0 %v8781_v31  ;;  %v8820_v31 = vld [vmem:[#allocation120_spill] sm:$0xff] }
 0xb2f   :  { %5972 = vmatpush1.bf16.msra.mxu0 %v8782_v20  ;;  %v6382_v20 = vld [vmem:[%s8318_s7 + $0x8] sm:$0x3] }
 0xb30   :  { %5974 = vmatprep.subr.bf16.mxu0 %v8783_v12  ;;  %v8821_v12 = vld [vmem:[#allocation121_spill] sm:$0xff] }
 0xb33   :  { %5976 = vmatpush1.bf16.msra.mxu0 %v8784_v27  ;;  %v8822_v27 = vld [vmem:[#allocation122_spill] sm:$0xff] }
 0xb34   :  { %5978 = vmatprep.subr.bf16.mxu0 %v8785_v39  ;;  %v8823_v39 = vld [vmem:[#allocation123_spill] sm:$0xff] }
 0xb37   :  { %5980 = vmatpush1.bf16.msra.mxu0 %v8786_v42  ;;  %v8824_v42 = vld [vmem:[#allocation124_spill] sm:$0xff] }
 0xb38   :  { %5982 = vmatprep.subr.bf16.mxu0 %v8787_v50  ;;  %v8825_v50 = vld [vmem:[#allocation125_spill] sm:$0xff] }
 0xb3b   :  { %5984 = vmatpush1.bf16.msra.mxu0 %v8788_v51  ;;  %v8826_v51 = vld [vmem:[#allocation126_spill] sm:$0xff] }
 0xb3c   :  { %5986 = vmatprep.subr.bf16.mxu0 %v8789_v56  ;;  %v8827_v56 = vld [vmem:[#allocation127_spill] sm:$0xff] }
 0xb3f   :  { %5988 = vmatpush1.bf16.msra.mxu0 %v8790_v57  ;;  %v8828_v57 = vld [vmem:[#allocation128_spill] sm:$0xff] }
 0xb40   :  { %5990 = vmatprep.subr.bf16.mxu0 %v8791_v17  ;;  %v8829_v17 = vld [vmem:[#allocation129_spill] sm:$0xff] }
 0xb42   :  { %3622 = vmatmul.mubr.f32.vlgmr.msra.gmra.mrb[28].mxu0 %v3554_v33  ;;  %v8798_v33 = vld [vmem:[#allocation109_spill] sm:$0xff] }
 0xb43   :  { %5992 = vmatpush1.bf16.msra.mxu0 %v8792_v19  ;;  %3627 = vmatprep.mubr.f32.mxu0 %v8557_v18  ;;  %v8830_v19 = vld [vmem:[#allocation130_spill] sm:$0xff] }
 0xb44   :  { %5994 = vmatprep.subr.bf16.mxu0 %v8793_v37  ;;  %v8831_v37 = vld [vmem:[#allocation131_spill] sm:$0xff] }
 0xb46   :  { %3628 = vmatmul.mubr.f32.gmra.mrb[30].mxu0 %v3553_v3  ;;  %v8803_v3 = vld [vmem:[#allocation114_spill] sm:$0xff] }
 0xb47   :  { %5996 = vmatpush1.bf16.msra.mxu0 %v8794_v35  ;;  %3707 = vmatprep.mubr.f32.mxu0 %v8557_v18  ;;  %v8832_v35 = vld [vmem:[#allocation132_spill] sm:$0xff] }
 0xb48   :  { %5998 = vmatprep.subr.bf16.mxu0 %v8795_v49  ;;  %v8833_v49 = vld [vmem:[#allocation133_spill] sm:$0xff] }
 0xb4b   :  { %6000 = vmatpush1.bf16.msra.mxu0 %v8796_v14  ;;  %v8834_v14 = vld [vmem:[#allocation134_spill] sm:$0xff] }
 0xb4c   :  { %6002 = vmatprep.subr.bf16.mxu0 %v8797_v44  ;;  %v8835_v44 = vld [vmem:[#allocation135_spill] sm:$0xff] }
 0xb4f   :  { %6004 = vmatpush1.bf16.msra.mxu0 %v8798_v33  ;;  %v8836_v33 = vld [vmem:[#allocation136_spill] sm:$0xff] }
 0xb50   :  { %6006 = vmatprep.subr.bf16.mxu0 %v8799_v10  ;;  %v8837_v10 = vld [vmem:[#allocation137_spill] sm:$0xff] }
 0xb53   :  { %6008 = vmatpush1.bf16.msra.mxu0 %v8800_v45  ;;  %v8838_v45 = vld [vmem:[#allocation138_spill] sm:$0xff] }
 0xb54   :  { %6010 = vmatprep.subr.bf16.mxu0 %v8801_v63  ;;  %v8839_v63 = vld [vmem:[#allocation139_spill] sm:$0xff] }
 0xb57   :  { %6012 = vmatpush1.bf16.msra.mxu0 %v8802_v32  ;;  %v8840_v32 = vld [vmem:[#allocation140_spill] sm:$0xff] }
 0xb58   :  { %6014 = vmatprep.subr.bf16.mxu0 %v8803_v3  ;;  %v8841_v3 = vld [vmem:[#allocation141_spill] sm:$0xff] }
 0xb5b   :  { %6016 = vmatpush1.bf16.msra.mxu0 %v8804_v38  ;;  %v8842_v38 = vld [vmem:[#allocation142_spill] sm:$0xff] }
 0xb5c   :  { %6018 = vmatprep.subr.bf16.mxu0 %v8805_v11  ;;  %v8843_v11 = vld [vmem:[#allocation143_spill] sm:$0xff] }
 0xb5f   :  { %6020 = vmatpush1.bf16.msra.mxu0 %v8806_v6  ;;  %v8844_v6 = vld [vmem:[#allocation147_spill] sm:$0xff] }
 0xb60   :  { %6163 = vmatprep.subr.bf16.mxu0 %v8670_v59 }
 0xb62   :  { %3708 = vmatmul.mubr.f32.vlgmr.msra.gmra.mrb[28].mxu0 %v8024_v34  ;;  %v8810_v34 = vld [vmem:[#allocation156_spill] sm:$0xff] }
 0xb63   :  { %3713 = vmatprep.mubr.f32.mxu0 %v8557_v18  ;;  %6165 = vmatpush3.bf16.msra.mxu0 %v8807_v36  ;;  %v8845_v36 = vld [vmem:[#allocation148_spill] sm:$0xff] }
 0xb64   :  { %6166 = vmatprep.subr.bf16.mxu0 %v8670_v59 }
 0xb66   :  { %3714 = vmatmul.mubr.f32.gmra.mrb[30].mxu0 %v3639_v5  ;;  %v8813_v5 = vld [vmem:[#allocation159_spill] sm:$0xff] }
 0xb67   :  { %6168 = vmatpush3.bf16.msra.mxu0 %v8808_v16  ;;  %5127 = vmatprep.mubr.msk.f32.mxu0 %vm6632_vm12, %v8557_v18  ;;  %v8846_v16 = vld [vmem:[#allocation149_spill] sm:$0xff] }
 0xb68   :  { %6169 = vmatprep.subr.bf16.mxu0 %v8670_v59 }
 0xb6b   :  { %6171 = vmatpush3.bf16.msra.mxu0 %v8809_v7  ;;  %v8847_v7 = vld [vmem:[#allocation150_spill] sm:$0xff] }
 0xb6c   :  { %6172 = vmatprep.subr.bf16.mxu0 %v8670_v59 }
 0xb6f   :  { %6174 = vmatpush3.bf16.msra.mxu0 %v8810_v34  ;;  %v8848_v34 = vld [vmem:[#allocation151_spill] sm:$0xff] }
 0xb70   :  { %6175 = vmatprep.subr.bf16.mxu0 %v8670_v59 }
 0xb73   :  { %6177 = vmatpush3.bf16.msra.mxu0 %v8811_v62  ;;  %v8849_v62 = vld [vmem:[#allocation152_spill] sm:$0xff] }
 0xb74   :  { %6178 = vmatprep.subr.bf16.mxu0 %v8670_v59 }
 0xb77   :  { %6180 = vmatpush3.bf16.msra.mxu0 %v8812_v29 }
 0xb78   :  { %6181 = vmatprep.subr.bf16.mxu0 %v8670_v59 }
 0xb7b   :  { %6183 = vmatpush3.bf16.msra.mxu0 %v8813_v5 }
 0xb7c   :  { %6184 = vmatprep.subr.bf16.mxu0 %v8670_v59 }
 0xb7f   :  { %6186 = vmatpush3.bf16.msra.mxu0 %v8814_v47 }
 0xb80   :  { %6211 = vmatprep.subr.bf16.mxu0 %v8670_v59 }
 0xc35   :  { %v3709_v1 = vpop.f32.mrb[28].mxu0 }
 0xc36   :  { %v3711_v28 = vpop.f32.mrb[29].mxu0  ;;  %v3724_v40 = vadd.f32 %v3709_v1, %v8815_v21 }
 0xc37   :  { %v3725_v13 = vadd.f32 %v3711_v28, %v8816_v60 }
 0xc38   :  { %v3728_v43 = vmax.f32 %v3724_v40, 0.0 }
 0xc39   :  { %v3715_v23 = vpop.f32.mrb[30].mxu0  ;;  %v3729_v30 = vmax.f32 %v3725_v13, 0.0 }
 0xc3a   :  { %v3726_v58 = vadd.f32 %v3715_v23, %v8815_v21  ;;  %v3717_v24 = vpop.f32.mrb[31].mxu0 }
 0xc3b   :  { %v3727_v26 = vadd.f32 %v3717_v24, %v8816_v60 }
 0xc3c   :  { %v3730_v52 = vmax.f32 %v3726_v58, 0.0 }
 0xc3d   :  { %v3731_v61 = vmax.f32 %v3727_v26, 0.0  ;;  %v8850_v26 = vld [vmem:[#allocation160_spill] sm:$0xff] }
 0xc3e   :  { %v6024_v8 = vpack.c.bf16 %v3730_v52, %v3728_v43  ;;  %v8851_v43 = vld [vmem:[#allocation161_spill] sm:$0xff]  ;;  %v8852_v52 = vld [vmem:[#allocation162_spill] sm:$0xff] }
 0xc3f   :  { %v6021_v22 = vpack.c.bf16 %v3731_v61, %v3729_v30  ;;  %v8853_v30 = vld [vmem:[#allocation163_spill] sm:$0xff]  ;;  %v8854_v61 = vld [vmem:[#allocation164_spill] sm:$0xff] }
 0xc41   :  { %6023 = vmatprep.subr.msk.bf16.mxu1 %vm7529_vm9, %v6021_v22  ;;  %v8856_v22 = vld [vmem:[#allocation166_spill] sm:$0xff] }
 0xc42   :  { %6026 = vmatpush1.bf16.msk.msra.mxu1 %vm7529_vm9, %v6024_v8  ;;  %v8855_v8 = vld [vmem:[#allocation165_spill] sm:$0xff] }
 0xc43   :  { %6028 = vmatprep.subr.bf16.mxu1 %v8818_v41 }
 0xc45   :  { %4505 = vmatmul.mubr.msk.f32.vlgmr.msra.gmra.mrb[36].mxu1 %vm1779_vm10, %v6381_v9 }
 0xc46   :  { %3808 = vmatprep.mubr.f32.mxu1 %v8557_v18  ;;  %6030 = vmatpush1.bf16.msra.mxu1 %v8819_v15 }
 0xc47   :  { %6032 = vmatprep.subr.bf16.mxu1 %v8820_v31 }
 0xc49   :  { %4506 = vmatmul.mubr.msk.f32.gmra.mrb[38].mxu1 %vm1779_vm10, %v6382_v20 }
 0xc4a   :  { %6034 = vmatpush1.bf16.msra.mxu1 %v8821_v12  ;;  %v8858_v12 = vld [vmem:[#allocation169_spill] sm:$0xff] }
 0xc4b   :  { %6036 = vmatprep.subr.bf16.mxu1 %v8822_v27  ;;  %v8859_v27 = vld [vmem:[#allocation193_spill] sm:$0xff] }
 0xc4e   :  { %6038 = vmatpush1.bf16.msra.mxu1 %v8823_v39  ;;  %v8860_v39 = vld [vmem:[#allocation170_spill] sm:$0xff] }
 0xc4f   :  { %6040 = vmatprep.subr.bf16.mxu1 %v8824_v42  ;;  %v8861_v42 = vld [vmem:[#allocation194_spill] sm:$0xff] }
 0xc52   :  { %6042 = vmatpush1.bf16.msra.mxu1 %v8825_v50  ;;  %v8862_v50 = vld [vmem:[#allocation171_spill] sm:$0xff] }
 0xc53   :  { %6044 = vmatprep.subr.bf16.mxu1 %v8826_v51  ;;  %v8863_v51 = vld [vmem:[#allocation195_spill] sm:$0xff] }
 0xc56   :  { %6046 = vmatpush1.bf16.msra.mxu1 %v8827_v56  ;;  %v8864_v56 = vld [vmem:[#allocation172_spill] sm:$0xff] }
 0xc57   :  { %6048 = vmatprep.subr.bf16.mxu1 %v8828_v57  ;;  %v8865_v57 = vld [vmem:[#allocation196_spill] sm:$0xff] }
 0xc5a   :  { %6050 = vmatpush1.bf16.msra.mxu1 %v8829_v17  ;;  %v8866_v17 = vld [vmem:[#allocation173_spill] sm:$0xff] }
 0xc5b   :  { %6052 = vmatprep.subr.bf16.mxu1 %v8830_v19  ;;  %v8867_v19 = vld [vmem:[#allocation197_spill] sm:$0xff] }
 0xc5e   :  { %6054 = vmatpush1.bf16.msra.mxu1 %v8831_v37  ;;  %v8868_v37 = vld [vmem:[#allocation174_spill] sm:$0xff] }
 0xc5f   :  { %6056 = vmatprep.subr.bf16.mxu1 %v8832_v35  ;;  %v8869_v35 = vld [vmem:[#allocation198_spill] sm:$0xff] }
 0xc62   :  { %6058 = vmatpush1.bf16.msra.mxu1 %v8833_v49  ;;  %v8870_v49 = vld [vmem:[#allocation175_spill] sm:$0xff] }
 0xc63   :  { %6060 = vmatprep.subr.bf16.mxu1 %v8834_v14  ;;  %v8871_v14 = vld [vmem:[#allocation199_spill] sm:$0xff] }
 0xc66   :  { %6062 = vmatpush1.bf16.msra.mxu1 %v8835_v44  ;;  %v8872_v44 = vld [vmem:[#allocation176_spill] sm:$0xff] }
 0xc67   :  { %6064 = vmatprep.subr.bf16.mxu1 %v8836_v33  ;;  %v8873_v33 = vld [vmem:[#allocation200_spill] sm:$0xff] }
 0xc6a   :  { %6066 = vmatpush1.bf16.msra.mxu1 %v8837_v10  ;;  %v8874_v10 = vld [vmem:[#allocation177_spill] sm:$0xff] }
 0xc6b   :  { %6068 = vmatprep.subr.bf16.mxu1 %v8838_v45  ;;  %v8875_v45 = vld [vmem:[#allocation178_spill] sm:$0xff] }
 0xc6e   :  { %6070 = vmatpush1.bf16.msra.mxu1 %v8839_v63  ;;  %v8876_v63 = vld [vmem:[#allocation179_spill] sm:$0xff] }
 0xc6f   :  { %6072 = vmatprep.subr.bf16.mxu1 %v8840_v32  ;;  %v8877_v32 = vld [vmem:[#allocation180_spill] sm:$0xff] }
 0xc72   :  { %6074 = vmatpush1.bf16.msra.mxu1 %v8841_v3  ;;  %v8878_v3 = vld [vmem:[#allocation181_spill] sm:$0xff] }
 0xc73   :  { %6076 = vmatprep.subr.bf16.mxu1 %v8842_v38  ;;  %v8879_v38 = vld [vmem:[#allocation182_spill] sm:$0xff] }
 0xc76   :  { %6078 = vmatpush1.bf16.msra.mxu1 %v8843_v11  ;;  %v8880_v11 = vld [vmem:[#allocation183_spill] sm:$0xff] }
 0xc77   :  { %6080 = vmatprep.subr.bf16.mxu1 %v8844_v6  ;;  %v8881_v6 = vld [vmem:[#allocation184_spill] sm:$0xff] }
 0xc7a   :  { %6082 = vmatpush1.bf16.msra.mxu1 %v8845_v36 }
 0xc7b   :  { %6084 = vmatprep.subr.bf16.mxu1 %v8846_v16  ;;  %v8882_v16 = vld [vmem:[#allocation185_spill] sm:$0xff] }
 0xc7e   :  { %6086 = vmatpush1.bf16.msra.mxu1 %v8847_v7  ;;  %v8883_v7 = vld [vmem:[#allocation186_spill] sm:$0xff] }
 0xc7f   :  { %6088 = vmatprep.subr.bf16.mxu1 %v8848_v34  ;;  %v8884_v34 = vld [vmem:[#allocation187_spill] sm:$0xff] }
 0xc82   :  { %6090 = vmatpush1.bf16.msra.mxu1 %v8849_v62  ;;  %v8885_v62 = vld [vmem:[#allocation188_spill] sm:$0xff] }
 0xc83   :  { %6091 = vmatprep.subr.bf16.mxu1 %v8670_v59 }
 0xd18   :  { %v3804_v29 = vpop.f32.mrb[36].mxu1 }
 0xd19   :  { %v3806_v5 = vpop.f32.mrb[37].mxu1  ;;  %v3819_v1 = vrot.slane %v3804_v29, 5 }
 0xd1a   :  { %v3822_v40 = vrot.slane %v3806_v5, 5 }
 0xd1c   :  { %v3810_v47 = vpop.f32.mrb[38].mxu1 }
 0xd1d   :  { %v3820_v28 = vrot.slane %v3810_v47, 5  ;;  %v3812_v21 = vpop.f32.mrb[39].mxu1  ;;  %v8888_v47 = vld [vmem:[#allocation191_spill] sm:$0xff] }
 0xd1e   :  { %v3823_v60 = vrot.slane %v3812_v21, 5  ;;  %v8890_v21 = vld [vmem:[#allocation201_spill] sm:$0xff] }
 0xd1f   :  { %v3821_v13 = vsel %vm1873_vm11, %v3819_v1, %v3820_v28  ;;  %v8889_v1 = vld [vmem:[#allocation192_spill] sm:$0xff] }
 0xd20   :  { %v3827_v23 = vmax.f32 %v3804_v29, %v3821_v13  ;;  %v3824_v58 = vsel %vm1873_vm11, %v3822_v40, %v3823_v60  ;;  %v8886_v29 = vld [vmem:[#allocation189_spill] sm:$0xff] }
 0xd21   :  { %v3828_v24 = vmax.f32 %v3806_v5, %v3824_v58  ;;  %v8887_v5 = vld [vmem:[#allocation190_spill] sm:$0xff] }
 0xd23   :  { %3893 = vmatprep.mubr.f32.mxu1 %v3828_v24 }
 0xd24   :  { %3894 = vmatmul.mubr.f32.vlgmr.msra.gmra.mrb[40].mxu1 %v3827_v23 }
 0xd25   :  { %6093 = vmatpush3.bf16.msra.mxu1 %v8850_v26  ;;  %5022 = vmatprep.mubr.msk.f32.mxu1 %vm6632_vm12, %v8557_v18 }
 0xd26   :  { %6094 = vmatprep.subr.bf16.mxu1 %v8670_v59 }
 0xd29   :  { %6096 = vmatpush3.bf16.msra.mxu1 %v8851_v43 }
 0xd2a   :  { %6097 = vmatprep.subr.bf16.mxu1 %v8670_v59 }
 0xd2d   :  { %6099 = vmatpush3.bf16.msra.mxu1 %v8852_v52 }
 0xd2e   :  { %6100 = vmatprep.subr.bf16.mxu1 %v8670_v59 }
 0xd31   :  { %6102 = vmatpush3.bf16.msra.mxu1 %v8853_v30 }
 0xd32   :  { %6103 = vmatprep.subr.bf16.mxu1 %v8670_v59 }
 0xd35   :  { %6105 = vmatpush3.bf16.msra.mxu1 %v8854_v61 }
 0xd36   :  { %6106 = vmatprep.subr.bf16.mxu1 %v8670_v59 }
 0xd39   :  { %6108 = vmatpush3.bf16.msra.mxu1 %v8855_v8 }
 0xd3a   :  { %6109 = vmatprep.subr.bf16.mxu1 %v8670_v59 }
 0xd3d   :  { %6111 = vmatpush3.bf16.msra.mxu1 %v8856_v22 }
 0xd3e   :  { %6112 = vmatprep.subr.bf16.mxu1 %v8670_v59 }
 0xd41   :  { %6114 = vmatpush3.bf16.msra.mxu1 %v8857_v46 }
 0xd42   :  { %6115 = vmatprep.subr.bf16.mxu1 %v8670_v59 }
 0xdf7   :  { %v3895_v41 = vpop.f32.mrb[40].mxu1 }
 0xdf8   :  { %v3897_v9 = vpop.f32.mrb[41].mxu1 }
 0xdf9   :  { %v8193_v15 = vmax.f32 %v3895_v41, %v3897_v9  ;;  %v8892_v41 = vlaneseq }
 0xdfb   :  { %v3902_v31 = vrot.slane %v8193_v15, 1  ;;  %v4117_v20 = vrot.slane %v8193_v15, 3  ;;  %v4044_v36 = vrot.slane %v8193_v15, 2  ;;  %v4190_v28 = vrot.slane %v8193_v15, 4 }
 0xdfc   :  { %v4412_v9 = vand.u32 127, %v8892_v41 }
 0xdfd   :  { %5023 = vmatmul.mubr.f32.vlgmr.msra.gmra.mrb[42].mxu1 %v3902_v31  ;;  %5128 = vmatmul.mubr.f32.vlgmr.msra.gmra.mrb[32].mxu0 %v4117_v20 }
 0xdfe   :  { %6117 = vmatpush3.bf16.msra.mxu1 %v8858_v12  ;;  %5057 = vmatprep.mubr.msk.f32.mxu1 %vm6632_vm12, %v8557_v18  ;;  %vm4413_vm14 = vcmp.lt.s32.totalorder %v4412_v9, 10 }
 0xdff   :  { %6118 = vmatprep.subr.bf16.mxu1 %v8670_v59  ;;  %6213 = vmatpush3.bf16.msra.mxu0 %v8859_v27 }
 0xe00   :  { %6214 = vmatprep.subr.bf16.mxu0 %v8670_v59  ;;  %5197 = vmatprep.mubr.msk.f32.mxu0 %vm6632_vm12, %v8557_v18 }
 0xe02   :  { %6120 = vmatpush3.bf16.msra.mxu1 %v8860_v39 }
 0xe03   :  { %6121 = vmatprep.subr.bf16.mxu1 %v8670_v59  ;;  %6216 = vmatpush3.bf16.msra.mxu0 %v8861_v42 }
 0xe04   :  { %6217 = vmatprep.subr.bf16.mxu0 %v8670_v59 }
 0xe06   :  { %6123 = vmatpush3.bf16.msra.mxu1 %v8862_v50 }
 0xe07   :  { %6124 = vmatprep.subr.bf16.mxu1 %v8670_v59  ;;  %6219 = vmatpush3.bf16.msra.mxu0 %v8863_v51 }
 0xe08   :  { %6220 = vmatprep.subr.bf16.mxu0 %v8670_v59 }
 0xe0a   :  { %6126 = vmatpush3.bf16.msra.mxu1 %v8864_v56 }
 0xe0b   :  { %6127 = vmatprep.subr.bf16.mxu1 %v8670_v59  ;;  %6222 = vmatpush3.bf16.msra.mxu0 %v8865_v57 }
 0xe0c   :  { %6223 = vmatprep.subr.bf16.mxu0 %v8670_v59 }
 0xe0e   :  { %6129 = vmatpush3.bf16.msra.mxu1 %v8866_v17 }
 0xe0f   :  { %6130 = vmatprep.subr.bf16.mxu1 %v8670_v59  ;;  %6225 = vmatpush3.bf16.msra.mxu0 %v8867_v19 }
 0xe10   :  { %6226 = vmatprep.subr.bf16.mxu0 %v8670_v59 }
 0xe12   :  { %6132 = vmatpush3.bf16.msra.mxu1 %v8868_v37 }
 0xe13   :  { %6133 = vmatprep.subr.bf16.mxu1 %v8670_v59  ;;  %6228 = vmatpush3.bf16.msra.mxu0 %v8869_v35 }
 0xe14   :  { %6229 = vmatprep.subr.bf16.mxu0 %v8670_v59 }
 0xe16   :  { %6135 = vmatpush3.bf16.msra.mxu1 %v8870_v49 }
 0xe17   :  { %6136 = vmatprep.subr.bf16.mxu1 %v8670_v59  ;;  %6231 = vmatpush3.bf16.msra.mxu0 %v8871_v14 }
 0xe18   :  { %6232 = vmatprep.subr.bf16.mxu0 %v8670_v59 }
 0xe1a   :  { %6138 = vmatpush3.bf16.msra.mxu1 %v8872_v44 }
 0xe1b   :  { %6139 = vmatprep.subr.bf16.mxu1 %v8670_v59  ;;  %6234 = vmatpush3.bf16.msra.mxu0 %v8873_v33 }
 0xe1d   :  { %5058 = vmatmul.mubr.f32.vlgmr.msra.gmra.mrb[44].mxu1 %v8193_v15  ;;  %v343_v15 = vld [vmem:[%s8325_s14] sm:$0x1] }
 0xe1e   :  { %6141 = vmatpush3.bf16.msra.mxu1 %v8874_v10  ;;  %5092 = vmatprep.mubr.msk.f32.mxu1 %vm6632_vm12, %v8557_v18  ;;  %v2542_v27 = vadd.f32 %v8003_v54, %v343_v15 }
 0xe1f   :  { %6142 = vmatprep.subr.bf16.mxu1 %v8670_v59 }
 0xe22   :  { %6144 = vmatpush3.bf16.msra.mxu1 %v8875_v45 }
 0xe23   :  { %6145 = vmatprep.subr.bf16.mxu1 %v8670_v59 }
 0xe26   :  { %6147 = vmatpush3.bf16.msra.mxu1 %v8876_v63 }
 0xe27   :  { %6148 = vmatprep.subr.bf16.mxu1 %v8670_v59 }
 0xe2a   :  { %6150 = vmatpush3.bf16.msra.mxu1 %v8877_v32 }
 0xe2b   :  { %6151 = vmatprep.subr.bf16.mxu1 %v8670_v59 }
 0xe2e   :  { %6153 = vmatpush3.bf16.msra.mxu1 %v8878_v3 }
 0xe2f   :  { %6154 = vmatprep.subr.bf16.mxu1 %v8670_v59 }
 0xe32   :  { %6156 = vmatpush3.bf16.msra.mxu1 %v8879_v38 }
 0xe33   :  { %6157 = vmatprep.subr.bf16.mxu1 %v8670_v59 }
 0xe36   :  { %6159 = vmatpush3.bf16.msra.mxu1 %v8880_v11 }
 0xe37   :  { %6160 = vmatprep.subr.bf16.mxu1 %v8670_v59 }
 0xe3a   :  { %6162 = vmatpush3.bf16.msra.mxu1 %v8881_v6 }
 0xe3b   :  { %6187 = vmatprep.subr.bf16.mxu1 %v8670_v59 }
 0xe3d   :  { %5093 = vmatmul.mubr.f32.vlgmr.msra.gmra.mrb[46].mxu1 %v4044_v36 }
 0xe3e   :  { %6189 = vmatpush3.bf16.msra.mxu1 %v8882_v16  ;;  %5162 = vmatprep.mubr.msk.f32.mxu1 %vm6632_vm12, %v8557_v18 }
 0xe3f   :  { %6190 = vmatprep.subr.bf16.mxu1 %v8670_v59 }
 0xe42   :  { %6192 = vmatpush3.bf16.msra.mxu1 %v8883_v7 }
 0xe43   :  { %6193 = vmatprep.subr.bf16.mxu1 %v8670_v59 }
 0xe46   :  { %6195 = vmatpush3.bf16.msra.mxu1 %v8884_v34 }
 0xe47   :  { %6196 = vmatprep.subr.bf16.mxu1 %v8670_v59 }
 0xe4a   :  { %6198 = vmatpush3.bf16.msra.mxu1 %v8885_v62 }
 0xe4b   :  { %6199 = vmatprep.subr.bf16.mxu1 %v8670_v59 }
 0xe4e   :  { %6201 = vmatpush3.bf16.msra.mxu1 %v8886_v29 }
 0xe4f   :  { %6202 = vmatprep.subr.bf16.mxu1 %v8670_v59 }
 0xe52   :  { %6204 = vmatpush3.bf16.msra.mxu1 %v8887_v5 }
 0xe53   :  { %6205 = vmatprep.subr.bf16.mxu1 %v8670_v59 }
 0xe56   :  { %6207 = vmatpush3.bf16.msra.mxu1 %v8888_v47 }
 0xe57   :  { %6208 = vmatprep.subr.bf16.mxu1 %v8670_v59 }
 0xe5a   :  { %6210 = vmatpush3.bf16.msra.mxu1 %v8889_v1 }
 0xe5b   :  { %6235 = vmatprep.subr.bf16.mxu1 %v8670_v59 }
 0xe5d   :  { %5163 = vmatmul.mubr.f32.vlgmr.msra.gmra.mrb[48].mxu1 %v4190_v28 }
 0xe5e   :  { %6237 = vmatpush3.bf16.msra.mxu1 %v8890_v21  ;;  %5232 = vmatprep.mubr.msk.f32.mxu1 %vm6632_vm12, %v8557_v18  ;;  %v8891_v18 = vld [vmem:[#allocation202_spill] sm:$0xff] }
 0xe5f   :  { %6238 = vmatprep.subr.bf16.mxu1 %v8670_v59 }
 0xe62   :  { %6240 = vmatpush3.bf16.msra.mxu1 %v7807_v2 }
 0xe63   :  { %6241 = vmatprep.subr.bf16.mxu1 %v8670_v59 }
 0xe66   :  { %6243 = vmatpush3.bf16.msra.mxu1 %v7811_v4 }
 0xe67   :  { %6244 = vmatprep.subr.bf16.mxu1 %v8670_v59 }
 0xe6a   :  { %6246 = vmatpush3.bf16.msra.mxu1 %v7815_v48 }
 0xe6b   :  { %6247 = vmatprep.subr.bf16.mxu1 %v8670_v59 }
 0xe6e   :  { %6249 = vmatpush3.bf16.msra.mxu1 %v7819_v25 }
 0xe6f   :  { %6250 = vmatprep.subr.bf16.mxu1 %v8670_v59 }
 0xe72   :  { %6252 = vmatpush3.bf16.msra.mxu1 %v7823_v55 }
 0xe73   :  { %6253 = vmatprep.subr.bf16.mxu1 %v8670_v59 }
 0xe76   :  { %6255 = vmatpush3.bf16.msra.mxu1 %v8891_v18 }
 0xe77   :  { %6256 = vmatprep.subr.bf16.mxu1 %v8670_v59  ;;  %v6383_v59 = vld [vmem:[%s8321_s10] sm:$0x1]  ;;  %s6633_s10 = smov [#allocation17]  }
 0xe78   :  { %s4434_s14 = sshll.u32 %s6633_s10, 4  ;;  %s4435_s14 = int_to_ptr.vmem [resolvable:$true] %s4434_s14 }
 0xe79   :  { %s6582_s8 = scalar_lea.vmem %s4435_s14, 32  ;;  %p6587_p3 = scmp.lt.s32.totalorder %s4435_s14, %s4435_s14 }
 0xe7a   :  { %6258 = vmatpush3.bf16.msra.mxu1 %v7931_v53  ;;  %p6583_p2 = scmp.ne.s32.totalorder %s4435_s14, %s6582_s8  ;;  %p6588_p4 = scmp.lt.s32.totalorder %s6582_s8, %s6582_s8 }
 0xe7c   :  { %p6589_p5 = por %p6588_p4, %p6587_p3 }
 0xe7e   :  { %p6590_p6 = pnand %p6589_p5, %p6583_p2 }
 0xed0   :  { %v3970_v2 = vpop.f32.mrb[42].mxu1  ;;  %v4185_v4 = vpop.f32.mrb[32].mxu0 }
 0xed1   :  { %v5024_v40 = vpop.f32.mrb[43].mxu1  ;;  %v5129_v48 = vpop.f32.mrb[33].mxu0 }
 0xef0   :  { %v4040_v60 = vpop.f32.mrb[44].mxu1 }
 0xef1   :  { %v4041_v13 = vadd.f32 %v4040_v60, %v3970_v2  ;;  %v5059_v23 = vpop.f32.mrb[45].mxu1 }
 0xf10   :  { %v4112_v25 = vpop.f32.mrb[46].mxu1 }
 0xf11   :  { %v4116_v58 = vadd.f32 %v4112_v25, %v4041_v13  ;;  %v5094_v24 = vpop.f32.mrb[47].mxu1 }
 0xf13   :  { %v4189_v26 = vadd.f32 %v4185_v4, %v4116_v58 }
 0xf30   :  { %v4258_v55 = vpop.f32.mrb[48].mxu1 }
 0xf31   :  { %v4262_v43 = vadd.f32 %v4258_v55, %v4189_v26  ;;  %v5164_v52 = vpop.f32.mrb[49].mxu1 }
 0xf33   :  { %v4263_v30 = vadd.f32 %v6383_v59, %v4262_v43 }
 0xf35   :  { %v4264_v53 = vmax.f32 %v4263_v30, 0.0 }
 0xf37   :  { %5198 = vmatmul.mubr.f32.vlgmr.msra.gmra.mrb[34].mxu0 %v4264_v53 }
0x100a   :  { %v4331_v61 = vpop.f32.mrb[34].mxu0 }
0x100b   :  { %v4332_v8 = vadd.f32 %v4331_v61, %v7948_v0  ;;  %v5199_v22 = vpop.f32.mrb[35].mxu0 }
0x100d   :  { %v4335_v46 = vmax.f32 %v4332_v8, 0.0 }
0x100f   :  { %5233 = vmatmul.mubr.f32.vlgmr.msra.gmra.mrb[50].mxu1 %v4335_v46 }
0x10e2   :  { %v4402_v31 = vpop.f32.mrb[50].mxu1 }
0x10e3   :  { %v4403_v20 = vadd.f32 %v4402_v31, %v343_v15  ;;  %v5234_v12 = vpop.f32.mrb[51].mxu1 }
0x10e5   :  { %v4407_v39 = vrot.slane %v4403_v20, 7 }
0x10e7   :  { %v4410_v42 = vsel %vm4409_vm13, %v2542_v27, %v4407_v39 }
0x10e8   :  { %v4414_v50 = vsel %vm4413_vm14, %v4410_v42, -1e+30 }
0x10e9   :  { %v4415_v0 = vsel %vm1079_vm8, %v4414_v50, -inf }
0x10ea   :  { %4416 = vmax.xlane.f32.xlu0 %v4415_v0 }
0x1177   :  { %v4417_v51 = vpop.xlane.xlu0 %4416 }
0x1178   :  { %v4418_v56 = vsub.f32 %v4414_v50, %v4417_v51 }
0x117a   :  { %v4419_v57 = vmul.f32 1.442695, %v4418_v56 }
0x117c   :  { %6373 = vpow2.f32 %v4419_v57 }
0x1186   :  { %v6374_v17 = vpop.eup %6373 }
0x1187   :  { %v4421_v19 = vsel %vm1079_vm8, %v6374_v17, 0.0 }
0x1188   :  { %4422 = vadd.xlane.f32.xlu0 %v4421_v19 }
0x1215   :  { %v4423_v37 = vpop.xlane.xlu0 %4422 }
0x1216   :  { %6375 = vlog2.f32 %v4423_v37 }
0x1220   :  { %v6376_v35 = vpop.eup %6375 }
0x1221   :  { %v4425_v54 = vmul.f32 0.6931472, %v6376_v35 }
0x1223   :  { %v4426_v49 = vsub.f32 %v4418_v56, %v4425_v54 }
0x1225   :  { %4427 = vst [vmem:[#allocation17] sm:$0x3] %v4426_v49 }
0x1226   :  { %6593 = shalt.err (!%p6590_p6)
}
0x1227   :  { %s8893_s26 = sld [smem:[#allocation203_spill]] }
0x122d   :  { %s6594_s3 = scalar_lea.hbm %s8893_s26, 32 }
0x122e   :  { %p6595_p7 = scmp.ne.s32.totalorder %s8893_s26, %s6594_s3  ;;  %p6598_p8 = scmp.lt.u32.totalorder %s6594_s3, %s8893_s26 }
0x1230   :  { %p6600_p9 = pnand %p6598_p8, %p6595_p7 }
0x1232   :  { %6603 = shalt.err (!%p6600_p9)
}
0x1233   :  { %4437 = dma.vmem_to_hbm [thread:$0]  %s4435_s14, 32, %s8893_s26, [#allocation4]  }
0x1234   :  { %6614 = dma.done.wait [#allocation4], 32  }
0x1235   :  { %6615 = vsyncadd [#allocation4], 4294967264 }
0x1236   :  { %4441 = vsyncpa [#allocation3], 1 }
0x1237   :  { %4442 = vsyncpa [#allocation6], 1 }
0x1238   :  { %4443 = vsyncpa [#allocation9], 1 }
0x1239   :  { %4444 = vsyncpa [#allocation12], 1 }
0x123a   :  { %4445 = vsyncpa [#allocation15], 1 }
0x123b   :  { %4446 = vsyncpa [#allocation4], 1 }

</bundles_post_ra>
